<compile_context>
chip_gen: v5e
topology: v5e:2x2
jax: 0.10.0
libtpu: 0.0.40
codegen_flags: <defaults>
</compile_context>

<pallas_src>
import jax
import jax.numpy as jnp
import numpy as np
from jax.experimental import pallas as pl
from jax.experimental.pallas import tpu as pltpu

OH, OW = 7, 7            # floor((14 + 2*1 - 3)/2) + 1 = 7
OHP, OWP = 8, 8          # padded output grid (row/col 7 discarded)
KH, KW = 3, 3
CIN, COUT = 256, 512
KDIM = KH * KW * CIN     # 2304


def relu_conv_kernel(p_ref, w_ref, o_ref):
    # p_ref: (64, 2304)      bf16  im2col patches (same block every grid step -> DMA'd once)
    # w_ref: (2304, COUT_BLK) bf16  one contiguous COUT slab of the im2col weight matrix
    # o_ref: (64, COUT_BLK)   f32   one COUT block of the padded output slab
    o_ref[...] = jnp.dot(p_ref[...], w_ref[...],      # one MXU matmul, f32 accumulation
                         preferred_element_type=jnp.float32)


def pick_nsplit():
    # COUT split only pays on 2-TensorCore chips (v7x): each TC pulls half the weight
    # bytes.  On 1-TC chips (v5e/v6e) it just adds ~0.35 us of grid-step overhead.
    try:
        kind = jax.devices()[0].device_kind.lower()
    except Exception:
        kind = ""
    return 2 if "7" in kind else 1


def prepare_weights(w_hwio, nsplit):
    # Done once, host/XLA side: HWIO (3,3,256,512) -> im2col (2304,512) bf16, then
    # split COUT into `nsplit` CONTIGUOUS slabs (nsplit, 2304, 512/nsplit) so each
    # grid step's weight DMA is one contiguous transfer instead of 2304 strided runs.
    w2 = jnp.asarray(w_hwio, jnp.bfloat16).reshape(KDIM, COUT)
    return jnp.transpose(w2.reshape(KDIM, nsplit, COUT // nsplit), (1, 0, 2))


@jax.jit
def relu_conv2d(x_nchw, w_slabs):
    nsplit, kdim, cout_blk = w_slabs.shape            # static under jit

    # ---- layout-only prep (no arithmetic beyond the hoisted ReLU) ----
    # ReLU is applied here (fuses into the transpose/cast/pad fusion on the small
    # 14x14x256 source) instead of inside the kernel on the 9x-duplicated patches.
    # ReLU(zero-padding) == zero-padding and ReLU commutes with bf16 rounding.
    x_hwc = jnp.maximum(jnp.transpose(x_nchw[0], (1, 2, 0)), 0.0).astype(jnp.bfloat16)
    pad = jnp.pad(x_hwc, ((1, 3), (1, 3), (0, 0)))                      # (18, 18, 256)
    cols = [pad[kh:kh + 2 * OHP:2, kw:kw + 2 * OWP:2, :].reshape(OHP * OWP, CIN)
            for kh in range(KH) for kw in range(KW)]
    patches = jnp.concatenate(cols, axis=1)                             # (64, 2304) bf16

    out = pl.pallas_call(
        relu_conv_kernel,
        out_shape=jax.ShapeDtypeStruct((OHP * OWP, COUT), jnp.float32),
        grid=(nsplit,),
        in_specs=[
            # patches: same block every step -> stays resident, DMA'd once
            pl.BlockSpec((OHP * OWP, kdim), lambda j: (0, 0)),
            # weights: contiguous per-step slab, leading (split) dim squeezed away
            pl.BlockSpec((None, kdim, cout_blk), lambda j: (j, 0, 0)),
        ],
        out_specs=pl.BlockSpec((OHP * OWP, cout_blk), lambda j: (0, j)),
        compiler_params=pltpu.CompilerParams(
            # v7x: shard the 2 COUT slabs across the 2 TensorCores.
            # (If tracing shows it running sequentially, switch to CORE_PARALLEL /
            #  pl.core_map per the review.)
            dimension_semantics=(("parallel",) if nsplit > 1 else ("arbitrary",))),
    )(patches, w_slabs)                                                 # (64, 512) f32

    out = out.reshape(OHP, OWP, COUT)[:OH, :OW]        # trim padded row/col 7
    return jnp.transpose(out, (2, 0, 1))[None]         # (1, 512, 7, 7) NCHW


if __name__ == "__main__":
    key = jax.random.PRNGKey(0)
    kx, kw_key = jax.random.split(key)

    # deterministic inputs / parameters (shapes fixed by the module: 256->512, 3x3, 14x14)
    x = jax.random.normal(kx, (1, CIN, 14, 14), dtype=jnp.float32)
    bound = 1.0 / np.sqrt(CIN * KH * KW)                               # kaiming-uniform-like scale
    w_hwio = jax.random.uniform(kw_key, (KH, KW, CIN, COUT), jnp.float32,
                                minval=-bound, maxval=bound)

    nsplit = pick_nsplit()                                             # 2 on v7x, else 1
    w_slabs = jax.block_until_ready(prepare_weights(w_hwio, nsplit))   # bf16, packed once
    y = jax.block_until_ready(relu_conv2d(x, w_slabs))
    assert y.shape == (1, COUT, OH, OW), y.shape

    # reference: relu -> conv (NCHW / OIHW) in f32, matching PyTorch semantics
    w_oihw = jnp.transpose(w_hwio, (3, 2, 0, 1))                       # (512, 256, 3, 3)
    y_ref = jax.lax.conv_general_dilated(
        jnp.maximum(x, 0.0), w_oihw, window_strides=(2, 2),
        padding=((1, 1), (1, 1)),
        dimension_numbers=('NCHW', 'OIHW', 'NCHW'),
        precision=jax.lax.Precision.HIGHEST)
    # bf16 inputs/weights with f32 accumulation over K=2304: observed error << 1e-2
    np.testing.assert_allclose(np.asarray(y), np.asarray(y_ref), rtol=1e-2, atol=1e-2)

    print("KERNEL_OK")
</pallas_src>

<mosaic_0001>
module attributes {stable_mosaic.version = 11 : i64} {
  func.func @relu_conv_kernel(%arg0: i32, %arg1: memref<64x2304xbf16, #tpu.memory_space<vmem>>, %arg2: memref<1x2304x512xbf16, #tpu.memory_space<vmem>>, %arg3: memref<64x512xf32, #tpu.memory_space<vmem>>) attributes {dimension_semantics = [#tpu.dimension_semantics<arbitrary>], iteration_bounds = array<i64: 1>, scalar_prefetch = 0 : i64, scratch_operands = 0 : i64, tpu.core_type = #tpu.core_type<tc>, window_params = [{pipeline_mode = #tpu.pipeline_mode<synchronous>, transform_indices = @transform_0, window_bounds = array<i64: 64, 2304>}, {transform_indices = @transform_1, window_bounds = array<i64: 1, 2304, 512>}, {transform_indices = @transform_2, window_bounds = array<i64: 64, 512>}]} {
    %c0 = arith.constant 0 : index
    %c0_0 = arith.constant 0 : index
    %0 = vector.load %arg1[%c0, %c0_0] : memref<64x2304xbf16, #tpu.memory_space<vmem>>, vector<64x2304xbf16>
    %c0_1 = arith.constant 0 : index
    %c0_2 = arith.constant 0 : index
    %c0_3 = arith.constant 0 : index
    %1 = vector.load %arg2[%c0_1, %c0_2, %c0_3] : memref<1x2304x512xbf16, #tpu.memory_space<vmem>>, vector<1x2304x512xbf16>
    %2 = vector.shape_cast %1 : vector<1x2304x512xbf16> to vector<2304x512xbf16>
    %cst = arith.constant dense<0.000000e+00> : vector<64x512xf32>
    %3 = tpu.matmul %0, %2, %cst {dimension_numbers = #tpu.dot_dimension_numbers<[1], [0], [0], [1], [0, 0, 1, 1], [], []>} : vector<64x2304xbf16>, vector<2304x512xbf16>, vector<64x512xf32> -> vector<64x512xf32>
    %c0_4 = arith.constant 0 : index
    %c0_5 = arith.constant 0 : index
    %4 = vector.load %arg3[%c0_4, %c0_5] : memref<64x512xf32, #tpu.memory_space<vmem>>, vector<64x512xf32>
    tpu.vector_store %arg3[%c0_4, %c0_5], %3 {strides = array<i32>} : memref<64x512xf32, #tpu.memory_space<vmem>>, vector<64x512xf32>,
    return
  }
  func.func @transform_0(%arg0: i32) -> (i32, i32) {
    %c0_i32 = arith.constant 0 : i32
    %c0_i32_0 = arith.constant 0 : i32
    %c0_i32_1 = arith.constant 0 : i32
    return %c0_i32, %c0_i32_0 : i32, i32
  }
  func.func @transform_1(%arg0: i32) -> (i32, i32, i32) {
    %c0_i32 = arith.constant 0 : i32
    %c0_i32_0 = arith.constant 0 : i32
    %c0_i32_1 = arith.constant 0 : i32
    return %arg0, %c0_i32, %c0_i32_0 : i32, i32, i32
  }
  func.func @transform_2(%arg0: i32) -> (i32, i32) {
    %c0_i32 = arith.constant 0 : i32
    %c0_i32_0 = arith.constant 0 : i32
    return %c0_i32, %arg0 : i32, i32
  }
}

</mosaic_0001>

<bundles_post_ra>
// kernel: relu_conv2d.1
= control target key start
LH: loop header
LB: loop body
LE: loop exit
PB: predicated region body
PF: predicated region fallthrough
CT: control target
= control target key end

     0   :  { %7 = vsyncpa [#allocation3], 0  ;;  %s9309_s12 = smov [#allocation2]   ;;  %s9310_s14 = smov 256   ;;  %s10902_s0 = inlined_call_operand.vmem [shape: bf16[64,2304], index: 0, kind: input, shape index: {}]   ;;  %s10903_s1 = inlined_call_operand.hbm [shape: bf16[1,2304,512], index: 1, kind: input, shape index: {}]   ;;  %s10904_s2 = inlined_call_operand.vmem [shape: f32[64,512], index: 2, kind: output, shape index: {}]  }
   0x1   :  { %s14_s11 = sshll.u32 %s10903_s1, 4  ;;  %s16_s13 = sshll.u32 %s9309_s12, 4  ;;  %s15_s11 = int_to_ptr.hbm [resolvable:$true] %s14_s11  ;;  %s17_s13 = int_to_ptr.vmem [resolvable:$true] %s16_s13 }
   0x2   :  { %s9311_s15 = smov 16  }
   0x3   :  { %22 = dma.hbm_to_vmem [thread:$0]  %s15_s11, 73728, %s17_s13, [#allocation3], %s9310_s14, %s9310_s14, %s9311_s15  }
   0x4   :  { %9307 = dma.done.wait [#allocation3], 73728  }
   0x5   :  { %9308 = vsyncadd [#allocation3], 4294893568  ;;  %v6442_v0 = vld [vmem:[#allocation2 + $0xe0] sm:$0xf]  ;;  %v8734_v1 = vld [vmem:[#allocation2 + $0xec] sm:$0xf0] }
   0x6   :  { %v6570_v2 = vld [vmem:[#allocation2 + $0x1e0] sm:$0xf]  ;;  %v6443_v3 = vor.u32 %v8734_v1, %v6442_v0  ;;  %v8766_v4 = vld [vmem:[#allocation2 + $0x1ec] sm:$0xf0] }
   0x7   :  { %v6698_v5 = vld [vmem:[#allocation2 + $0x2e0] sm:$0xf]  ;;  %v8798_v6 = vld [vmem:[#allocation2 + $0x2ec] sm:$0xf0]  ;;  %v6571_v7 = vor.u32 %v8766_v4, %v6570_v2 }
   0x8   :  { %v6699_v8 = vor.u32 %v8798_v6, %v6698_v5  ;;  %v6826_v9 = vld [vmem:[#allocation2 + $0x3e0] sm:$0xf]  ;;  %v8830_v10 = vld [vmem:[#allocation2 + $0x3ec] sm:$0xf0]  ;;  %3915 = vmatpush.bf16.msra.mxu0 %v6443_v3 }
   0x9   :  { %v6426_v11 = vld [vmem:[#allocation2 + $0xc0] sm:$0xf]  ;;  %v6827_v12 = vor.u32 %v8830_v10, %v6826_v9  ;;  %v8730_v13 = vld [vmem:[#allocation2 + $0xcc] sm:$0xf0]  ;;  %3944 = vmatpush.bf16.msra.mxu1 %v6571_v7 }
   0xa   :  { %v6554_v14 = vld [vmem:[#allocation2 + $0x1c0] sm:$0xf]  ;;  %v8762_v15 = vld [vmem:[#allocation2 + $0x1cc] sm:$0xf0]  ;;  %3973 = vmatpush.bf16.msra.mxu2 %v6699_v8  ;;  %v6427_v16 = vor.u32 %v8730_v13, %v6426_v11 }
   0xb   :  { %v6555_v17 = vor.u32 %v8762_v15, %v6554_v14  ;;  %v6682_v18 = vld [vmem:[#allocation2 + $0x2c0] sm:$0xf]  ;;  %v8794_v19 = vld [vmem:[#allocation2 + $0x2cc] sm:$0xf0]  ;;  %4002 = vmatpush.bf16.msra.mxu3 %v6827_v12 }
   0xc   :  { %v6810_v20 = vld [vmem:[#allocation2 + $0x3c0] sm:$0xf]  ;;  %v6683_v21 = vor.u32 %v8794_v19, %v6682_v18  ;;  %v8826_v22 = vld [vmem:[#allocation2 + $0x3cc] sm:$0xf0]  ;;  %3916 = vmatpush.bf16.msra.mxu0 %v6427_v16 }
   0xd   :  { %v6410_v23 = vld [vmem:[#allocation2 + $0xa0] sm:$0xf]  ;;  %v8726_v24 = vld [vmem:[#allocation2 + $0xac] sm:$0xf0]  ;;  %v6811_v25 = vor.u32 %v8826_v22, %v6810_v20  ;;  %3945 = vmatpush.bf16.msra.mxu1 %v6555_v17 }
   0xe   :  { %v6538_v26 = vld [vmem:[#allocation2 + $0x1a0] sm:$0xf]  ;;  %v8758_v27 = vld [vmem:[#allocation2 + $0x1ac] sm:$0xf0]  ;;  %v6411_v29 = vor.u32 %v8726_v24, %v6410_v23  ;;  %3974 = vmatpush.bf16.msra.mxu2 %v6683_v21 }
   0xf   :  { %v6666_v28 = vld [vmem:[#allocation2 + $0x2a0] sm:$0xf]  ;;  %v8790_v30 = vld [vmem:[#allocation2 + $0x2ac] sm:$0xf0]  ;;  %v6539_v33 = vor.u32 %v8758_v27, %v6538_v26  ;;  %4003 = vmatpush.bf16.msra.mxu3 %v6811_v25 }
  0x10   :  { %v6794_v31 = vld [vmem:[#allocation2 + $0x3a0] sm:$0xf]  ;;  %v8822_v32 = vld [vmem:[#allocation2 + $0x3ac] sm:$0xf0]  ;;  %v6667_v34 = vor.u32 %v8790_v30, %v6666_v28  ;;  %3917 = vmatpush.bf16.msra.mxu0 %v6411_v29  ;;  %v8641_v29 = vld [vmem:[%s10902_s0 + $0x44] sm:$0xf0] }
  0x11   :  { %v6394_v35 = vld [vmem:[#allocation2 + $0x80] sm:$0xf]  ;;  %v8722_v36 = vld [vmem:[#allocation2 + $0x8c] sm:$0xf0]  ;;  %v6795_v38 = vor.u32 %v8822_v32, %v6794_v31  ;;  %3946 = vmatpush.bf16.msra.mxu1 %v6539_v33  ;;  %v8632_v30 = vld [vmem:[%s10902_s0 + $0x4] sm:$0xf] }
  0x12   :  { %v6522_v37 = vld [vmem:[#allocation2 + $0x180] sm:$0xf]  ;;  %v8754_v39 = vld [vmem:[#allocation2 + $0x18c] sm:$0xf0]  ;;  %v6395_v44 = vor.u32 %v8722_v36, %v6394_v35  ;;  %3975 = vmatpush.bf16.msra.mxu2 %v6667_v34  ;;  %v6044_v31 = vld [vmem:[%s10902_s0 + $0x48] sm:$0xf0] }
  0x13   :  { %v6650_v40 = vld [vmem:[#allocation2 + $0x280] sm:$0xf]  ;;  %v8786_v41 = vld [vmem:[#allocation2 + $0x28c] sm:$0xf0]  ;;  %v6523_v45 = vor.u32 %v8754_v39, %v6522_v37  ;;  %4004 = vmatpush.bf16.msra.mxu3 %v6795_v38  ;;  %v6050_v35 = vld [vmem:[%s10902_s0 + $0x8] sm:$0xf] }
  0x14   :  { %v6778_v42 = vld [vmem:[#allocation2 + $0x380] sm:$0xf]  ;;  %v8818_v43 = vld [vmem:[#allocation2 + $0x38c] sm:$0xf0]  ;;  %v6651_v46 = vor.u32 %v8786_v41, %v6650_v40  ;;  %3918 = vmatpush.bf16.msra.mxu0 %v6395_v44  ;;  %v8633_v41 = vld [vmem:[%s10902_s0 + $0xc] sm:$0xf] }
  0x15   :  { %v6378_v47 = vld [vmem:[#allocation2 + $0x60] sm:$0xf]  ;;  %v8718_v48 = vld [vmem:[#allocation2 + $0x6c] sm:$0xf0]  ;;  %v6779_v50 = vor.u32 %v8818_v43, %v6778_v42  ;;  %3947 = vmatpush.bf16.msra.mxu1 %v6523_v45  ;;  %v6052_v42 = vld [vmem:[%s10902_s0 + $0x50] sm:$0xf0] }
  0x16   :  { %v6506_v49 = vld [vmem:[#allocation2 + $0x160] sm:$0xf]  ;;  %v8750_v51 = vld [vmem:[#allocation2 + $0x16c] sm:$0xf0]  ;;  %v6379_v56 = vor.u32 %v8718_v48, %v6378_v47  ;;  %3976 = vmatpush.bf16.msra.mxu2 %v6651_v46 }
  0x17   :  { %v6634_v52 = vld [vmem:[#allocation2 + $0x260] sm:$0xf]  ;;  %v8782_v53 = vld [vmem:[#allocation2 + $0x26c] sm:$0xf0]  ;;  %v6507_v57 = vor.u32 %v8750_v51, %v6506_v49  ;;  %4005 = vmatpush.bf16.msra.mxu3 %v6779_v50 }
  0x18   :  { %v6762_v54 = vld [vmem:[#allocation2 + $0x360] sm:$0xf]  ;;  %v8814_v55 = vld [vmem:[#allocation2 + $0x36c] sm:$0xf0]  ;;  %v6635_v58 = vor.u32 %v8782_v53, %v6634_v52  ;;  %3919 = vmatpush.bf16.msra.mxu0 %v6379_v56  ;;  %v9356_v53 = vor.u32 %v8632_v30, %v6044_v31 }
  0x19   :  { %v6362_v59 = vld [vmem:[#allocation2 + $0x40] sm:$0xf]  ;;  %v8714_v60 = vld [vmem:[#allocation2 + $0x4c] sm:$0xf0]  ;;  %v6763_v62 = vor.u32 %v8814_v55, %v6762_v54  ;;  %3948 = vmatpush.bf16.msra.mxu1 %v6507_v57  ;;  %v9360_v57 = vor.u32 %v8633_v41, %v6052_v42 }
  0x1a   :  { %v6490_v61 = vld [vmem:[#allocation2 + $0x140] sm:$0xf]  ;;  %v8746_v63 = vld [vmem:[#allocation2 + $0x14c] sm:$0xf0]  ;;  %v6363_v4 = vor.u32 %v8714_v60, %v6362_v59  ;;  %3977 = vmatpush.bf16.msra.mxu2 %v6635_v58  ;;  %11041 = vst [vmem:[#allocation6_spill] sm:$0xff] %v9356_v53 }
  0x1b   :  { %v6618_v0 = vld [vmem:[#allocation2 + $0x240] sm:$0xf]  ;;  %v8778_v1 = vld [vmem:[#allocation2 + $0x24c] sm:$0xf0]  ;;  %v6491_v5 = vor.u32 %v8746_v63, %v6490_v61  ;;  %4006 = vmatpush.bf16.msra.mxu3 %v6763_v62  ;;  %11043 = vst [vmem:[#allocation8_spill] sm:$0xff] %v9360_v57 }
  0x1c   :  { %v6746_v2 = vld [vmem:[#allocation2 + $0x340] sm:$0xf]  ;;  %v8810_v3 = vld [vmem:[#allocation2 + $0x34c] sm:$0xf0]  ;;  %v6619_v6 = vor.u32 %v8778_v1, %v6618_v0  ;;  %3920 = vmatpush.bf16.msra.mxu0 %v6363_v4 }
  0x1d   :  { %v6346_v7 = vld [vmem:[#allocation2 + $0x20] sm:$0xf]  ;;  %v8710_v8 = vld [vmem:[#allocation2 + $0x2c] sm:$0xf0]  ;;  %v6747_v10 = vor.u32 %v8810_v3, %v6746_v2  ;;  %3949 = vmatpush.bf16.msra.mxu1 %v6491_v5 }
  0x1e   :  { %v6474_v9 = vld [vmem:[#allocation2 + $0x120] sm:$0xf]  ;;  %v8742_v11 = vld [vmem:[#allocation2 + $0x12c] sm:$0xf0]  ;;  %v6347_v17 = vor.u32 %v8710_v8, %v6346_v7  ;;  %3978 = vmatpush.bf16.msra.mxu2 %v6619_v6 }
  0x1f   :  { %v6602_v12 = vld [vmem:[#allocation2 + $0x220] sm:$0xf]  ;;  %v8774_v13 = vld [vmem:[#allocation2 + $0x22c] sm:$0xf0]  ;;  %v6475_v21 = vor.u32 %v8742_v11, %v6474_v9  ;;  %4007 = vmatpush.bf16.msra.mxu3 %v6747_v10 }
  0x20   :  { %v6730_v14 = vld [vmem:[#allocation2 + $0x320] sm:$0xf]  ;;  %v8806_v15 = vld [vmem:[#allocation2 + $0x32c] sm:$0xf0]  ;;  %v6603_v22 = vor.u32 %v8774_v13, %v6602_v12  ;;  %3921 = vmatpush.bf16.msra.mxu0 %v6347_v17 }
  0x21   :  { %v6330_v16 = vld [vmem:[#allocation2] sm:$0xf]  ;;  %v8706_v18 = vld [vmem:[#allocation2 + $0xc] sm:$0xf0]  ;;  %v6731_v26 = vor.u32 %v8806_v15, %v6730_v14  ;;  %3950 = vmatpush.bf16.msra.mxu1 %v6475_v21 }
  0x22   :  { %v6458_v19 = vld [vmem:[#allocation2 + $0x100] sm:$0xf]  ;;  %v8738_v20 = vld [vmem:[#allocation2 + $0x10c] sm:$0xf0]  ;;  %v6331_v34 = vor.u32 %v8706_v18, %v6330_v16  ;;  %3979 = vmatpush.bf16.msra.mxu2 %v6603_v22 }
  0x23   :  { %v6586_v23 = vld [vmem:[#allocation2 + $0x200] sm:$0xf]  ;;  %v8770_v24 = vld [vmem:[#allocation2 + $0x20c] sm:$0xf0]  ;;  %v6459_v38 = vor.u32 %v8738_v20, %v6458_v19  ;;  %4008 = vmatpush.bf16.msra.mxu3 %v6731_v26  ;;  %v8659_v20 = vld [vmem:[%s10902_s0 + $0xd4] sm:$0xf0] }
  0x24   :  { %v6714_v25 = vld [vmem:[#allocation2 + $0x300] sm:$0xf]  ;;  %v8802_v27 = vld [vmem:[#allocation2 + $0x30c] sm:$0xf0]  ;;  %v6587_v39 = vor.u32 %v8770_v24, %v6586_v23  ;;  %3922 = vmatpush.bf16.msra.mxu0 %v6331_v34  ;;  %v8650_v26 = vld [vmem:[%s10902_s0 + $0x94] sm:$0xf] }
  0x25   :  { %v6042_v28 = vld [vmem:[%s10902_s0] sm:$0xf]  ;;  %v8926_v33 = vld [vmem:[#allocation2 + $0x6ec] sm:$0xf0]  ;;  %v6715_v43 = vor.u32 %v8802_v27, %v6714_v25  ;;  %3951 = vmatpush.bf16.msra.mxu1 %v6459_v38  ;;  %v6116_v27 = vld [vmem:[%s10902_s0 + $0xd8] sm:$0xf0] }
  0x26   :  { %v7210_v32 = vld [vmem:[#allocation2 + $0x6e0] sm:$0xf]  ;;  %v8958_v37 = vld [vmem:[#allocation2 + $0x7ec] sm:$0xf0]  ;;  %v9354_v48 = vor.u32 %v8641_v29, %v6042_v28  ;;  %3980 = vmatpush.bf16.msra.mxu2 %v6587_v39 }
  0x27   :  { %v7338_v36 = vld [vmem:[#allocation2 + $0x7e0] sm:$0xf]  ;;  %v8642_v40 = vld [vmem:[%s10902_s0 + $0x4c] sm:$0xf0]  ;;  %v7211_v44 = vor.u32 %v8926_v33, %v7210_v32  ;;  %4009 = vmatpush.bf16.msra.mxu3 %v6715_v43  ;;  %v6122_v32 = vld [vmem:[%s10902_s0 + $0x98] sm:$0xf] }
  0x28   :  { %v6954_v45 = vld [vmem:[#allocation2 + $0x4e0] sm:$0xf]  ;;  %v8862_v46 = vld [vmem:[#allocation2 + $0x4ec] sm:$0xf0]  ;;  %11040 = vst [vmem:[#allocation5_spill] sm:$0xff] %v9354_v48  ;;  %v7339_v49 = vor.u32 %v8958_v37, %v7338_v36  ;;  %v9358_v54 = vor.u32 %v8642_v40, %v6050_v35  ;;  %3923 = vmatmul.bf16.vlgmr.msra.gmra.mxu0 %v9354_v48  ;;  %3952 = vmatmul.bf16.vlgmr.msra.gmra.mxu1 %v9356_v53 }
  0x29   :  { %v7082_v47 = vld [vmem:[#allocation2 + $0x5e0] sm:$0xf]  ;;  %v8894_v50 = vld [vmem:[#allocation2 + $0x5ec] sm:$0xf0]  ;;  %v6955_v58 = vor.u32 %v8862_v46, %v6954_v45  ;;  %v8651_v36 = vld [vmem:[%s10902_s0 + $0x9c] sm:$0xf] }
  0x2a   :  { %v7194_v51 = vld [vmem:[#allocation2 + $0x6c0] sm:$0xf]  ;;  %v8922_v52 = vld [vmem:[#allocation2 + $0x6cc] sm:$0xf0]  ;;  %11042 = vst [vmem:[#allocation7_spill] sm:$0xff] %v9358_v54  ;;  %4089 = vmatpush.bf16.msrb.mxu2 %v7211_v44  ;;  %v7083_v59 = vor.u32 %v8894_v50, %v7082_v47  ;;  %4010 = vmatmul.bf16.vlgmr.msra.gmra.mxu3 %v9360_v57  ;;  %v9392_v50 = vor.u32 %v8650_v26, %v6116_v27 }
  0x2b   :  { %v7322_v55 = vld [vmem:[#allocation2 + $0x7c0] sm:$0xf]  ;;  %v8954_v56 = vld [vmem:[#allocation2 + $0x7cc] sm:$0xf0]  ;;  %v7195_v60 = vor.u32 %v8922_v52, %v7194_v51  ;;  %4118 = vmatpush.bf16.msrb.mxu3 %v7339_v49  ;;  %3981 = vmatmul.bf16.vlgmr.msra.gmra.mxu2 %v9358_v54  ;;  %v6124_v37 = vld [vmem:[%s10902_s0 + $0xe0] sm:$0xf0] }
  0x2c   :  { %v6938_v61 = vld [vmem:[#allocation2 + $0x4c0] sm:$0xf]  ;;  %v8858_v62 = vld [vmem:[#allocation2 + $0x4cc] sm:$0xf0]  ;;  %v7323_v0 = vor.u32 %v8954_v56, %v7322_v55  ;;  %4031 = vmatpush.bf16.msrb.mxu0 %v6955_v58  ;;  %4060 = vmatpush.bf16.msrb.mxu1 %v7083_v59  ;;  %11045 = vst [vmem:[#allocation10_spill] sm:$0xff] %v9392_v50  ;;  %v9396_v56 = vor.u32 %v8651_v36, %v6124_v37 }
  0x2d   :  { %v7066_v63 = vld [vmem:[#allocation2 + $0x5c0] sm:$0xf]  ;;  %v8890_v1 = vld [vmem:[#allocation2 + $0x5cc] sm:$0xf0]  ;;  %v6939_v6 = vor.u32 %v8858_v62, %v6938_v61  ;;  %v8677_v27 = vld [vmem:[%s10902_s0 + $0x164] sm:$0xf0] }
  0x2e   :  { %v7178_v2 = vld [vmem:[#allocation2 + $0x6a0] sm:$0xf]  ;;  %v8918_v3 = vld [vmem:[#allocation2 + $0x6ac] sm:$0xf0]  ;;  %4090 = vmatpush.bf16.msrb.mxu2 %v7195_v60  ;;  %v7067_v7 = vor.u32 %v8890_v1, %v7066_v63  ;;  %11047 = vst [vmem:[#allocation12_spill] sm:$0xff] %v9396_v56 }
  0x2f   :  { %v7306_v4 = vld [vmem:[#allocation2 + $0x7a0] sm:$0xf]  ;;  %v8950_v5 = vld [vmem:[#allocation2 + $0x7ac] sm:$0xf0]  ;;  %v7179_v8 = vor.u32 %v8918_v3, %v7178_v2  ;;  %4119 = vmatpush.bf16.msrb.mxu3 %v7323_v0 }
  0x30   :  { %v6922_v9 = vld [vmem:[#allocation2 + $0x4a0] sm:$0xf]  ;;  %v8854_v10 = vld [vmem:[#allocation2 + $0x4ac] sm:$0xf0]  ;;  %v7307_v12 = vor.u32 %v8950_v5, %v7306_v4  ;;  %4032 = vmatpush.bf16.msrb.mxu0 %v6939_v6  ;;  %4061 = vmatpush.bf16.msrb.mxu1 %v7067_v7 }
  0x31   :  { %v7050_v11 = vld [vmem:[#allocation2 + $0x5a0] sm:$0xf]  ;;  %v8886_v13 = vld [vmem:[#allocation2 + $0x5ac] sm:$0xf0]  ;;  %v6923_v18 = vor.u32 %v8854_v10, %v6922_v9 }
  0x32   :  { %v7162_v14 = vld [vmem:[#allocation2 + $0x680] sm:$0xf]  ;;  %v8914_v15 = vld [vmem:[#allocation2 + $0x68c] sm:$0xf0]  ;;  %4091 = vmatpush.bf16.msrb.mxu2 %v7179_v8  ;;  %v7051_v21 = vor.u32 %v8886_v13, %v7050_v11 }
  0x33   :  { %v7290_v16 = vld [vmem:[#allocation2 + $0x780] sm:$0xf]  ;;  %v8946_v17 = vld [vmem:[#allocation2 + $0x78c] sm:$0xf0]  ;;  %v7163_v22 = vor.u32 %v8914_v15, %v7162_v14  ;;  %4120 = vmatpush.bf16.msrb.mxu3 %v7307_v12 }
  0x34   :  { %v6114_v19 = vld [vmem:[%s10902_s0 + $0x90] sm:$0xf]  ;;  %v6906_v23 = vld [vmem:[#allocation2 + $0x480] sm:$0xf]  ;;  %v7291_v28 = vor.u32 %v8946_v17, %v7290_v16  ;;  %4033 = vmatpush.bf16.msrb.mxu0 %v6923_v18  ;;  %4062 = vmatpush.bf16.msrb.mxu1 %v7051_v21 }
  0x35   :  { %v8850_v24 = vld [vmem:[#allocation2 + $0x48c] sm:$0xf0]  ;;  %v7034_v25 = vld [vmem:[#allocation2 + $0x580] sm:$0xf]  ;;  %v9390_v44 = vor.u32 %v8659_v20, %v6114_v19 }
  0x36   :  { %v8882_v29 = vld [vmem:[#allocation2 + $0x58c] sm:$0xf0]  ;;  %v7146_v30 = vld [vmem:[#allocation2 + $0x660] sm:$0xf]  ;;  %v6907_v38 = vor.u32 %v8850_v24, %v6906_v23  ;;  %4092 = vmatpush.bf16.msrb.mxu2 %v7163_v22 }
  0x37   :  { %v8910_v31 = vld [vmem:[#allocation2 + $0x66c] sm:$0xf0]  ;;  %v7274_v33 = vld [vmem:[#allocation2 + $0x760] sm:$0xf]  ;;  %v7035_v39 = vor.u32 %v8882_v29, %v7034_v25  ;;  %11044 = vst [vmem:[#allocation9_spill] sm:$0xff] %v9390_v44  ;;  %4121 = vmatpush.bf16.msrb.mxu3 %v7291_v28 }
  0x38   :  { %v8942_v34 = vld [vmem:[#allocation2 + $0x76c] sm:$0xf0]  ;;  %v8660_v35 = vld [vmem:[%s10902_s0 + $0xdc] sm:$0xf0]  ;;  %v7147_v40 = vor.u32 %v8910_v31, %v7146_v30  ;;  %4034 = vmatpush.bf16.msrb.mxu0 %v6907_v38  ;;  %3957 = vmatmul.bf16.gmra.mxu1 %v9392_v50  ;;  %v8668_v28 = vld [vmem:[%s10902_s0 + $0x124] sm:$0xf] }
  0x39   :  { %v6890_v41 = vld [vmem:[#allocation2 + $0x460] sm:$0xf]  ;;  %v8846_v42 = vld [vmem:[#allocation2 + $0x46c] sm:$0xf0]  ;;  %v7275_v45 = vor.u32 %v8942_v34, %v7274_v33  ;;  %v9394_v51 = vor.u32 %v8660_v35, %v6122_v32  ;;  %4063 = vmatpush.bf16.msrb.mxu1 %v7035_v39  ;;  %3928 = vmatmul.bf16.gmra.mxu0 %v9390_v44  ;;  %v6188_v29 = vld [vmem:[%s10902_s0 + $0x168] sm:$0xf0] }
  0x3a   :  { %v7018_v43 = vld [vmem:[#allocation2 + $0x560] sm:$0xf]  ;;  %v8878_v46 = vld [vmem:[#allocation2 + $0x56c] sm:$0xf0]  ;;  %v6891_v58 = vor.u32 %v8846_v42, %v6890_v41  ;;  %4093 = vmatpush.bf16.msrb.mxu2 %v7147_v40  ;;  %4015 = vmatmul.bf16.gmra.mxu3 %v9396_v56  ;;  %v6194_v30 = vld [vmem:[%s10902_s0 + $0x128] sm:$0xf]  ;;  %v9428_v37 = vor.u32 %v8668_v28, %v6188_v29 }
  0x3b   :  { %v7130_v47 = vld [vmem:[#allocation2 + $0x640] sm:$0xf]  ;;  %v8906_v49 = vld [vmem:[#allocation2 + $0x64c] sm:$0xf0]  ;;  %11046 = vst [vmem:[#allocation11_spill] sm:$0xff] %v9394_v51  ;;  %v7019_v59 = vor.u32 %v8878_v46, %v7018_v43  ;;  %4122 = vmatpush.bf16.msrb.mxu3 %v7275_v45  ;;  %3986 = vmatmul.bf16.gmra.mxu2 %v9394_v51 }
  0x3c   :  { %v7258_v52 = vld [vmem:[#allocation2 + $0x740] sm:$0xf]  ;;  %v8938_v55 = vld [vmem:[#allocation2 + $0x74c] sm:$0xf0]  ;;  %v7131_v60 = vor.u32 %v8906_v49, %v7130_v47  ;;  %4035 = vmatpush.bf16.msrb.mxu0 %v6891_v58  ;;  %v8669_v33 = vld [vmem:[%s10902_s0 + $0x12c] sm:$0xf] }
  0x3d   :  { %v6874_v61 = vld [vmem:[#allocation2 + $0x440] sm:$0xf]  ;;  %v8842_v62 = vld [vmem:[#allocation2 + $0x44c] sm:$0xf0]  ;;  %v7259_v63 = vor.u32 %v8938_v55, %v7258_v52  ;;  %4064 = vmatpush.bf16.msrb.mxu1 %v7019_v59  ;;  %v6196_v34 = vld [vmem:[%s10902_s0 + $0x170] sm:$0xf0] }
  0x3e   :  { %v7002_v0 = vld [vmem:[#allocation2 + $0x540] sm:$0xf]  ;;  %v8874_v1 = vld [vmem:[#allocation2 + $0x54c] sm:$0xf0]  ;;  %v6875_v2 = vor.u32 %v8842_v62, %v6874_v61  ;;  %4094 = vmatpush.bf16.msrb.mxu2 %v7131_v60  ;;  %11049 = vst [vmem:[#allocation14_spill] sm:$0xff] %v9428_v37  ;;  %v9432_v39 = vor.u32 %v8669_v33, %v6196_v34 }
  0x3f   :  { %v7114_v3 = vld [vmem:[#allocation2 + $0x620] sm:$0xf]  ;;  %v8902_v4 = vld [vmem:[#allocation2 + $0x62c] sm:$0xf0]  ;;  %v7003_v6 = vor.u32 %v8874_v1, %v7002_v0  ;;  %4123 = vmatpush.bf16.msrb.mxu3 %v7259_v63 }
  0x40   :  { %v6858_v5 = vld [vmem:[#allocation2 + $0x420] sm:$0xf]  ;;  %v7115_v7 = vor.u32 %v8902_v4, %v7114_v3  ;;  %v8838_v8 = vld [vmem:[#allocation2 + $0x42c] sm:$0xf0]  ;;  %4036 = vmatpush.bf16.msrb.mxu0 %v6875_v2  ;;  %11051 = vst [vmem:[#allocation16_spill] sm:$0xff] %v9432_v39 }
  0x41   :  { %v7242_v9 = vld [vmem:[#allocation2 + $0x720] sm:$0xf]  ;;  %v8934_v10 = vld [vmem:[#allocation2 + $0x72c] sm:$0xf0]  ;;  %v6859_v16 = vor.u32 %v8838_v8, %v6858_v5  ;;  %4065 = vmatpush.bf16.msrb.mxu1 %v7003_v6 }
  0x42   :  { %v7243_v11 = vor.u32 %v8934_v10, %v7242_v9  ;;  %v6986_v12 = vld [vmem:[#allocation2 + $0x520] sm:$0xf]  ;;  %v8870_v13 = vld [vmem:[#allocation2 + $0x52c] sm:$0xf0]  ;;  %4095 = vmatpush.bf16.msrb.mxu2 %v7115_v7  ;;  %v8695_v9 = vld [vmem:[%s10902_s0 + $0x1f4] sm:$0xf0] }
  0x43   :  { %v7098_v14 = vld [vmem:[#allocation2 + $0x600] sm:$0xf]  ;;  %v8898_v15 = vld [vmem:[#allocation2 + $0x60c] sm:$0xf0]  ;;  %v6987_v19 = vor.u32 %v8870_v13, %v6986_v12  ;;  %v8686_v10 = vld [vmem:[%s10902_s0 + $0x1b4] sm:$0xf] }
  0x44   :  { %v7226_v17 = vld [vmem:[#allocation2 + $0x700] sm:$0xf]  ;;  %v8930_v18 = vld [vmem:[#allocation2 + $0x70c] sm:$0xf0]  ;;  %v7099_v20 = vor.u32 %v8898_v15, %v7098_v14  ;;  %4124 = vmatpush.bf16.msrb.mxu3 %v7243_v11  ;;  %4037 = vmatpush.bf16.msrb.mxu0 %v6859_v16  ;;  %v6260_v11 = vld [vmem:[%s10902_s0 + $0x1f8] sm:$0xf0] }
  0x45   :  { %v6842_v21 = vld [vmem:[#allocation2 + $0x400] sm:$0xf]  ;;  %v8834_v22 = vld [vmem:[#allocation2 + $0x40c] sm:$0xf0]  ;;  %v7227_v23 = vor.u32 %v8930_v18, %v7226_v17  ;;  %4066 = vmatpush.bf16.msrb.mxu1 %v6987_v19  ;;  %v6266_v12 = vld [vmem:[%s10902_s0 + $0x1b8] sm:$0xf]  ;;  %v9464_v17 = vor.u32 %v8686_v10, %v6260_v11 }
  0x46   :  { %v6970_v24 = vld [vmem:[#allocation2 + $0x500] sm:$0xf]  ;;  %v8866_v25 = vld [vmem:[#allocation2 + $0x50c] sm:$0xf0]  ;;  %v6843_v32 = vor.u32 %v8834_v22, %v6842_v21  ;;  %4096 = vmatpush.bf16.msrb.mxu2 %v7099_v20  ;;  %v8687_v14 = vld [vmem:[%s10902_s0 + $0x1bc] sm:$0xf] }
  0x47   :  { %v6186_v26 = vld [vmem:[%s10902_s0 + $0x120] sm:$0xf]  ;;  %v8678_v31 = vld [vmem:[%s10902_s0 + $0x16c] sm:$0xf0]  ;;  %v6971_v35 = vor.u32 %v8866_v25, %v6970_v24  ;;  %v6268_v15 = vld [vmem:[%s10902_s0 + $0x200] sm:$0xf0] }
  0x48   :  { %v9426_v36 = vor.u32 %v8677_v27, %v6186_v26  ;;  %4125 = vmatpush.bf16.msrb.mxu3 %v7227_v23  ;;  %v9430_v38 = vor.u32 %v8678_v31, %v6194_v30  ;;  %4038 = vmatpush.bf16.msrb.mxu0 %v6843_v32  ;;  %v7722_v40 = vld [vmem:[#allocation2 + $0xae0] sm:$0xf]  ;;  %v9054_v41 = vld [vmem:[#allocation2 + $0xaec] sm:$0xf0]  ;;  %11053 = vst [vmem:[#allocation18_spill] sm:$0xff] %v9464_v17 }
  0x49   :  { %4067 = vmatpush.bf16.msrb.mxu1 %v6971_v35  ;;  %v7466_v42 = vld [vmem:[#allocation2 + $0x8e0] sm:$0xf]  ;;  %v7723_v43 = vor.u32 %v9054_v41, %v7722_v40  ;;  %v8990_v45 = vld [vmem:[#allocation2 + $0x8ec] sm:$0xf0]  ;;  %v9468_v19 = vor.u32 %v8687_v14, %v6268_v15 }
  0x4a   :  { %11048 = vst [vmem:[#allocation13_spill] sm:$0xff] %v9426_v36  ;;  %3933 = vmatmul.bf16.gmra.mxu0 %v9426_v36  ;;  %3962 = vmatmul.bf16.gmra.mxu1 %v9428_v37  ;;  %v7850_v46 = vld [vmem:[#allocation2 + $0xbe0] sm:$0xf]  ;;  %v9086_v47 = vld [vmem:[#allocation2 + $0xbec] sm:$0xf0]  ;;  %v7467_v49 = vor.u32 %v8990_v45, %v7466_v42 }
  0x4b   :  { %11050 = vst [vmem:[#allocation15_spill] sm:$0xff] %v9430_v38  ;;  %3991 = vmatmul.bf16.gmra.mxu2 %v9430_v38  ;;  %4020 = vmatmul.bf16.gmra.mxu3 %v9432_v39  ;;  %v7851_v52 = vor.u32 %v9086_v47, %v7850_v46  ;;  %v7594_v55 = vld [vmem:[#allocation2 + $0x9e0] sm:$0xf]  ;;  %v9022_v58 = vld [vmem:[#allocation2 + $0x9ec] sm:$0xf0] }
  0x4c   :  { %v7706_v59 = vld [vmem:[#allocation2 + $0xac0] sm:$0xf]  ;;  %4205 = vmatpush.bf16.msra.mxu2 %v7723_v43  ;;  %v7595_v60 = vor.u32 %v9022_v58, %v7594_v55  ;;  %v9050_v61 = vld [vmem:[#allocation2 + $0xacc] sm:$0xf0]  ;;  %4147 = vmatpush.bf16.msra.mxu0 %v7467_v49  ;;  %11055 = vst [vmem:[#allocation20_spill] sm:$0xff] %v9468_v19 }
  0x4d   :  { %v7450_v62 = vld [vmem:[#allocation2 + $0x8c0] sm:$0xf]  ;;  %v8986_v63 = vld [vmem:[#allocation2 + $0x8cc] sm:$0xf0]  ;;  %4234 = vmatpush.bf16.msra.mxu3 %v7851_v52  ;;  %v7707_v0 = vor.u32 %v9050_v61, %v7706_v59  ;;  %v8643_v55 = vld [vmem:[%s10902_s0 + $0x54] sm:$0xf0] }
  0x4e   :  { %v7451_v1 = vor.u32 %v8986_v63, %v7450_v62  ;;  %v7834_v2 = vld [vmem:[#allocation2 + $0xbc0] sm:$0xf]  ;;  %v9082_v3 = vld [vmem:[#allocation2 + $0xbcc] sm:$0xf0]  ;;  %4176 = vmatpush.bf16.msra.mxu1 %v7595_v60  ;;  %v8634_v58 = vld [vmem:[%s10902_s0 + $0x14] sm:$0xf] }
  0x4f   :  { %v7578_v4 = vld [vmem:[#allocation2 + $0x9c0] sm:$0xf]  ;;  %v7835_v5 = vor.u32 %v9082_v3, %v7834_v2  ;;  %v9018_v6 = vld [vmem:[#allocation2 + $0x9cc] sm:$0xf0]  ;;  %v6060_v59 = vld [vmem:[%s10902_s0 + $0x58] sm:$0xf0] }
  0x50   :  { %v7579_v7 = vor.u32 %v9018_v6, %v7578_v4  ;;  %v6258_v8 = vld [vmem:[%s10902_s0 + $0x1b0] sm:$0xf]  ;;  %4206 = vmatpush.bf16.msra.mxu2 %v7707_v0  ;;  %v8696_v13 = vld [vmem:[%s10902_s0 + $0x1fc] sm:$0xf0]  ;;  %4148 = vmatpush.bf16.msra.mxu0 %v7451_v1  ;;  %v6066_v60 = vld [vmem:[%s10902_s0 + $0x18] sm:$0xf]  ;;  %v9500_v1 = vor.u32 %v8634_v58, %v6060_v59 }
  0x51   :  { %4235 = vmatpush.bf16.msra.mxu3 %v7835_v5  ;;  %v9462_v16 = vor.u32 %v8695_v9, %v6258_v8  ;;  %v9466_v18 = vor.u32 %v8696_v13, %v6266_v12  ;;  %v7690_v20 = vld [vmem:[#allocation2 + $0xaa0] sm:$0xf]  ;;  %v9046_v21 = vld [vmem:[#allocation2 + $0xaac] sm:$0xf0]  ;;  %v8635_v62 = vld [vmem:[%s10902_s0 + $0x1c] sm:$0xf] }
  0x52   :  { %4177 = vmatpush.bf16.msra.mxu1 %v7579_v7  ;;  %v7434_v22 = vld [vmem:[#allocation2 + $0x8a0] sm:$0xf]  ;;  %v7691_v23 = vor.u32 %v9046_v21, %v7690_v20  ;;  %v8982_v24 = vld [vmem:[#allocation2 + $0x8ac] sm:$0xf0]  ;;  %v6068_v63 = vld [vmem:[%s10902_s0 + $0x60] sm:$0xf0] }
  0x53   :  { %11052 = vst [vmem:[#allocation17_spill] sm:$0xff] %v9462_v16  ;;  %v7818_v25 = vld [vmem:[#allocation2 + $0xba0] sm:$0xf]  ;;  %v9078_v26 = vld [vmem:[#allocation2 + $0xbac] sm:$0xf0]  ;;  %v7435_v27 = vor.u32 %v8982_v24, %v7434_v22  ;;  %v9504_v3 = vor.u32 %v8635_v62, %v6068_v63 }
  0x54   :  { %11054 = vst [vmem:[#allocation19_spill] sm:$0xff] %v9466_v18  ;;  %v7819_v28 = vor.u32 %v9078_v26, %v7818_v25  ;;  %v7562_v29 = vld [vmem:[#allocation2 + $0x9a0] sm:$0xf]  ;;  %v9014_v30 = vld [vmem:[#allocation2 + $0x9ac] sm:$0xf0]  ;;  %4207 = vmatpush.bf16.msra.mxu2 %v7691_v23 }
  0x55   :  { %v7674_v31 = vld [vmem:[#allocation2 + $0xa80] sm:$0xf]  ;;  %v7563_v32 = vor.u32 %v9014_v30, %v7562_v29  ;;  %v9042_v33 = vld [vmem:[#allocation2 + $0xa8c] sm:$0xf0]  ;;  %4149 = vmatpush.bf16.msra.mxu0 %v7435_v27  ;;  %11057 = vst [vmem:[#allocation22_spill] sm:$0xff] %v9500_v1 }
  0x56   :  { %v7418_v34 = vld [vmem:[#allocation2 + $0x880] sm:$0xf]  ;;  %v8978_v35 = vld [vmem:[#allocation2 + $0x88c] sm:$0xf0]  ;;  %4236 = vmatpush.bf16.msra.mxu3 %v7819_v28  ;;  %v7675_v40 = vor.u32 %v9042_v33, %v7674_v31  ;;  %11058 = vst [vmem:[#allocation23_spill] sm:$0xff] %v9504_v3 }
  0x57   :  { %v7419_v41 = vor.u32 %v8978_v35, %v7418_v34  ;;  %v7802_v42 = vld [vmem:[#allocation2 + $0xb80] sm:$0xf]  ;;  %v9074_v43 = vld [vmem:[#allocation2 + $0xb8c] sm:$0xf0]  ;;  %4178 = vmatpush.bf16.msra.mxu1 %v7563_v32  ;;  %v8661_v33 = vld [vmem:[%s10902_s0 + $0xe4] sm:$0xf0] }
  0x58   :  { %v7546_v45 = vld [vmem:[#allocation2 + $0x980] sm:$0xf]  ;;  %v7803_v46 = vor.u32 %v9074_v43, %v7802_v42  ;;  %v9010_v47 = vld [vmem:[#allocation2 + $0x98c] sm:$0xf0]  ;;  %4208 = vmatpush.bf16.msra.mxu2 %v7675_v40  ;;  %v8652_v34 = vld [vmem:[%s10902_s0 + $0xa4] sm:$0xf] }
  0x59   :  { %v7547_v49 = vor.u32 %v9010_v47, %v7546_v45  ;;  %v6058_v52 = vld [vmem:[%s10902_s0 + $0x10] sm:$0xf]  ;;  %v8644_v61 = vld [vmem:[%s10902_s0 + $0x5c] sm:$0xf0]  ;;  %4150 = vmatpush.bf16.msra.mxu0 %v7419_v41  ;;  %v6132_v35 = vld [vmem:[%s10902_s0 + $0xe8] sm:$0xf0] }
  0x5a   :  { %3938 = vmatmul.bf16.gmra.mxu0 %v9462_v16  ;;  %3967 = vmatmul.bf16.gmra.mxu1 %v9464_v17  ;;  %v9498_v0 = vor.u32 %v8643_v55, %v6058_v52  ;;  %v9502_v2 = vor.u32 %v8644_v61, %v6066_v60  ;;  %v7658_v4 = vld [vmem:[#allocation2 + $0xa60] sm:$0xf]  ;;  %v9038_v5 = vld [vmem:[#allocation2 + $0xa6c] sm:$0xf0]  ;;  %v6138_v40 = vld [vmem:[%s10902_s0 + $0xa8] sm:$0xf] }
  0x5b   :  { %3996 = vmatmul.bf16.gmra.mxu2 %v9466_v18  ;;  %4025 = vmatmul.bf16.gmra.mxu3 %v9468_v19  ;;  %v7402_v6 = vld [vmem:[#allocation2 + $0x860] sm:$0xf]  ;;  %v7659_v7 = vor.u32 %v9038_v5, %v7658_v4  ;;  %v8974_v8 = vld [vmem:[#allocation2 + $0x86c] sm:$0xf0]  ;;  %v8653_v42 = vld [vmem:[%s10902_s0 + $0xac] sm:$0xf] }
  0x5c   :  { %4237 = vmatpush.bf16.msra.mxu3 %v7803_v46  ;;  %4179 = vmatpush.bf16.msra.mxu1 %v7547_v49  ;;  %11056 = vst [vmem:[#allocation21_spill] sm:$0xff] %v9498_v0  ;;  %v7786_v9 = vld [vmem:[#allocation2 + $0xb60] sm:$0xf]  ;;  %v9070_v10 = vld [vmem:[#allocation2 + $0xb6c] sm:$0xf0]  ;;  %v7403_v11 = vor.u32 %v8974_v8, %v7402_v6  ;;  %v9536_v46 = vor.u32 %v8652_v34, %v6132_v35 }
  0x5d   :  { %v7787_v12 = vor.u32 %v9070_v10, %v7786_v9  ;;  %v7530_v13 = vld [vmem:[#allocation2 + $0x960] sm:$0xf]  ;;  %v9006_v14 = vld [vmem:[#allocation2 + $0x96c] sm:$0xf0]  ;;  %4209 = vmatpush.bf16.msra.mxu2 %v7659_v7  ;;  %v6140_v43 = vld [vmem:[%s10902_s0 + $0xf0] sm:$0xf0] }
  0x5e   :  { %v7642_v15 = vld [vmem:[#allocation2 + $0xa40] sm:$0xf]  ;;  %v7531_v20 = vor.u32 %v9006_v14, %v7530_v13  ;;  %v9034_v21 = vld [vmem:[#allocation2 + $0xa4c] sm:$0xf0]  ;;  %4151 = vmatpush.bf16.msra.mxu0 %v7403_v11  ;;  %11060 = vst [vmem:[#allocation25_spill] sm:$0xff] %v9536_v46  ;;  %v9540_v49 = vor.u32 %v8653_v42, %v6140_v43 }
  0x5f   :  { %v7386_v22 = vld [vmem:[#allocation2 + $0x840] sm:$0xf]  ;;  %v8970_v23 = vld [vmem:[#allocation2 + $0x84c] sm:$0xf0]  ;;  %v7643_v24 = vor.u32 %v9034_v21, %v7642_v15 }
  0x60   :  { %4238 = vmatpush.bf16.msra.mxu3 %v7787_v12  ;;  %v7387_v25 = vor.u32 %v8970_v23, %v7386_v22  ;;  %v7770_v26 = vld [vmem:[#allocation2 + $0xb40] sm:$0xf]  ;;  %v9066_v27 = vld [vmem:[#allocation2 + $0xb4c] sm:$0xf0]  ;;  %4180 = vmatpush.bf16.msra.mxu1 %v7531_v20 }
  0x61   :  { %v7514_v28 = vld [vmem:[#allocation2 + $0x940] sm:$0xf]  ;;  %v7771_v29 = vor.u32 %v9066_v27, %v7770_v26  ;;  %v9002_v30 = vld [vmem:[#allocation2 + $0x94c] sm:$0xf0]  ;;  %4210 = vmatpush.bf16.msra.mxu2 %v7643_v24  ;;  %v8670_v26 = vld [vmem:[%s10902_s0 + $0x134] sm:$0xf] }
  0x62   :  { %v7515_v31 = vor.u32 %v9002_v30, %v7514_v28  ;;  %v6130_v32 = vld [vmem:[%s10902_s0 + $0xa0] sm:$0xf]  ;;  %v8662_v41 = vld [vmem:[%s10902_s0 + $0xec] sm:$0xf0]  ;;  %4152 = vmatpush.bf16.msra.mxu0 %v7387_v25  ;;  %v8679_v25 = vld [vmem:[%s10902_s0 + $0x174] sm:$0xf0] }
  0x63   :  { %v9534_v45 = vor.u32 %v8661_v33, %v6130_v32  ;;  %v9538_v47 = vor.u32 %v8662_v41, %v6138_v40  ;;  %v7626_v52 = vld [vmem:[#allocation2 + $0xa20] sm:$0xf]  ;;  %v9030_v55 = vld [vmem:[#allocation2 + $0xa2c] sm:$0xf0]  ;;  %v6204_v27 = vld [vmem:[%s10902_s0 + $0x178] sm:$0xf0] }
  0x64   :  { %4239 = vmatpush.bf16.msra.mxu3 %v7771_v29  ;;  %4181 = vmatpush.bf16.msra.mxu1 %v7515_v31  ;;  %v7370_v58 = vld [vmem:[#allocation2 + $0x820] sm:$0xf]  ;;  %v7627_v59 = vor.u32 %v9030_v55, %v7626_v52  ;;  %v8966_v60 = vld [vmem:[#allocation2 + $0x82c] sm:$0xf0]  ;;  %v6210_v28 = vld [vmem:[%s10902_s0 + $0x138] sm:$0xf]  ;;  %v9572_v33 = vor.u32 %v8670_v26, %v6204_v27 }
  0x65   :  { %11059 = vst [vmem:[#allocation24_spill] sm:$0xff] %v9534_v45  ;;  %v7754_v61 = vld [vmem:[#allocation2 + $0xb20] sm:$0xf]  ;;  %v9062_v62 = vld [vmem:[#allocation2 + $0xb2c] sm:$0xf0]  ;;  %v7371_v63 = vor.u32 %v8966_v60, %v7370_v58 }
  0x66   :  { %v7755_v4 = vor.u32 %v9062_v62, %v7754_v61  ;;  %v7498_v5 = vld [vmem:[#allocation2 + $0x920] sm:$0xf]  ;;  %v8998_v6 = vld [vmem:[#allocation2 + $0x92c] sm:$0xf0]  ;;  %4211 = vmatpush.bf16.msra.mxu2 %v7627_v59  ;;  %v8671_v30 = vld [vmem:[%s10902_s0 + $0x13c] sm:$0xf] }
  0x67   :  { %v7610_v7 = vld [vmem:[#allocation2 + $0xa00] sm:$0xf]  ;;  %v7499_v8 = vor.u32 %v8998_v6, %v7498_v5  ;;  %v9026_v9 = vld [vmem:[#allocation2 + $0xa0c] sm:$0xf0]  ;;  %4153 = vmatpush.bf16.msra.mxu0 %v7371_v63  ;;  %v6212_v31 = vld [vmem:[%s10902_s0 + $0x180] sm:$0xf0] }
  0x68   :  { %v7354_v10 = vld [vmem:[#allocation2 + $0x800] sm:$0xf]  ;;  %v8962_v11 = vld [vmem:[#allocation2 + $0x80c] sm:$0xf0]  ;;  %4240 = vmatpush.bf16.msra.mxu3 %v7755_v4  ;;  %v7611_v12 = vor.u32 %v9026_v9, %v7610_v7  ;;  %11062 = vst [vmem:[#allocation27_spill] sm:$0xff] %v9572_v33  ;;  %v9576_v35 = vor.u32 %v8671_v30, %v6212_v31 }
  0x69   :  { %v7355_v13 = vor.u32 %v8962_v11, %v7354_v10  ;;  %v7738_v14 = vld [vmem:[#allocation2 + $0xb00] sm:$0xf]  ;;  %v9058_v15 = vld [vmem:[#allocation2 + $0xb0c] sm:$0xf0]  ;;  %4182 = vmatpush.bf16.msra.mxu1 %v7499_v8  ;;  %v8697_v62 = vld [vmem:[%s10902_s0 + $0x204] sm:$0xf0] }
  0x6a   :  { %4039 = vmatmul.bf16.vlgmr.msrb.gmra.mxu0 %v9498_v0  ;;  %4068 = vmatmul.bf16.vlgmr.msrb.gmra.mxu1 %v9500_v1  ;;  %v7482_v20 = vld [vmem:[#allocation2 + $0x900] sm:$0xf]  ;;  %v7739_v21 = vor.u32 %v9058_v15, %v7738_v14  ;;  %v8994_v22 = vld [vmem:[#allocation2 + $0x90c] sm:$0xf0]  ;;  %11064 = vst [vmem:[#allocation29_spill] sm:$0xff] %v9576_v35 }
  0x6b   :  { %4097 = vmatmul.bf16.vlgmr.msrb.gmra.mxu2 %v9502_v2  ;;  %4126 = vmatmul.bf16.vlgmr.msrb.gmra.mxu3 %v9504_v3  ;;  %v7483_v23 = vor.u32 %v8994_v22, %v7482_v20  ;;  %v6202_v24 = vld [vmem:[%s10902_s0 + $0x130] sm:$0xf]  ;;  %v8680_v29 = vld [vmem:[%s10902_s0 + $0x17c] sm:$0xf0]  ;;  %v8688_v10 = vld [vmem:[%s10902_s0 + $0x1c4] sm:$0xf] }
  0x6c   :  { %4212 = vmatpush.bf16.msra.mxu2 %v7611_v12  ;;  %4154 = vmatpush.bf16.msra.mxu0 %v7355_v13  ;;  %v9570_v32 = vor.u32 %v8679_v25, %v6202_v24  ;;  %v9574_v34 = vor.u32 %v8680_v29, %v6210_v28  ;;  %v8234_v40 = vld [vmem:[#allocation2 + $0xee0] sm:$0xf]  ;;  %v9182_v41 = vld [vmem:[#allocation2 + $0xeec] sm:$0xf0]  ;;  %v6276_v15 = vld [vmem:[%s10902_s0 + $0x208] sm:$0xf0] }
  0x6d   :  { %4241 = vmatpush.bf16.msra.mxu3 %v7739_v21  ;;  %4183 = vmatpush.bf16.msra.mxu1 %v7483_v23  ;;  %v7978_v42 = vld [vmem:[#allocation2 + $0xce0] sm:$0xf]  ;;  %v8235_v43 = vor.u32 %v9182_v41, %v8234_v40  ;;  %v9118_v52 = vld [vmem:[#allocation2 + $0xcec] sm:$0xf0]  ;;  %v6282_v20 = vld [vmem:[%s10902_s0 + $0x1c8] sm:$0xf]  ;;  %v9608_v26 = vor.u32 %v8688_v10, %v6276_v15 }
  0x6e   :  { %11061 = vst [vmem:[#allocation26_spill] sm:$0xff] %v9570_v32  ;;  %v8362_v55 = vld [vmem:[#allocation2 + $0xfe0] sm:$0xf]  ;;  %v9214_v58 = vld [vmem:[#allocation2 + $0xfec] sm:$0xf0]  ;;  %v7979_v59 = vor.u32 %v9118_v52, %v7978_v42 }
  0x6f   :  { %11063 = vst [vmem:[#allocation28_spill] sm:$0xff] %v9574_v34  ;;  %v8363_v60 = vor.u32 %v9214_v58, %v8362_v55  ;;  %v6274_v61 = vld [vmem:[%s10902_s0 + $0x1c0] sm:$0xf]  ;;  %v9150_v4 = vld [vmem:[#allocation2 + $0xdec] sm:$0xf0] }
  0x70   :  { %4321 = vmatpush.bf16.msrb.mxu2 %v8235_v43  ;;  %4263 = vmatpush.bf16.msrb.mxu0 %v7979_v59  ;;  %v8106_v63 = vld [vmem:[#allocation2 + $0xde0] sm:$0xf]  ;;  %v9178_v7 = vld [vmem:[#allocation2 + $0xecc] sm:$0xf0]  ;;  %v8689_v23 = vld [vmem:[%s10902_s0 + $0x1cc] sm:$0xf]  ;;  %v9606_v25 = vor.u32 %v8697_v62, %v6274_v61 }
  0x71   :  { %4350 = vmatpush.bf16.msrb.mxu3 %v8363_v60  ;;  %v8218_v5 = vld [vmem:[#allocation2 + $0xec0] sm:$0xf]  ;;  %v8107_v6 = vor.u32 %v9150_v4, %v8106_v63  ;;  %v9114_v9 = vld [vmem:[#allocation2 + $0xccc] sm:$0xf0]  ;;  %v6284_v24 = vld [vmem:[%s10902_s0 + $0x210] sm:$0xf0] }
  0x72   :  { %v7962_v8 = vld [vmem:[#allocation2 + $0xcc0] sm:$0xf]  ;;  %v8219_v11 = vor.u32 %v9178_v7, %v8218_v5  ;;  %v9210_v14 = vld [vmem:[#allocation2 + $0xfcc] sm:$0xf0]  ;;  %11065 = vst [vmem:[#allocation30_spill] sm:$0xff] %v9606_v25  ;;  %v9612_v28 = vor.u32 %v8689_v23, %v6284_v24 }
  0x73   :  { %v7963_v12 = vor.u32 %v9114_v9, %v7962_v8  ;;  %v8346_v13 = vld [vmem:[#allocation2 + $0xfc0] sm:$0xf]  ;;  %v8698_v21 = vld [vmem:[%s10902_s0 + $0x20c] sm:$0xf0]  ;;  %4292 = vmatpush.bf16.msrb.mxu1 %v8107_v6  ;;  %11066 = vst [vmem:[#allocation31_spill] sm:$0xff] %v9608_v26 }
  0x74   :  { %v8347_v22 = vor.u32 %v9210_v14, %v8346_v13  ;;  %4322 = vmatpush.bf16.msrb.mxu2 %v8219_v11  ;;  %v9610_v27 = vor.u32 %v8698_v21, %v6282_v20  ;;  %11068 = vst [vmem:[#allocation33_spill] sm:$0xff] %v9612_v28  ;;  %v8090_v29 = vld [vmem:[#allocation2 + $0xdc0] sm:$0xf]  ;;  %v9146_v30 = vld [vmem:[#allocation2 + $0xdcc] sm:$0xf0] }
  0x75   :  { %4264 = vmatpush.bf16.msrb.mxu0 %v7963_v12  ;;  %v8091_v31 = vor.u32 %v9146_v30, %v8090_v29  ;;  %v8202_v40 = vld [vmem:[#allocation2 + $0xea0] sm:$0xf]  ;;  %v9174_v41 = vld [vmem:[#allocation2 + $0xeac] sm:$0xf0]  ;;  %v8645_v62 = vld [vmem:[%s10902_s0 + $0x64] sm:$0xf0] }
  0x76   :  { %4351 = vmatpush.bf16.msrb.mxu3 %v8347_v22  ;;  %11067 = vst [vmem:[#allocation32_spill] sm:$0xff] %v9610_v27  ;;  %v8203_v42 = vor.u32 %v9174_v41, %v8202_v40  ;;  %v7946_v43 = vld [vmem:[#allocation2 + $0xca0] sm:$0xf]  ;;  %v9110_v52 = vld [vmem:[#allocation2 + $0xcac] sm:$0xf0] }
  0x77   :  { %4293 = vmatpush.bf16.msrb.mxu1 %v8091_v31  ;;  %v8330_v55 = vld [vmem:[#allocation2 + $0xfa0] sm:$0xf]  ;;  %v7947_v58 = vor.u32 %v9110_v52, %v7946_v43  ;;  %v9206_v59 = vld [vmem:[#allocation2 + $0xfac] sm:$0xf0]  ;;  %v8636_v10 = vld [vmem:[%s10902_s0 + $0x24] sm:$0xf] }
  0x78   :  { %4323 = vmatpush.bf16.msrb.mxu2 %v8203_v42  ;;  %v8331_v60 = vor.u32 %v9206_v59, %v8330_v55  ;;  %v6074_v61 = vld [vmem:[%s10902_s0 + $0x20] sm:$0xf]  ;;  %v9142_v4 = vld [vmem:[#allocation2 + $0xdac] sm:$0xf0]  ;;  %v6076_v15 = vld [vmem:[%s10902_s0 + $0x68] sm:$0xf0] }
  0x79   :  { %4265 = vmatpush.bf16.msrb.mxu0 %v7947_v58  ;;  %v8074_v63 = vld [vmem:[#allocation2 + $0xda0] sm:$0xf]  ;;  %v9170_v7 = vld [vmem:[#allocation2 + $0xe8c] sm:$0xf0]  ;;  %v6082_v20 = vld [vmem:[%s10902_s0 + $0x28] sm:$0xf]  ;;  %v9642_v29 = vor.u32 %v8645_v62, %v6074_v61  ;;  %v9644_v31 = vor.u32 %v8636_v10, %v6076_v15 }
  0x7a   :  { %4044 = vmatmul.bf16.gmra.mxu0 %v9534_v45  ;;  %4073 = vmatmul.bf16.gmra.mxu1 %v9536_v46  ;;  %v8186_v5 = vld [vmem:[#allocation2 + $0xe80] sm:$0xf]  ;;  %v8075_v6 = vor.u32 %v9142_v4, %v8074_v63  ;;  %v9106_v9 = vld [vmem:[#allocation2 + $0xc8c] sm:$0xf0]  ;;  %v8637_v23 = vld [vmem:[%s10902_s0 + $0x2c] sm:$0xf] }
  0x7b   :  { %4102 = vmatmul.bf16.gmra.mxu2 %v9538_v47  ;;  %4131 = vmatmul.bf16.gmra.mxu3 %v9540_v49  ;;  %v7930_v8 = vld [vmem:[#allocation2 + $0xc80] sm:$0xf]  ;;  %v8187_v11 = vor.u32 %v9170_v7, %v8186_v5  ;;  %v9202_v14 = vld [vmem:[#allocation2 + $0xf8c] sm:$0xf0]  ;;  %v6084_v24 = vld [vmem:[%s10902_s0 + $0x70] sm:$0xf0] }
  0x7c   :  { %4352 = vmatpush.bf16.msrb.mxu3 %v8331_v60  ;;  %v7931_v12 = vor.u32 %v9106_v9, %v7930_v8  ;;  %v8314_v13 = vld [vmem:[#allocation2 + $0xf80] sm:$0xf]  ;;  %v8646_v21 = vld [vmem:[%s10902_s0 + $0x6c] sm:$0xf0]  ;;  %4294 = vmatpush.bf16.msrb.mxu1 %v8075_v6  ;;  %v9648_v42 = vor.u32 %v8637_v23, %v6084_v24 }
  0x7d   :  { %v8315_v22 = vor.u32 %v9202_v14, %v8314_v13  ;;  %4324 = vmatpush.bf16.msrb.mxu2 %v8187_v11  ;;  %v9646_v40 = vor.u32 %v8646_v21, %v6082_v20  ;;  %v8058_v52 = vld [vmem:[#allocation2 + $0xd80] sm:$0xf]  ;;  %v9138_v55 = vld [vmem:[#allocation2 + $0xd8c] sm:$0xf0]  ;;  %v8663_v20 = vld [vmem:[%s10902_s0 + $0xf4] sm:$0xf0] }
  0x7e   :  { %4266 = vmatpush.bf16.msrb.mxu0 %v7931_v12  ;;  %11070 = vst [vmem:[#allocation35_spill] sm:$0xff] %v9648_v42  ;;  %v8059_v58 = vor.u32 %v9138_v55, %v8058_v52  ;;  %v8170_v59 = vld [vmem:[#allocation2 + $0xe60] sm:$0xf]  ;;  %v9166_v60 = vld [vmem:[#allocation2 + $0xe6c] sm:$0xf0] }
  0x7f   :  { %11069 = vst [vmem:[#allocation34_spill] sm:$0xff] %v9646_v40  ;;  %v8171_v61 = vor.u32 %v9166_v60, %v8170_v59  ;;  %v7914_v62 = vld [vmem:[#allocation2 + $0xc60] sm:$0xf]  ;;  %v9102_v63 = vld [vmem:[#allocation2 + $0xc6c] sm:$0xf0] }
  0x80   :  { %4353 = vmatpush.bf16.msrb.mxu3 %v8315_v22  ;;  %4295 = vmatpush.bf16.msrb.mxu1 %v8059_v58  ;;  %v8298_v4 = vld [vmem:[#allocation2 + $0xf60] sm:$0xf]  ;;  %v7915_v6 = vor.u32 %v9102_v63, %v7914_v62  ;;  %v9198_v7 = vld [vmem:[#allocation2 + $0xf6c] sm:$0xf0]  ;;  %v8654_v52 = vld [vmem:[%s10902_s0 + $0xb4] sm:$0xf] }
  0x81   :  { %4325 = vmatpush.bf16.msrb.mxu2 %v8171_v61  ;;  %v8299_v11 = vor.u32 %v9198_v7, %v8298_v4  ;;  %v6146_v15 = vld [vmem:[%s10902_s0 + $0xb0] sm:$0xf]  ;;  %v8042_v21 = vld [vmem:[#allocation2 + $0xd60] sm:$0xf]  ;;  %v6148_v61 = vld [vmem:[%s10902_s0 + $0xf8] sm:$0xf0] }
  0x82   :  { %4267 = vmatpush.bf16.msrb.mxu0 %v7915_v6  ;;  %v9134_v22 = vld [vmem:[#allocation2 + $0xd6c] sm:$0xf0]  ;;  %v8154_v23 = vld [vmem:[#allocation2 + $0xe40] sm:$0xf]  ;;  %v6154_v62 = vld [vmem:[%s10902_s0 + $0xb8] sm:$0xf] }
  0x83   :  { %v8043_v24 = vor.u32 %v9134_v22, %v8042_v21  ;;  %v8282_v59 = vld [vmem:[#allocation2 + $0xf40] sm:$0xf]  ;;  %v9194_v60 = vld [vmem:[#allocation2 + $0xf4c] sm:$0xf0]  ;;  %v6156_v6 = vld [vmem:[%s10902_s0 + $0x100] sm:$0xf0] }
  0x84   :  { %4354 = vmatpush.bf16.msrb.mxu3 %v8299_v11  ;;  %v8664_v63 = vld [vmem:[%s10902_s0 + $0xfc] sm:$0xf0]  ;;  %v8283_v4 = vor.u32 %v9194_v60, %v8282_v59 }
  0x85   :  { %4296 = vmatpush.bf16.msrb.mxu1 %v8043_v24  ;;  %v9684_v21 = vor.u32 %v8664_v63, %v6154_v62  ;;  %v8266_v59 = vld [vmem:[#allocation2 + $0xf20] sm:$0xf]  ;;  %v9190_v62 = vld [vmem:[#allocation2 + $0xf2c] sm:$0xf0] }
  0x87   :  { %11073 = vst [vmem:[#allocation38_spill] sm:$0xff] %v9684_v21 }
  0x88   :  { %4355 = vmatpush.bf16.msrb.mxu3 %v8283_v4 }
  0x8a   :  { %4049 = vmatmul.bf16.gmra.mxu0 %v9570_v32  ;;  %4078 = vmatmul.bf16.gmra.mxu1 %v9572_v33 }
  0x8b   :  { %4107 = vmatmul.bf16.gmra.mxu2 %v9574_v34  ;;  %4136 = vmatmul.bf16.gmra.mxu3 %v9576_v35  ;;  %v9266_v35 = vld [vmem:[#allocation2 + $0x118c] sm:$0xf0] }
  0x9a   :  { %4054 = vmatmul.bf16.gmra.mxu0 %v9606_v25  ;;  %4083 = vmatmul.bf16.gmra.mxu1 %v9608_v26 }
  0x9b   :  { %4112 = vmatmul.bf16.gmra.mxu2 %v9610_v27  ;;  %4141 = vmatmul.bf16.gmra.mxu3 %v9612_v28 }
  0xa5   :  { %v3924_v30 = vpop.f32.mrf.mxu0  ;;  %v3953_v41 = vpop.f32.mrf.mxu1 }
  0xa6   :  { %v3954_v43 = vadd.f32 %v3953_v41, %v3924_v30  ;;  %v9162_v30 = vld [vmem:[#allocation2 + $0xe4c] sm:$0xf0]  ;;  %v7898_v41 = vld [vmem:[#allocation2 + $0xc40] sm:$0xf] }
  0xa7   :  { %v8155_v55 = vor.u32 %v9162_v30, %v8154_v23 }
  0xa9   :  { %4326 = vmatpush.bf16.msrb.mxu2 %v8155_v55  ;;  %v7882_v55 = vld [vmem:[#allocation2 + $0xc20] sm:$0xf] }
  0xaa   :  { %4155 = vmatmul.bf16.vlgmr.msra.gmra.mxu0 %v9642_v29  ;;  %4184 = vmatmul.bf16.vlgmr.msra.gmra.mxu1 %v9644_v31 }
  0xab   :  { %4213 = vmatmul.bf16.vlgmr.msra.gmra.mxu2 %v9646_v40  ;;  %4242 = vmatmul.bf16.vlgmr.msra.gmra.mxu3 %v9648_v42 }
  0xad   :  { %v4011_v9 = vpop.f32.mrf.mxu3  ;;  %v3926_v10 = vpop.f32.mrf.mxu0 }
  0xae   :  { %v3982_v5 = vpop.f32.mrf.mxu2  ;;  %v3955_v12 = vpop.f32.mrf.mxu1 }
  0xaf   :  { %v3983_v8 = vadd.f32 %v3982_v5, %v3954_v43  ;;  %v3956_v14 = vadd.f32 %v3955_v12, %v3926_v10  ;;  %v9098_v43 = vld [vmem:[#allocation2 + $0xc4c] sm:$0xf0]  ;;  %v8655_v5 = vld [vmem:[%s10902_s0 + $0xbc] sm:$0xf]  ;;  %v9682_v12 = vor.u32 %v8654_v52, %v6148_v61 }
  0xb0   :  { %v7899_v58 = vor.u32 %v9098_v43, %v7898_v41  ;;  %v9686_v23 = vor.u32 %v8655_v5, %v6156_v6  ;;  %v8026_v41 = vld [vmem:[#allocation2 + $0xd40] sm:$0xf]  ;;  %v9130_v43 = vld [vmem:[#allocation2 + $0xd4c] sm:$0xf0]  ;;  %v8267_v6 = vor.u32 %v9190_v62, %v8266_v59  ;;  %v6220_v62 = vld [vmem:[%s10902_s0 + $0x188] sm:$0xf0] }
  0xb1   :  { %v9654_v13 = vadd.f32 %v4011_v9, %v3983_v8  ;;  %v9680_v8 = vor.u32 %v8663_v20, %v6146_v15  ;;  %11072 = vst [vmem:[#allocation37_spill] sm:$0xff] %v9682_v12  ;;  %v8027_v15 = vor.u32 %v9130_v43, %v8026_v41  ;;  %v9158_v20 = vld [vmem:[#allocation2 + $0xe2c] sm:$0xf0]  ;;  %v8010_v41 = vld [vmem:[#allocation2 + $0xd20] sm:$0xf] }
  0xb2   :  { %4268 = vmatpush.bf16.msrb.mxu0 %v7899_v58  ;;  %11074 = vst [vmem:[#allocation39_spill] sm:$0xff] %v9686_v23  ;;  %v9094_v58 = vld [vmem:[#allocation2 + $0xc2c] sm:$0xf0]  ;;  %4356 = vmatpush.bf16.msrb.mxu3 %v8267_v6  ;;  %v8122_v43 = vld [vmem:[#allocation2 + $0xe00] sm:$0xf] }
  0xb3   :  { %11071 = vst [vmem:[#allocation36_spill] sm:$0xff] %v9680_v8  ;;  %4297 = vmatpush.bf16.msrb.mxu1 %v8027_v15  ;;  %v7883_v61 = vor.u32 %v9094_v58, %v7882_v55  ;;  %v8672_v55 = vld [vmem:[%s10902_s0 + $0x144] sm:$0xf]  ;;  %v8673_v6 = vld [vmem:[%s10902_s0 + $0x14c] sm:$0xf] }
  0xb5   :  { %v4013_v10 = vpop.f32.mrf.mxu3 }
  0xb6   :  { %v3984_v7 = vpop.f32.mrf.mxu2  ;;  %v3929_v11 = vpop.f32.mrf.mxu0  ;;  %4269 = vmatpush.bf16.msrb.mxu0 %v7883_v61  ;;  %v9186_v61 = vld [vmem:[#allocation2 + $0xf0c] sm:$0xf0] }
  0xb7   :  { %v3985_v9 = vadd.f32 %v3984_v7, %v3956_v14  ;;  %v3958_v22 = vpop.f32.mrf.mxu1  ;;  %v8138_v14 = vld [vmem:[#allocation2 + $0xe20] sm:$0xf] }
  0xb8   :  { %v3959_v30 = vadd.f32 %v3958_v22, %v3929_v11  ;;  %v8139_v52 = vor.u32 %v9158_v20, %v8138_v14  ;;  %v6218_v11 = vld [vmem:[%s10902_s0 + $0x140] sm:$0xf]  ;;  %v8681_v22 = vld [vmem:[%s10902_s0 + $0x184] sm:$0xf0]  ;;  %v9154_v14 = vld [vmem:[#allocation2 + $0xe0c] sm:$0xf0] }
  0xb9   :  { %v9688_v24 = vadd.f32 %v4013_v10, %v3985_v9  ;;  %v7866_v20 = vld [vmem:[#allocation2 + $0xc00] sm:$0xf]  ;;  %v8123_v58 = vor.u32 %v9154_v14, %v8122_v43  ;;  %v9122_v14 = vld [vmem:[#allocation2 + $0xd0c] sm:$0xf0] }
  0xba   :  { %4160 = vmatmul.bf16.gmra.mxu0 %v9680_v8  ;;  %4189 = vmatmul.bf16.gmra.mxu1 %v9682_v12  ;;  %v7994_v43 = vld [vmem:[#allocation2 + $0xd00] sm:$0xf] }
  0xbb   :  { %4218 = vmatmul.bf16.gmra.mxu2 %v9684_v21  ;;  %4247 = vmatmul.bf16.gmra.mxu3 %v9686_v23  ;;  %v7995_v23 = vor.u32 %v9122_v14, %v7994_v43 }
  0xbc   :  { %4327 = vmatpush.bf16.msrb.mxu2 %v8139_v52  ;;  %v9090_v52 = vld [vmem:[#allocation2 + $0xc0c] sm:$0xf0] }
  0xbd   :  { %v4016_v4 = vpop.f32.mrf.mxu3  ;;  %v7867_v59 = vor.u32 %v9090_v52, %v7866_v20 }
  0xbe   :  { %v3987_v60 = vpop.f32.mrf.mxu2  ;;  %v3931_v5 = vpop.f32.mrf.mxu0 }
  0xbf   :  { %v3988_v63 = vadd.f32 %v3987_v60, %v3959_v30  ;;  %v3960_v7 = vpop.f32.mrf.mxu1  ;;  %v9126_v30 = vld [vmem:[#allocation2 + $0xd2c] sm:$0xf0]  ;;  %v8250_v60 = vld [vmem:[#allocation2 + $0xf00] sm:$0xf]  ;;  %4270 = vmatpush.bf16.msrb.mxu0 %v7867_v59 }
  0xc0   :  { %v3961_v10 = vadd.f32 %v3960_v7, %v3931_v5  ;;  %v8011_v15 = vor.u32 %v9126_v30, %v8010_v41  ;;  %v8251_v5 = vor.u32 %v9186_v61, %v8250_v60  ;;  %v6228_v7 = vld [vmem:[%s10902_s0 + $0x190] sm:$0xf0]  ;;  %4328 = vmatpush.bf16.msrb.mxu2 %v8123_v58  ;;  %v9720_v30 = vor.u32 %v8681_v22, %v6218_v11  ;;  %v8490_v22 = vld [vmem:[#allocation2 + $0x10e0] sm:$0xf]  ;;  %v9246_v59 = vld [vmem:[#allocation2 + $0x10ec] sm:$0xf0] }
  0xc1   :  { %v9694_v9 = vadd.f32 %v4016_v4, %v3988_v63  ;;  %v6226_v63 = vld [vmem:[%s10902_s0 + $0x148] sm:$0xf]  ;;  %v8682_v4 = vld [vmem:[%s10902_s0 + $0x18c] sm:$0xf0]  ;;  %v9722_v60 = vor.u32 %v8672_v55, %v6220_v62  ;;  %v9726_v42 = vor.u32 %v8673_v6, %v6228_v7  ;;  %v6444_v11 = vld [vmem:[#allocation2 + $0xf0] sm:$0xf0] }
  0xc2   :  { %4298 = vmatpush.bf16.msrb.mxu1 %v8011_v15  ;;  %11075 = vst [vmem:[#allocation40_spill] sm:$0xff] %v9720_v30  ;;  %4357 = vmatpush.bf16.msrb.mxu3 %v8251_v5  ;;  %v9724_v61 = vor.u32 %v8682_v4, %v6226_v63  ;;  %v8764_v62 = vld [vmem:[#allocation2 + $0x1e4] sm:$0xf]  ;;  %v6572_v63 = vld [vmem:[#allocation2 + $0x1f0] sm:$0xf0]  ;;  %v8491_v5 = vor.u32 %v9246_v59, %v8490_v22 }
  0xc3   :  { %11076 = vst [vmem:[#allocation41_spill] sm:$0xff] %v9722_v60  ;;  %v6575_v6 = vor.u32 %v8764_v62, %v6572_v63  ;;  %v8728_v22 = vld [vmem:[#allocation2 + $0xc4] sm:$0xf]  ;;  %v8474_v59 = vld [vmem:[#allocation2 + $0x10c0] sm:$0xf] }
  0xc4   :  { %11077 = vst [vmem:[#allocation42_spill] sm:$0xff] %v9724_v61  ;;  %4379 = vmatpush.bf16.msra.mxu0 %v8491_v5  ;;  %v9242_v63 = vld [vmem:[#allocation2 + $0x10cc] sm:$0xf0]  ;;  %v6556_v5 = vld [vmem:[#allocation2 + $0x1d0] sm:$0xf0] }
  0xc5   :  { %v4018_v52 = vpop.f32.mrf.mxu3  ;;  %11078 = vst [vmem:[#allocation43_spill] sm:$0xff] %v9726_v42 }
  0xc6   :  { %v3989_v41 = vpop.f32.mrf.mxu2  ;;  %4299 = vmatpush.bf16.msrb.mxu1 %v7995_v23  ;;  %4466 = vmatpush.bf16.msra.mxu3 %v6575_v6  ;;  %v6292_v6 = vld [vmem:[%s10902_s0 + $0x218] sm:$0xf0] }
  0xc7   :  { %v3990_v20 = vadd.f32 %v3989_v41, %v3961_v10  ;;  %v3934_v15 = vpop.f32.mrf.mxu0  ;;  %v3963_v21 = vpop.f32.mrf.mxu1  ;;  %v8732_v10 = vld [vmem:[#allocation2 + $0xe4] sm:$0xf] }
  0xc8   :  { %v3964_v58 = vadd.f32 %v3963_v21, %v3934_v15  ;;  %v6447_v55 = vor.u32 %v8732_v10, %v6444_v11  ;;  %v8618_v15 = vld [vmem:[#allocation2 + $0x11e0] sm:$0xf]  ;;  %v9278_v10 = vld [vmem:[#allocation2 + $0x11ec] sm:$0xf0] }
  0xc9   :  { %v9728_v40 = vadd.f32 %v4018_v52, %v3990_v20  ;;  %v6290_v20 = vld [vmem:[%s10902_s0 + $0x1d0] sm:$0xf]  ;;  %v8699_v52 = vld [vmem:[%s10902_s0 + $0x214] sm:$0xf0]  ;;  %v8619_v11 = vor.u32 %v9278_v10, %v8618_v15  ;;  %v8691_v15 = vld [vmem:[%s10902_s0 + $0x1dc] sm:$0xf] }
  0xca   :  { %4165 = vmatmul.bf16.gmra.mxu0 %v9720_v30  ;;  %4194 = vmatmul.bf16.gmra.mxu1 %v9722_v60  ;;  %v6300_v10 = vld [vmem:[%s10902_s0 + $0x220] sm:$0xf0]  ;;  %v8602_v60 = vld [vmem:[#allocation2 + $0x11c0] sm:$0xf] }
  0xcb   :  { %4223 = vmatmul.bf16.gmra.mxu2 %v9724_v61  ;;  %4252 = vmatmul.bf16.gmra.mxu3 %v9726_v42 }
  0xcc   :  { %4437 = vmatpush.bf16.msra.mxu2 %v6447_v55  ;;  %v6428_v55 = vld [vmem:[#allocation2 + $0xd0] sm:$0xf0]  ;;  %4408 = vmatpush.bf16.msra.mxu1 %v8619_v11 }
  0xcd   :  { %v6431_v62 = vor.u32 %v8728_v22, %v6428_v55  ;;  %v9760_v55 = vor.u32 %v8699_v52, %v6290_v20  ;;  %v6412_v52 = vld [vmem:[#allocation2 + $0xb0] sm:$0xf0] }
  0xce   :  { %v3992_v4 = vpop.f32.mrf.mxu2  ;;  %v4021_v23 = vpop.f32.mrf.mxu3 }
  0xcf   :  { %v3993_v21 = vadd.f32 %v3992_v4, %v3964_v58  ;;  %v3936_v7 = vpop.f32.mrf.mxu0  ;;  %v3965_v41 = vpop.f32.mrf.mxu1  ;;  %v8690_v58 = vld [vmem:[%s10902_s0 + $0x1d4] sm:$0xf]  ;;  %v8760_v4 = vld [vmem:[#allocation2 + $0x1c4] sm:$0xf]  ;;  %11079 = vst [vmem:[#allocation44_spill] sm:$0xff] %v9760_v55 }
  0xd0   :  { %v3966_v14 = vadd.f32 %v3965_v41, %v3936_v7  ;;  %v8475_v7 = vor.u32 %v9242_v63, %v8474_v59  ;;  %v6559_v41 = vor.u32 %v8760_v4, %v6556_v5  ;;  %4438 = vmatpush.bf16.msra.mxu2 %v6431_v62  ;;  %v9762_v11 = vor.u32 %v8690_v58, %v6292_v6  ;;  %v9274_v62 = vld [vmem:[#allocation2 + $0x11cc] sm:$0xf0]  ;;  %v8458_v6 = vld [vmem:[#allocation2 + $0x10a0] sm:$0xf] }
  0xd1   :  { %v9734_v43 = vadd.f32 %v4021_v23, %v3993_v21  ;;  %v6298_v21 = vld [vmem:[%s10902_s0 + $0x1d8] sm:$0xf]  ;;  %v8700_v23 = vld [vmem:[%s10902_s0 + $0x21c] sm:$0xf0]  ;;  %v9766_v4 = vor.u32 %v8691_v15, %v6300_v10  ;;  %v8603_v20 = vor.u32 %v9274_v62, %v8602_v60  ;;  %v6090_v62 = vld [vmem:[%s10902_s0 + $0x30] sm:$0xf] }
  0xd2   :  { %4380 = vmatpush.bf16.msra.mxu0 %v8475_v7  ;;  %4467 = vmatpush.bf16.msra.mxu3 %v6559_v41  ;;  %11080 = vst [vmem:[#allocation45_spill] sm:$0xff] %v9762_v11  ;;  %v9764_v59 = vor.u32 %v8700_v23, %v6298_v21  ;;  %v9238_v21 = vld [vmem:[#allocation2 + $0x10ac] sm:$0xf0]  ;;  %v6540_v23 = vld [vmem:[#allocation2 + $0x1b0] sm:$0xf0] }
  0xd3   :  { %11082 = vst [vmem:[#allocation47_spill] sm:$0xff] %v9766_v4  ;;  %4409 = vmatpush.bf16.msra.mxu1 %v8603_v20  ;;  %v8647_v20 = vld [vmem:[%s10902_s0 + $0x74] sm:$0xf0] }
  0xd4   :  { %11081 = vst [vmem:[#allocation46_spill] sm:$0xff] %v9764_v59 }
  0xd6   :  { %v3994_v22 = vpop.f32.mrf.mxu2  ;;  %v4023_v61 = vpop.f32.mrf.mxu3 }
  0xd7   :  { %v3995_v42 = vadd.f32 %v3994_v22, %v3966_v14  ;;  %v3939_v28 = vpop.f32.mrf.mxu0  ;;  %v3968_v63 = vpop.f32.mrf.mxu1  ;;  %v8724_v14 = vld [vmem:[#allocation2 + $0xa4] sm:$0xf] }
  0xd8   :  { %v3969_v27 = vadd.f32 %v3968_v63, %v3939_v28  ;;  %v6415_v58 = vor.u32 %v8724_v14, %v6412_v52  ;;  %v8459_v28 = vor.u32 %v9238_v21, %v8458_v6  ;;  %v8586_v14 = vld [vmem:[#allocation2 + $0x11a0] sm:$0xf]  ;;  %v8638_v52 = vld [vmem:[%s10902_s0 + $0x34] sm:$0xf]  ;;  %v8720_v6 = vld [vmem:[#allocation2 + $0x84] sm:$0xf] }
  0xd9   :  { %v9768_v5 = vadd.f32 %v4023_v61, %v3995_v42  ;;  %v8756_v42 = vld [vmem:[#allocation2 + $0x1a4] sm:$0xf]  ;;  %v6396_v21 = vld [vmem:[#allocation2 + $0x90] sm:$0xf0] }
  0xda   :  { %4170 = vmatmul.bf16.gmra.mxu0 %v9760_v55  ;;  %4199 = vmatmul.bf16.gmra.mxu1 %v9762_v11  ;;  %v6543_v60 = vor.u32 %v8756_v42, %v6540_v23  ;;  %v8442_v42 = vld [vmem:[#allocation2 + $0x1080] sm:$0xf]  ;;  %v8752_v23 = vld [vmem:[#allocation2 + $0x184] sm:$0xf] }
  0xdb   :  { %4228 = vmatmul.bf16.gmra.mxu2 %v9764_v59  ;;  %4257 = vmatmul.bf16.gmra.mxu3 %v9766_v4  ;;  %v9800_v4 = vor.u32 %v8647_v20, %v6090_v62 }
  0xdc   :  { %4439 = vmatpush.bf16.msra.mxu2 %v6415_v58  ;;  %4381 = vmatpush.bf16.msra.mxu0 %v8459_v28  ;;  %v9234_v28 = vld [vmem:[#allocation2 + $0x108c] sm:$0xf0] }
  0xdd   :  { %4468 = vmatpush.bf16.msra.mxu3 %v6543_v60  ;;  %v8648_v60 = vld [vmem:[%s10902_s0 + $0x7c] sm:$0xf0]  ;;  %11083 = vst [vmem:[#allocation48_spill] sm:$0xff] %v9800_v4 }
  0xde   :  { %v3997_v61 = vpop.f32.mrf.mxu2  ;;  %v4026_v41 = vpop.f32.mrf.mxu3 }
  0xdf   :  { %v3998_v7 = vadd.f32 %v3997_v61, %v3969_v27  ;;  %v3941_v15 = vpop.f32.mrf.mxu0  ;;  %v3970_v10 = vpop.f32.mrf.mxu1  ;;  %v9270_v27 = vld [vmem:[#allocation2 + $0x11ac] sm:$0xf0]  ;;  %v6399_v61 = vor.u32 %v8720_v6, %v6396_v21  ;;  %v6100_v6 = vld [vmem:[%s10902_s0 + $0x80] sm:$0xf0] }
  0xe0   :  { %v3971_v63 = vadd.f32 %v3970_v10, %v3941_v15  ;;  %v8587_v58 = vor.u32 %v9270_v27, %v8586_v14  ;;  %v6098_v15 = vld [vmem:[%s10902_s0 + $0x38] sm:$0xf]  ;;  %v8443_v10 = vor.u32 %v9234_v28, %v8442_v42  ;;  %v8639_v27 = vld [vmem:[%s10902_s0 + $0x3c] sm:$0xf] }
  0xe1   :  { %v9774_v22 = vadd.f32 %v4026_v41, %v3998_v7  ;;  %v6524_v7 = vld [vmem:[#allocation2 + $0x190] sm:$0xf0]  ;;  %v6092_v41 = vld [vmem:[%s10902_s0 + $0x78] sm:$0xf0]  ;;  %4440 = vmatpush.bf16.msra.mxu2 %v6399_v61  ;;  %v9804_v42 = vor.u32 %v8648_v60, %v6098_v15  ;;  %v8570_v61 = vld [vmem:[#allocation2 + $0x1180] sm:$0xf] }
  0xe2   :  { %4410 = vmatpush.bf16.msra.mxu1 %v8587_v58  ;;  %v6527_v14 = vor.u32 %v8752_v23, %v6524_v7  ;;  %4382 = vmatpush.bf16.msra.mxu0 %v8443_v10  ;;  %v9802_v58 = vor.u32 %v8638_v52, %v6092_v41  ;;  %v9807_v7 = vor.u32 %v8639_v27, %v6100_v6  ;;  %v8426_v52 = vld [vmem:[#allocation2 + $0x1060] sm:$0xf]  ;;  %v9230_v41 = vld [vmem:[#allocation2 + $0x106c] sm:$0xf0]  ;;  %v6508_v60 = vld [vmem:[#allocation2 + $0x170] sm:$0xf0] }
  0xe3   :  { %11085 = vst [vmem:[#allocation50_spill] sm:$0xff] %v9804_v42  ;;  %v8571_v20 = vor.u32 %v9266_v35, %v8570_v61  ;;  %v8427_v15 = vor.u32 %v9230_v41, %v8426_v52  ;;  %v8665_v61 = vld [vmem:[%s10902_s0 + $0x104] sm:$0xf0]  ;;  %v6364_v52 = vld [vmem:[#allocation2 + $0x50] sm:$0xf0] }
  0xe4   :  { %4469 = vmatpush.bf16.msra.mxu3 %v6527_v14  ;;  %11084 = vst [vmem:[#allocation49_spill] sm:$0xff] %v9802_v58  ;;  %v8410_v41 = vld [vmem:[#allocation2 + $0x1040] sm:$0xf] }
  0xe5   :  { %11086 = vst [vmem:[#allocation51_spill] sm:$0xff] %v9807_v7 }
  0xe6   :  { %v3999_v21 = vpop.f32.mrf.mxu2  ;;  %v4028_v11 = vpop.f32.mrf.mxu3  ;;  %4411 = vmatpush.bf16.msra.mxu1 %v8571_v20  ;;  %4383 = vmatpush.bf16.msra.mxu0 %v8427_v15  ;;  %v9262_v20 = vld [vmem:[#allocation2 + $0x116c] sm:$0xf0]  ;;  %v8744_v15 = vld [vmem:[#allocation2 + $0x144] sm:$0xf] }
  0xe7   :  { %v4000_v59 = vadd.f32 %v3999_v21, %v3971_v63  ;;  %v4040_v55 = vpop.f32.mrf.mxu0  ;;  %v4069_v23 = vpop.f32.mrf.mxu1  ;;  %v8716_v63 = vld [vmem:[#allocation2 + $0x64] sm:$0xf] }
  0xe8   :  { %v4041_v28 = vadd.f32 %v4040_v55, %v9654_v13  ;;  %v6380_v13 = vld [vmem:[#allocation2 + $0x70] sm:$0xf0] }
  0xe9   :  { %v9809_v30 = vadd.f32 %v4028_v11, %v4000_v59  ;;  %v6383_v55 = vor.u32 %v8716_v63, %v6380_v13  ;;  %v8748_v11 = vld [vmem:[#allocation2 + $0x164] sm:$0xf] }
  0xea   :  { %v4070_v62 = vadd.f32 %v4069_v23, %v4041_v28  ;;  %4271 = vmatmul.bf16.vlgmr.msrb.gmra.mxu0 %v9800_v4  ;;  %4300 = vmatmul.bf16.vlgmr.msrb.gmra.mxu1 %v9802_v58  ;;  %v6511_v35 = vor.u32 %v8748_v11, %v6508_v60  ;;  %v6162_v23 = vld [vmem:[%s10902_s0 + $0xc0] sm:$0xf]  ;;  %v6492_v60 = vld [vmem:[#allocation2 + $0x150] sm:$0xf0]  ;;  %v9258_v4 = vld [vmem:[#allocation2 + $0x114c] sm:$0xf0] }
  0xeb   :  { %4329 = vmatmul.bf16.vlgmr.msrb.gmra.mxu2 %v9804_v42  ;;  %4358 = vmatmul.bf16.vlgmr.msrb.gmra.mxu3 %v9807_v7 }
  0xec   :  { %4441 = vmatpush.bf16.msra.mxu2 %v6383_v55  ;;  %4470 = vmatpush.bf16.msra.mxu3 %v6511_v35  ;;  %v8712_v55 = vld [vmem:[#allocation2 + $0x44] sm:$0xf] }
  0xed   :  { %v6367_v11 = vor.u32 %v8712_v55, %v6364_v52  ;;  %v9842_v55 = vor.u32 %v8665_v61, %v6162_v23 }
  0xee   :  { %v4098_v59 = vpop.f32.mrf.mxu2  ;;  %v4127_v14 = vpop.f32.mrf.mxu3 }
  0xef   :  { %v4099_v10 = vadd.f32 %v4098_v59, %v4070_v62  ;;  %v4042_v27 = vpop.f32.mrf.mxu0  ;;  %v4071_v21 = vpop.f32.mrf.mxu1  ;;  %v8554_v62 = vld [vmem:[#allocation2 + $0x1160] sm:$0xf]  ;;  %v9226_v59 = vld [vmem:[#allocation2 + $0x104c] sm:$0xf0]  ;;  %11087 = vst [vmem:[#allocation52_spill] sm:$0xff] %v9842_v55 }
  0xf0   :  { %v4043_v6 = vadd.f32 %v4042_v27, %v9688_v24  ;;  %v8656_v24 = vld [vmem:[%s10902_s0 + $0xc4] sm:$0xf]  ;;  %v8555_v13 = vor.u32 %v9262_v20, %v8554_v62  ;;  %v8666_v27 = vld [vmem:[%s10902_s0 + $0x10c] sm:$0xf0]  ;;  %v8411_v35 = vor.u32 %v9226_v59, %v8410_v41  ;;  %v6172_v62 = vld [vmem:[%s10902_s0 + $0x110] sm:$0xf0]  ;;  %4442 = vmatpush.bf16.msra.mxu2 %v6367_v11 }
  0xf1   :  { %v9816_v28 = vadd.f32 %v4127_v14, %v4099_v10  ;;  %v6164_v10 = vld [vmem:[%s10902_s0 + $0x108] sm:$0xf0]  ;;  %v6170_v14 = vld [vmem:[%s10902_s0 + $0xc8] sm:$0xf]  ;;  %v8538_v11 = vld [vmem:[#allocation2 + $0x1140] sm:$0xf] }
  0xf2   :  { %v4072_v63 = vadd.f32 %v4071_v21, %v4043_v6  ;;  %4412 = vmatpush.bf16.msra.mxu1 %v8555_v13  ;;  %v6495_v6 = vor.u32 %v8744_v15, %v6492_v60  ;;  %v8657_v21 = vld [vmem:[%s10902_s0 + $0xcc] sm:$0xf]  ;;  %4384 = vmatpush.bf16.msra.mxu0 %v8411_v35  ;;  %v9844_v13 = vor.u32 %v8656_v24, %v6164_v10  ;;  %v8394_v24 = vld [vmem:[#allocation2 + $0x1020] sm:$0xf]  ;;  %v9222_v10 = vld [vmem:[#allocation2 + $0x102c] sm:$0xf0] }
  0xf3   :  { %v9846_v41 = vor.u32 %v8666_v27, %v6170_v14  ;;  %v9849_v60 = vor.u32 %v8657_v21, %v6172_v62  ;;  %v8539_v61 = vor.u32 %v9258_v4, %v8538_v11  ;;  %v8395_v27 = vor.u32 %v9222_v10, %v8394_v24  ;;  %v6476_v35 = vld [vmem:[#allocation2 + $0x130] sm:$0xf0]  ;;  %v8683_v11 = vld [vmem:[%s10902_s0 + $0x194] sm:$0xf0]  ;;  %v8378_v10 = vld [vmem:[#allocation2 + $0x1000] sm:$0xf] }
  0xf4   :  { %4471 = vmatpush.bf16.msra.mxu3 %v6495_v6  ;;  %11088 = vst [vmem:[#allocation53_spill] sm:$0xff] %v9844_v13  ;;  %v6332_v24 = vld [vmem:[#allocation2 + $0x10] sm:$0xf0] }
  0xf5   :  { %11089 = vst [vmem:[#allocation54_spill] sm:$0xff] %v9846_v41 }
  0xf6   :  { %v4100_v20 = vpop.f32.mrf.mxu2  ;;  %v4129_v7 = vpop.f32.mrf.mxu3  ;;  %11090 = vst [vmem:[#allocation55_spill] sm:$0xff] %v9849_v60  ;;  %4413 = vmatpush.bf16.msra.mxu1 %v8539_v61  ;;  %4385 = vmatpush.bf16.msra.mxu0 %v8395_v27  ;;  %v9254_v61 = vld [vmem:[#allocation2 + $0x112c] sm:$0xf0]  ;;  %v8736_v27 = vld [vmem:[#allocation2 + $0x104] sm:$0xf] }
  0xf7   :  { %v4101_v52 = vadd.f32 %v4100_v20, %v4072_v63  ;;  %v4045_v42 = vpop.f32.mrf.mxu0  ;;  %v4074_v15 = vpop.f32.mrf.mxu1  ;;  %v8708_v63 = vld [vmem:[#allocation2 + $0x24] sm:$0xf] }
  0xf8   :  { %v4046_v59 = vadd.f32 %v4045_v42, %v9694_v9  ;;  %v6348_v9 = vld [vmem:[#allocation2 + $0x30] sm:$0xf0] }
  0xf9   :  { %v9851_v58 = vadd.f32 %v4129_v7, %v4101_v52  ;;  %v6351_v42 = vor.u32 %v8708_v63, %v6348_v9  ;;  %v8740_v7 = vld [vmem:[#allocation2 + $0x124] sm:$0xf] }
  0xfa   :  { %v4075_v23 = vadd.f32 %v4074_v15, %v4046_v59  ;;  %4276 = vmatmul.bf16.gmra.mxu0 %v9842_v55  ;;  %4305 = vmatmul.bf16.gmra.mxu1 %v9844_v13  ;;  %v6479_v4 = vor.u32 %v8740_v7, %v6476_v35  ;;  %v6234_v15 = vld [vmem:[%s10902_s0 + $0x150] sm:$0xf]  ;;  %v6460_v35 = vld [vmem:[#allocation2 + $0x110] sm:$0xf0] }
  0xfb   :  { %4334 = vmatmul.bf16.gmra.mxu2 %v9846_v41  ;;  %4363 = vmatmul.bf16.gmra.mxu3 %v9849_v60  ;;  %v9250_v60 = vld [vmem:[#allocation2 + $0x110c] sm:$0xf0] }
  0xfc   :  { %4443 = vmatpush.bf16.msra.mxu2 %v6351_v42  ;;  %4472 = vmatpush.bf16.msra.mxu3 %v6479_v4  ;;  %v8704_v42 = vld [vmem:[#allocation2 + $0x4] sm:$0xf] }
  0xfd   :  { %v6335_v7 = vor.u32 %v8704_v42, %v6332_v24  ;;  %v9884_v42 = vor.u32 %v8683_v11, %v6234_v15  ;;  %v8506_v24 = vld [vmem:[#allocation2 + $0x1100] sm:$0xf]  ;;  %v8860_v11 = vld [vmem:[#allocation2 + $0x4e4] sm:$0xf] }
  0xfe   :  { %v4103_v14 = vpop.f32.mrf.mxu2  ;;  %v4132_v21 = vpop.f32.mrf.mxu3 }
  0xff   :  { %v4104_v6 = vadd.f32 %v4103_v14, %v4075_v23  ;;  %v4047_v62 = vpop.f32.mrf.mxu0  ;;  %v4076_v52 = vpop.f32.mrf.mxu1  ;;  %v8522_v23 = vld [vmem:[#allocation2 + $0x1120] sm:$0xf]  ;;  %v9218_v14 = vld [vmem:[#allocation2 + $0x100c] sm:$0xf0]  ;;  %11091 = vst [vmem:[#allocation56_spill] sm:$0xff] %v9884_v42 }
 0x100   :  { %v4048_v20 = vadd.f32 %v4047_v62, %v9728_v40  ;;  %v8674_v40 = vld [vmem:[%s10902_s0 + $0x154] sm:$0xf]  ;;  %v8523_v9 = vor.u32 %v9254_v61, %v8522_v23  ;;  %v8684_v62 = vld [vmem:[%s10902_s0 + $0x19c] sm:$0xf0]  ;;  %v8379_v4 = vor.u32 %v9218_v14, %v8378_v10  ;;  %v6244_v23 = vld [vmem:[%s10902_s0 + $0x1a0] sm:$0xf0]  ;;  %4444 = vmatpush.bf16.msra.mxu2 %v6335_v7 }
 0x101   :  { %v9858_v59 = vadd.f32 %v4132_v21, %v4104_v6  ;;  %v6236_v6 = vld [vmem:[%s10902_s0 + $0x198] sm:$0xf0]  ;;  %v6242_v21 = vld [vmem:[%s10902_s0 + $0x158] sm:$0xf] }
 0x102   :  { %v4077_v63 = vadd.f32 %v4076_v52, %v4048_v20  ;;  %4414 = vmatpush.bf16.msra.mxu1 %v8523_v9  ;;  %v6463_v20 = vor.u32 %v8736_v27, %v6460_v35  ;;  %v8675_v52 = vld [vmem:[%s10902_s0 + $0x15c] sm:$0xf]  ;;  %4386 = vmatpush.bf16.msra.mxu0 %v8379_v4  ;;  %v9886_v14 = vor.u32 %v8674_v40, %v6236_v6  ;;  %v8892_v6 = vld [vmem:[#allocation2 + $0x5e4] sm:$0xf] }
 0x103   :  { %v9888_v27 = vor.u32 %v8684_v62, %v6242_v21  ;;  %v8507_v35 = vor.u32 %v9250_v60, %v8506_v24  ;;  %v9891_v34 = vor.u32 %v8675_v52, %v6244_v23  ;;  %v8796_v60 = vld [vmem:[#allocation2 + $0x2e4] sm:$0xf]  ;;  %v7084_v21 = vld [vmem:[#allocation2 + $0x5f0] sm:$0xf0]  ;;  %v6306_v24 = vld [vmem:[%s10902_s0 + $0x1e0] sm:$0xf] }
 0x104   :  { %4473 = vmatpush.bf16.msra.mxu3 %v6463_v20  ;;  %11092 = vst [vmem:[#allocation57_spill] sm:$0xff] %v9886_v14  ;;  %v7087_v4 = vor.u32 %v8892_v6, %v7084_v21  ;;  %v6684_v6 = vld [vmem:[#allocation2 + $0x2d0] sm:$0xf0]  ;;  %v8888_v21 = vld [vmem:[#allocation2 + $0x5c4] sm:$0xf] }
 0x105   :  { %11093 = vst [vmem:[#allocation58_spill] sm:$0xff] %v9888_v27 }
 0x106   :  { %v4105_v61 = vpop.f32.mrf.mxu2  ;;  %v4134_v9 = vpop.f32.mrf.mxu3  ;;  %11094 = vst [vmem:[#allocation59_spill] sm:$0xff] %v9891_v34  ;;  %4415 = vmatpush.bf16.msra.mxu1 %v8507_v35  ;;  %v6828_v35 = vld [vmem:[#allocation2 + $0x3f0] sm:$0xf0] }
 0x107   :  { %v4106_v41 = vadd.f32 %v4105_v61, %v4077_v63  ;;  %v4050_v10 = vpop.f32.mrf.mxu0  ;;  %v4079_v55 = vpop.f32.mrf.mxu1  ;;  %v6956_v63 = vld [vmem:[#allocation2 + $0x4f0] sm:$0xf0] }
 0x108   :  { %v4051_v13 = vadd.f32 %v4050_v10, %v9734_v43  ;;  %v6959_v40 = vor.u32 %v8860_v11, %v6956_v63  ;;  %v6700_v43 = vld [vmem:[#allocation2 + $0x2f0] sm:$0xf0]  ;;  %4582 = vmatpush.bf16.msrb.mxu3 %v7087_v4  ;;  %v8828_v10 = vld [vmem:[#allocation2 + $0x3e4] sm:$0xf]  ;;  %v6314_v4 = vld [vmem:[%s10902_s0 + $0x1e8] sm:$0xf] }
 0x109   :  { %v9893_v7 = vadd.f32 %v4134_v9, %v4106_v41  ;;  %v6703_v41 = vor.u32 %v8796_v60, %v6700_v43  ;;  %v8701_v9 = vld [vmem:[%s10902_s0 + $0x224] sm:$0xf0]  ;;  %v6831_v11 = vor.u32 %v8828_v10, %v6828_v35  ;;  %v8856_v63 = vld [vmem:[#allocation2 + $0x4c4] sm:$0xf]  ;;  %v6940_v60 = vld [vmem:[#allocation2 + $0x4d0] sm:$0xf0] }
 0x10a   :  { %v4080_v15 = vadd.f32 %v4079_v55, %v4051_v13  ;;  %4281 = vmatmul.bf16.gmra.mxu0 %v9884_v42  ;;  %4310 = vmatmul.bf16.gmra.mxu1 %v9886_v14  ;;  %v6943_v43 = vor.u32 %v8856_v63, %v6940_v60  ;;  %v9926_v35 = vor.u32 %v8701_v9, %v6306_v24  ;;  %v6812_v14 = vld [vmem:[#allocation2 + $0x3d0] sm:$0xf0] }
 0x10b   :  { %4339 = vmatmul.bf16.gmra.mxu2 %v9888_v27  ;;  %4368 = vmatmul.bf16.gmra.mxu3 %v9891_v34 }
 0x10c   :  { %4553 = vmatpush.bf16.msrb.mxu2 %v6959_v40  ;;  %4495 = vmatpush.bf16.msrb.mxu0 %v6703_v41  ;;  %v8792_v40 = vld [vmem:[#allocation2 + $0x2c4] sm:$0xf]  ;;  %v6308_v41 = vld [vmem:[%s10902_s0 + $0x228] sm:$0xf0]  ;;  %11095 = vst [vmem:[#allocation60_spill] sm:$0xff] %v9926_v35 }
 0x10d   :  { %4524 = vmatpush.bf16.msrb.mxu1 %v6831_v11 }
 0x10e   :  { %v4108_v62 = vpop.f32.mrf.mxu2  ;;  %v4137_v55 = vpop.f32.mrf.mxu3 }
 0x10f   :  { %v4109_v20 = vadd.f32 %v4108_v62, %v4080_v15  ;;  %v4052_v13 = vpop.f32.mrf.mxu0  ;;  %v4081_v23 = vpop.f32.mrf.mxu1  ;;  %v7068_v62 = vld [vmem:[#allocation2 + $0x5d0] sm:$0xf0] }
 0x110   :  { %v4053_v52 = vadd.f32 %v4052_v13, %v9768_v5  ;;  %v8692_v5 = vld [vmem:[%s10902_s0 + $0x1e4] sm:$0xf]  ;;  %v7071_v13 = vor.u32 %v8888_v21, %v7068_v62  ;;  %4554 = vmatpush.bf16.msrb.mxu2 %v6943_v43 }
 0x111   :  { %v9900_v61 = vadd.f32 %v4137_v55, %v4109_v20  ;;  %v8702_v20 = vld [vmem:[%s10902_s0 + $0x22c] sm:$0xf0]  ;;  %v6687_v55 = vor.u32 %v8792_v40, %v6684_v6  ;;  %v9928_v11 = vor.u32 %v8692_v5, %v6308_v41  ;;  %v8824_v43 = vld [vmem:[#allocation2 + $0x3c4] sm:$0xf]  ;;  %v6668_v41 = vld [vmem:[#allocation2 + $0x2b0] sm:$0xf0] }
 0x112   :  { %v4082_v15 = vadd.f32 %v4081_v23, %v4053_v52  ;;  %v8693_v52 = vld [vmem:[%s10902_s0 + $0x1ec] sm:$0xf]  ;;  %v6316_v23 = vld [vmem:[%s10902_s0 + $0x230] sm:$0xf0]  ;;  %4583 = vmatpush.bf16.msrb.mxu3 %v7071_v13  ;;  %v9930_v40 = vor.u32 %v8702_v20, %v6314_v4  ;;  %v6815_v9 = vor.u32 %v8824_v43, %v6812_v14  ;;  %v8884_v4 = vld [vmem:[#allocation2 + $0x5a4] sm:$0xf] }
 0x113   :  { %4496 = vmatpush.bf16.msrb.mxu0 %v6687_v55  ;;  %11096 = vst [vmem:[#allocation61_spill] sm:$0xff] %v9928_v11  ;;  %v9933_v62 = vor.u32 %v8693_v52, %v6316_v23  ;;  %v7052_v20 = vld [vmem:[#allocation2 + $0x5b0] sm:$0xf0]  ;;  %v8649_v43 = vld [vmem:[%s10902_s0 + $0x84] sm:$0xf0] }
 0x114   :  { %11097 = vst [vmem:[#allocation62_spill] sm:$0xff] %v9930_v40  ;;  %4525 = vmatpush.bf16.msrb.mxu1 %v6815_v9  ;;  %v7055_v52 = vor.u32 %v8884_v4, %v7052_v20  ;;  %v8820_v9 = vld [vmem:[#allocation2 + $0x3a4] sm:$0xf]  ;;  %v6652_v4 = vld [vmem:[#allocation2 + $0x290] sm:$0xf0] }
 0x115   :  { %11098 = vst [vmem:[#allocation63_spill] sm:$0xff] %v9933_v62  ;;  %v8880_v20 = vld [vmem:[#allocation2 + $0x584] sm:$0xf] }
 0x116   :  { %v4110_v10 = vpop.f32.mrf.mxu2  ;;  %v4139_v60 = vpop.f32.mrf.mxu3  ;;  %4584 = vmatpush.bf16.msrb.mxu3 %v7055_v52  ;;  %v6108_v52 = vld [vmem:[%s10902_s0 + $0x88] sm:$0xf0] }
 0x117   :  { %v4111_v63 = vadd.f32 %v4110_v10, %v4082_v15  ;;  %v4055_v34 = vpop.f32.mrf.mxu0  ;;  %v4084_v21 = vpop.f32.mrf.mxu1  ;;  %v8852_v15 = vld [vmem:[#allocation2 + $0x4a4] sm:$0xf] }
 0x118   :  { %v4056_v6 = vadd.f32 %v4055_v34, %v9774_v22  ;;  %v6924_v34 = vld [vmem:[#allocation2 + $0x4b0] sm:$0xf0]  ;;  %v8788_v22 = vld [vmem:[#allocation2 + $0x2a4] sm:$0xf] }
 0x119   :  { %v9935_v27 = vadd.f32 %v4139_v60, %v4111_v63  ;;  %v6927_v5 = vor.u32 %v8852_v15, %v6924_v34  ;;  %v6671_v13 = vor.u32 %v8788_v22, %v6668_v41  ;;  %v8848_v22 = vld [vmem:[#allocation2 + $0x484] sm:$0xf] }
 0x11a   :  { %v4085_v24 = vadd.f32 %v4084_v21, %v4056_v6  ;;  %4286 = vmatmul.bf16.gmra.mxu0 %v9926_v35  ;;  %4315 = vmatmul.bf16.gmra.mxu1 %v9928_v11  ;;  %v6106_v21 = vld [vmem:[%s10902_s0 + $0x40] sm:$0xf]  ;;  %v8816_v11 = vld [vmem:[#allocation2 + $0x384] sm:$0xf] }
 0x11b   :  { %4344 = vmatmul.bf16.gmra.mxu2 %v9930_v40  ;;  %4373 = vmatmul.bf16.gmra.mxu3 %v9933_v62 }
 0x11c   :  { %4555 = vmatpush.bf16.msrb.mxu2 %v6927_v5  ;;  %4497 = vmatpush.bf16.msrb.mxu0 %v6671_v13  ;;  %v6908_v5 = vld [vmem:[#allocation2 + $0x490] sm:$0xf0]  ;;  %v8640_v13 = vld [vmem:[%s10902_s0 + $0x44] sm:$0xf] }
 0x11d   :  { %v6911_v41 = vor.u32 %v8848_v22, %v6908_v5  ;;  %v9958_v22 = vor.u32 %v8640_v13, %v6108_v52 }
 0x11e   :  { %v4113_v55 = vpop.f32.mrf.mxu2  ;;  %v4142_v10 = vpop.f32.mrf.mxu3 }
 0x11f   :  { %v4114_v23 = vadd.f32 %v4113_v55, %v4085_v24  ;;  %v4057_v14 = vpop.f32.mrf.mxu0  ;;  %v4086_v60 = vpop.f32.mrf.mxu1  ;;  %v6796_v24 = vld [vmem:[#allocation2 + $0x3b0] sm:$0xf0]  ;;  %11100 = vst [vmem:[#allocation65_spill] sm:$0xff] %v9958_v22 }
 0x120   :  { %v4058_v63 = vadd.f32 %v4057_v14, %v9809_v30  ;;  %v6799_v34 = vor.u32 %v8820_v9, %v6796_v24  ;;  %v8784_v30 = vld [vmem:[#allocation2 + $0x284] sm:$0xf]  ;;  %v7036_v55 = vld [vmem:[#allocation2 + $0x590] sm:$0xf0]  ;;  %4556 = vmatpush.bf16.msrb.mxu2 %v6911_v41 }
 0x121   :  { %v9942_v6 = vadd.f32 %v4142_v10, %v4114_v23  ;;  %v6655_v23 = vor.u32 %v8784_v30, %v6652_v4  ;;  %v7039_v10 = vor.u32 %v8880_v20, %v7036_v55  ;;  %v6636_v4 = vld [vmem:[#allocation2 + $0x270] sm:$0xf0]  ;;  %v8876_v20 = vld [vmem:[#allocation2 + $0x564] sm:$0xf] }
 0x122   :  { %v4087_v15 = vadd.f32 %v4086_v60, %v4058_v63  ;;  %4526 = vmatpush.bf16.msrb.mxu1 %v6799_v34  ;;  %v9956_v63 = vor.u32 %v8649_v43, %v6106_v21  ;;  %v6780_v34 = vld [vmem:[#allocation2 + $0x390] sm:$0xf0]  ;;  %v8844_v21 = vld [vmem:[#allocation2 + $0x464] sm:$0xf] }
 0x123   :  { %4498 = vmatpush.bf16.msrb.mxu0 %v6655_v23  ;;  %4585 = vmatpush.bf16.msrb.mxu3 %v7039_v10  ;;  %v6783_v41 = vor.u32 %v8816_v11, %v6780_v34  ;;  %v6892_v43 = vld [vmem:[#allocation2 + $0x470] sm:$0xf0]  ;;  %v8812_v34 = vld [vmem:[#allocation2 + $0x364] sm:$0xf] }
 0x124   :  { %11099 = vst [vmem:[#allocation64_spill] sm:$0xff] %v9956_v63  ;;  %v7020_v55 = vld [vmem:[#allocation2 + $0x570] sm:$0xf0] }
 0x126   :  { %v4115_v14 = vpop.f32.mrf.mxu2  ;;  %v4144_v9 = vpop.f32.mrf.mxu3  ;;  %4527 = vmatpush.bf16.msrb.mxu1 %v6783_v41 }
 0x127   :  { %v4116_v60 = vadd.f32 %v4115_v14, %v4087_v15  ;;  %v4156_v24 = vpop.f32.mrf.mxu0  ;;  %v4185_v62 = vpop.f32.mrf.mxu1  ;;  %v8780_v15 = vld [vmem:[#allocation2 + $0x264] sm:$0xf] }
 0x128   :  { %v4157_v5 = vadd.f32 %v4156_v24, %v9816_v28  ;;  %v6895_v28 = vor.u32 %v8844_v21, %v6892_v43  ;;  %v6639_v52 = vor.u32 %v8780_v15, %v6636_v4  ;;  %v6178_v24 = vld [vmem:[%s10902_s0 + $0xd0] sm:$0xf]  ;;  %v8840_v43 = vld [vmem:[#allocation2 + $0x444] sm:$0xf]  ;;  %v6876_v15 = vld [vmem:[#allocation2 + $0x450] sm:$0xf0] }
 0x129   :  { %v9961_v40 = vadd.f32 %v4144_v9, %v4116_v60  ;;  %v6620_v4 = vld [vmem:[#allocation2 + $0x250] sm:$0xf0] }
 0x12a   :  { %v4186_v30 = vadd.f32 %v4185_v62, %v4157_v5  ;;  %4387 = vmatmul.bf16.vlgmr.msra.gmra.mxu0 %v9956_v63  ;;  %4416 = vmatmul.bf16.vlgmr.msra.gmra.mxu1 %v9958_v22  ;;  %v7023_v62 = vor.u32 %v8876_v20, %v7020_v55  ;;  %v8667_v5 = vld [vmem:[%s10902_s0 + $0x114] sm:$0xf0]  ;;  %v8872_v20 = vld [vmem:[#allocation2 + $0x544] sm:$0xf]  ;;  %v7004_v55 = vld [vmem:[#allocation2 + $0x550] sm:$0xf0] }
 0x12b   :  { %4445 = vmatmul.bf16.vlgmr.msra.gmra.mxu2 %v9354_v48  ;;  %4474 = vmatmul.bf16.vlgmr.msra.gmra.mxu3 %v9356_v53  ;;  %v8808_v48 = vld [vmem:[#allocation2 + $0x344] sm:$0xf] }
 0x12c   :  { %4557 = vmatpush.bf16.msrb.mxu2 %v6895_v28  ;;  %4499 = vmatpush.bf16.msrb.mxu0 %v6639_v52  ;;  %v6879_v28 = vor.u32 %v8840_v43, %v6876_v15  ;;  %v6180_v52 = vld [vmem:[%s10902_s0 + $0x118] sm:$0xf0] }
 0x12d   :  { %4586 = vmatpush.bf16.msrb.mxu3 %v7023_v62 }
 0x12e   :  { %v4214_v13 = vpop.f32.mrf.mxu2  ;;  %v4243_v10 = vpop.f32.mrf.mxu3 }
 0x12f   :  { %v4215_v23 = vadd.f32 %v4214_v13, %v4186_v30  ;;  %v4158_v11 = vpop.f32.mrf.mxu0  ;;  %v4187_v60 = vpop.f32.mrf.mxu1  ;;  %v6764_v30 = vld [vmem:[#allocation2 + $0x370] sm:$0xf0] }
 0x130   :  { %v4159_v14 = vadd.f32 %v4158_v11, %v9851_v58  ;;  %v6767_v21 = vor.u32 %v8812_v34, %v6764_v30  ;;  %v8776_v58 = vld [vmem:[#allocation2 + $0x244] sm:$0xf]  ;;  %v8658_v13 = vld [vmem:[%s10902_s0 + $0xd4] sm:$0xf]  ;;  %4558 = vmatpush.bf16.msrb.mxu2 %v6879_v28  ;;  %v9982_v11 = vor.u32 %v8667_v5, %v6178_v24 }
 0x131   :  { %v9968_v9 = vadd.f32 %v4243_v10, %v4215_v23  ;;  %v6623_v62 = vor.u32 %v8776_v58, %v6620_v4  ;;  %v7007_v23 = vor.u32 %v8872_v20, %v7004_v55  ;;  %v9984_v30 = vor.u32 %v8658_v13, %v6180_v52  ;;  %v8836_v24 = vld [vmem:[#allocation2 + $0x424] sm:$0xf]  ;;  %v6860_v5 = vld [vmem:[#allocation2 + $0x430] sm:$0xf0] }
 0x132   :  { %v4188_v41 = vadd.f32 %v4187_v60, %v4159_v14  ;;  %4528 = vmatpush.bf16.msrb.mxu1 %v6767_v21  ;;  %11101 = vst [vmem:[#allocation66_spill] sm:$0xff] %v9982_v11  ;;  %v6748_v21 = vld [vmem:[#allocation2 + $0x350] sm:$0xf0]  ;;  %v8868_v20 = vld [vmem:[#allocation2 + $0x524] sm:$0xf] }
 0x133   :  { %4500 = vmatpush.bf16.msrb.mxu0 %v6623_v62  ;;  %4587 = vmatpush.bf16.msrb.mxu3 %v7007_v23  ;;  %11102 = vst [vmem:[#allocation67_spill] sm:$0xff] %v9984_v30  ;;  %v6751_v28 = vor.u32 %v8808_v48, %v6748_v21  ;;  %v6604_v4 = vld [vmem:[#allocation2 + $0x230] sm:$0xf0]  ;;  %v8804_v21 = vld [vmem:[#allocation2 + $0x324] sm:$0xf] }
 0x134   :  { %v6988_v55 = vld [vmem:[#allocation2 + $0x530] sm:$0xf0] }
 0x135   :  { %v6991_v62 = vor.u32 %v8868_v20, %v6988_v55  ;;  %v8864_v20 = vld [vmem:[#allocation2 + $0x504] sm:$0xf]  ;;  %v6972_v55 = vld [vmem:[#allocation2 + $0x510] sm:$0xf0] }
 0x136   :  { %v4216_v10 = vpop.f32.mrf.mxu2  ;;  %v4245_v60 = vpop.f32.mrf.mxu3  ;;  %4529 = vmatpush.bf16.msrb.mxu1 %v6751_v28 }
 0x137   :  { %v4217_v14 = vadd.f32 %v4216_v10, %v4188_v41  ;;  %v4161_v34 = vpop.f32.mrf.mxu0  ;;  %v4190_v15 = vpop.f32.mrf.mxu1  ;;  %v8772_v41 = vld [vmem:[#allocation2 + $0x224] sm:$0xf]  ;;  %4588 = vmatpush.bf16.msrb.mxu3 %v6991_v62 }
 0x138   :  { %v4162_v43 = vadd.f32 %v4161_v34, %v9858_v59  ;;  %v6863_v59 = vor.u32 %v8836_v24, %v6860_v5  ;;  %v6607_v52 = vor.u32 %v8772_v41, %v6604_v4  ;;  %v8832_v5 = vld [vmem:[#allocation2 + $0x404] sm:$0xf]  ;;  %v6844_v41 = vld [vmem:[#allocation2 + $0x410] sm:$0xf0] }
 0x139   :  { %v9987_v53 = vadd.f32 %v4245_v60, %v4217_v14  ;;  %v6588_v4 = vld [vmem:[#allocation2 + $0x210] sm:$0xf0] }
 0x13a   :  { %v4191_v58 = vadd.f32 %v4190_v15, %v4162_v43  ;;  %4392 = vmatmul.bf16.gmra.mxu0 %v9982_v11  ;;  %4421 = vmatmul.bf16.gmra.mxu1 %v9984_v30  ;;  %v6250_v43 = vld [vmem:[%s10902_s0 + $0x160] sm:$0xf]  ;;  %v8685_v15 = vld [vmem:[%s10902_s0 + $0x1a4] sm:$0xf0] }
 0x13b   :  { %4450 = vmatmul.bf16.gmra.mxu2 %v9390_v44  ;;  %4479 = vmatmul.bf16.gmra.mxu3 %v9392_v50 }
 0x13c   :  { %4559 = vmatpush.bf16.msrb.mxu2 %v6863_v59  ;;  %4501 = vmatpush.bf16.msrb.mxu0 %v6607_v52  ;;  %v6847_v59 = vor.u32 %v8832_v5, %v6844_v41  ;;  %v6252_v52 = vld [vmem:[%s10902_s0 + $0x1a8] sm:$0xf0] }
 0x13e   :  { %v4219_v13 = vpop.f32.mrf.mxu2  ;;  %v4248_v10 = vpop.f32.mrf.mxu3 }
 0x13f   :  { %v4220_v23 = vadd.f32 %v4219_v13, %v4191_v58  ;;  %v4163_v48 = vpop.f32.mrf.mxu0  ;;  %v4192_v60 = vpop.f32.mrf.mxu1  ;;  %v6732_v58 = vld [vmem:[#allocation2 + $0x330] sm:$0xf0]  ;;  %v8676_v13 = vld [vmem:[%s10902_s0 + $0x164] sm:$0xf] }
 0x140   :  { %v4164_v14 = vadd.f32 %v4163_v48, %v9893_v7  ;;  %v6735_v24 = vor.u32 %v8804_v21, %v6732_v58  ;;  %v8768_v7 = vld [vmem:[#allocation2 + $0x204] sm:$0xf]  ;;  %4560 = vmatpush.bf16.msrb.mxu2 %v6847_v59  ;;  %v10008_v48 = vor.u32 %v8685_v15, %v6250_v43  ;;  %v10010_v41 = vor.u32 %v8676_v13, %v6252_v52  ;;  %v7468_v15 = vld [vmem:[#allocation2 + $0x8f0] sm:$0xf0] }
 0x141   :  { %v9994_v34 = vadd.f32 %v4248_v10, %v4220_v23  ;;  %v6591_v62 = vor.u32 %v8768_v7, %v6588_v4  ;;  %v6975_v23 = vor.u32 %v8864_v20, %v6972_v55  ;;  %v8988_v43 = vld [vmem:[#allocation2 + $0x8e4] sm:$0xf]  ;;  %v7212_v4 = vld [vmem:[#allocation2 + $0x6f0] sm:$0xf0] }
 0x142   :  { %v4193_v28 = vadd.f32 %v4192_v60, %v4164_v14  ;;  %4530 = vmatpush.bf16.msrb.mxu1 %v6735_v24  ;;  %11103 = vst [vmem:[#allocation68_spill] sm:$0xff] %v10008_v48  ;;  %v8800_v14 = vld [vmem:[#allocation2 + $0x304] sm:$0xf]  ;;  %v6716_v60 = vld [vmem:[#allocation2 + $0x310] sm:$0xf0]  ;;  %v7471_v59 = vor.u32 %v8988_v43, %v7468_v15 }
 0x143   :  { %4502 = vmatpush.bf16.msrb.mxu0 %v6591_v62  ;;  %4589 = vmatpush.bf16.msrb.mxu3 %v6975_v23  ;;  %11104 = vst [vmem:[#allocation69_spill] sm:$0xff] %v10010_v41  ;;  %v6719_v50 = vor.u32 %v8800_v14, %v6716_v60  ;;  %v9020_v20 = vld [vmem:[#allocation2 + $0x9e4] sm:$0xf]  ;;  %v6322_v14 = vld [vmem:[%s10902_s0 + $0x1f0] sm:$0xf] }
 0x144   :  { %4669 = vmatpush.bf16.msra.mxu2 %v7471_v59  ;;  %v8703_v60 = vld [vmem:[%s10902_s0 + $0x234] sm:$0xf0]  ;;  %v8984_v43 = vld [vmem:[#allocation2 + $0x8c4] sm:$0xf]  ;;  %v7452_v15 = vld [vmem:[#allocation2 + $0x8d0] sm:$0xf0] }
 0x145   :  { %v7196_v59 = vld [vmem:[#allocation2 + $0x6d0] sm:$0xf0] }
 0x146   :  { %v4221_v10 = vpop.f32.mrf.mxu2  ;;  %v4250_v58 = vpop.f32.mrf.mxu3  ;;  %4531 = vmatpush.bf16.msrb.mxu1 %v6719_v50 }
 0x147   :  { %v4222_v21 = vadd.f32 %v4221_v10, %v4193_v28  ;;  %v4166_v5 = vpop.f32.mrf.mxu0  ;;  %v4195_v30 = vpop.f32.mrf.mxu1  ;;  %v8924_v28 = vld [vmem:[#allocation2 + $0x6e4] sm:$0xf] }
 0x148   :  { %v4167_v44 = vadd.f32 %v4166_v5, %v9900_v61  ;;  %v7596_v61 = vld [vmem:[#allocation2 + $0x9f0] sm:$0xf0]  ;;  %v7215_v13 = vor.u32 %v8924_v28, %v7212_v4  ;;  %v7455_v28 = vor.u32 %v8984_v43, %v7452_v15  ;;  %v9016_v4 = vld [vmem:[#allocation2 + $0x9c4] sm:$0xf] }
 0x149   :  { %v10013_v24 = vadd.f32 %v4250_v58, %v4222_v21  ;;  %v7599_v52 = vor.u32 %v9020_v20, %v7596_v61  ;;  %v8956_v21 = vld [vmem:[#allocation2 + $0x7e4] sm:$0xf]  ;;  %v7340_v58 = vld [vmem:[#allocation2 + $0x7f0] sm:$0xf0] }
 0x14a   :  { %v4196_v7 = vadd.f32 %v4195_v30, %v4167_v44  ;;  %4397 = vmatmul.bf16.gmra.mxu0 %v10008_v48  ;;  %4426 = vmatmul.bf16.gmra.mxu1 %v10010_v41  ;;  %v7580_v20 = vld [vmem:[#allocation2 + $0x9d0] sm:$0xf0] }
 0x14b   :  { %4455 = vmatmul.bf16.gmra.mxu2 %v9426_v36  ;;  %4484 = vmatmul.bf16.gmra.mxu3 %v9428_v37  ;;  %v8694_v61 = vld [vmem:[%s10902_s0 + $0x1f4] sm:$0xf]  ;;  %v8952_v37 = vld [vmem:[#allocation2 + $0x7c4] sm:$0xf] }
 0x14c   :  { %4611 = vmatpush.bf16.msra.mxu0 %v7215_v13  ;;  %4698 = vmatpush.bf16.msra.mxu3 %v7599_v52  ;;  %v7583_v52 = vor.u32 %v9016_v4, %v7580_v20  ;;  %v9012_v4 = vld [vmem:[#allocation2 + $0x9a4] sm:$0xf]  ;;  %v7564_v20 = vld [vmem:[#allocation2 + $0x9b0] sm:$0xf0] }
 0x14d   :  { %4670 = vmatpush.bf16.msra.mxu2 %v7455_v28  ;;  %v8896_v36 = vld [vmem:[#allocation2 + $0x604] sm:$0xf] }
 0x14e   :  { %v4224_v55 = vpop.f32.mrf.mxu2  ;;  %v4253_v44 = vpop.f32.mrf.mxu3 }
 0x14f   :  { %v4225_v50 = vadd.f32 %v4224_v55, %v4196_v7  ;;  %v4168_v30 = vpop.f32.mrf.mxu0  ;;  %v4197_v23 = vpop.f32.mrf.mxu1  ;;  %v7343_v7 = vor.u32 %v8956_v21, %v7340_v58  ;;  %v6324_v55 = vld [vmem:[%s10902_s0 + $0x238] sm:$0xf0] }
 0x150   :  { %v4169_v62 = vadd.f32 %v4168_v30, %v9935_v27  ;;  %v8920_v27 = vld [vmem:[#allocation2 + $0x6c4] sm:$0xf]  ;;  %4699 = vmatpush.bf16.msra.mxu3 %v7583_v52  ;;  %v10036_v21 = vor.u32 %v8694_v61, %v6324_v55 }
 0x151   :  { %v10020_v10 = vadd.f32 %v4253_v44, %v4225_v50  ;;  %4640 = vmatpush.bf16.msra.mxu1 %v7343_v7  ;;  %v7199_v13 = vor.u32 %v8920_v27, %v7196_v59  ;;  %v10034_v44 = vor.u32 %v8703_v60, %v6322_v14  ;;  %v7324_v7 = vld [vmem:[#allocation2 + $0x7d0] sm:$0xf0]  ;;  %v8980_v14 = vld [vmem:[#allocation2 + $0x8a4] sm:$0xf] }
 0x152   :  { %v4198_v5 = vadd.f32 %v4197_v23, %v4169_v62  ;;  %11106 = vst [vmem:[#allocation71_spill] sm:$0xff] %v10036_v21  ;;  %v7327_v28 = vor.u32 %v8952_v37, %v7324_v7  ;;  %v7436_v60 = vld [vmem:[#allocation2 + $0x8b0] sm:$0xf0] }
 0x153   :  { %11105 = vst [vmem:[#allocation70_spill] sm:$0xff] %v10034_v44  ;;  %4612 = vmatpush.bf16.msra.mxu0 %v7199_v13  ;;  %v7180_v59 = vld [vmem:[#allocation2 + $0x6b0] sm:$0xf0]  ;;  %v7567_v13 = vor.u32 %v9012_v4, %v7564_v20 }
 0x154   :  { %v7548_v4 = vld [vmem:[#allocation2 + $0x990] sm:$0xf0] }
 0x155   :  { %4641 = vmatpush.bf16.msra.mxu1 %v7327_v28  ;;  %4700 = vmatpush.bf16.msra.mxu3 %v7567_v13 }
 0x156   :  { %v4226_v50 = vpop.f32.mrf.mxu2  ;;  %v4255_v62 = vpop.f32.mrf.mxu3 }
 0x157   :  { %v4227_v30 = vadd.f32 %v4226_v50, %v4198_v5  ;;  %v4171_v23 = vpop.f32.mrf.mxu0  ;;  %v4200_v43 = vpop.f32.mrf.mxu1  ;;  %v8916_v5 = vld [vmem:[#allocation2 + $0x6a4] sm:$0xf] }
 0x158   :  { %v4172_v58 = vadd.f32 %v4171_v23, %v9942_v6  ;;  %v7439_v6 = vor.u32 %v8980_v14, %v7436_v60  ;;  %v7183_v55 = vor.u32 %v8916_v5, %v7180_v59  ;;  %v8976_v14 = vld [vmem:[#allocation2 + $0x884] sm:$0xf]  ;;  %v7420_v60 = vld [vmem:[#allocation2 + $0x890] sm:$0xf0] }
 0x159   :  { %v10039_v15 = vadd.f32 %v4255_v62, %v4227_v30  ;;  %v7423_v5 = vor.u32 %v8976_v14, %v7420_v60  ;;  %v7164_v59 = vld [vmem:[#allocation2 + $0x690] sm:$0xf0]  ;;  %v9004_v14 = vld [vmem:[#allocation2 + $0x964] sm:$0xf] }
 0x15a   :  { %v4201_v27 = vadd.f32 %v4200_v43, %v4172_v58  ;;  %4402 = vmatmul.bf16.gmra.mxu0 %v10034_v44  ;;  %4431 = vmatmul.bf16.gmra.mxu1 %v10036_v21  ;;  %v8948_v58 = vld [vmem:[#allocation2 + $0x7a4] sm:$0xf]  ;;  %v7308_v43 = vld [vmem:[#allocation2 + $0x7b0] sm:$0xf0] }
 0x15b   :  { %4460 = vmatmul.bf16.gmra.mxu2 %v9462_v16  ;;  %4489 = vmatmul.bf16.gmra.mxu3 %v9464_v17  ;;  %v7311_v28 = vor.u32 %v8948_v58, %v7308_v43  ;;  %v8912_v17 = vld [vmem:[#allocation2 + $0x684] sm:$0xf]  ;;  %v7404_v58 = vld [vmem:[#allocation2 + $0x870] sm:$0xf0] }
 0x15c   :  { %4671 = vmatpush.bf16.msra.mxu2 %v7439_v6  ;;  %4613 = vmatpush.bf16.msra.mxu0 %v7183_v55  ;;  %v7167_v6 = vor.u32 %v8912_v17, %v7164_v59  ;;  %v8972_v17 = vld [vmem:[#allocation2 + $0x864] sm:$0xf]  ;;  %v7532_v60 = vld [vmem:[#allocation2 + $0x970] sm:$0xf0] }
 0x15d   :  { %4642 = vmatpush.bf16.msra.mxu1 %v7311_v28  ;;  %v8908_v43 = vld [vmem:[#allocation2 + $0x664] sm:$0xf]  ;;  %v7148_v28 = vld [vmem:[#allocation2 + $0x670] sm:$0xf0] }
 0x15e   :  { %v4229_v61 = vpop.f32.mrf.mxu2  ;;  %v4258_v50 = vpop.f32.mrf.mxu3  ;;  %v7151_v59 = vor.u32 %v8908_v43, %v7148_v28  ;;  %v7516_v43 = vld [vmem:[#allocation2 + $0x950] sm:$0xf0] }
 0x15f   :  { %v4230_v52 = vadd.f32 %v4229_v61, %v4201_v27  ;;  %v4173_v37 = vpop.f32.mrf.mxu0  ;;  %v4202_v62 = vpop.f32.mrf.mxu1  ;;  %v9008_v27 = vld [vmem:[#allocation2 + $0x984] sm:$0xf]  ;;  %v7708_v44 = vld [vmem:[#allocation2 + $0xad0] sm:$0xf0] }
 0x160   :  { %v4174_v30 = vadd.f32 %v4173_v37, %v9961_v40  ;;  %v7551_v20 = vor.u32 %v9008_v27, %v7548_v4  ;;  %4672 = vmatpush.bf16.msra.mxu2 %v7423_v5  ;;  %4614 = vmatpush.bf16.msra.mxu0 %v7167_v6  ;;  %v8944_v37 = vld [vmem:[#allocation2 + $0x784] sm:$0xf]  ;;  %v7535_v27 = vor.u32 %v9004_v14, %v7532_v60 }
 0x161   :  { %v10046_v23 = vadd.f32 %v4258_v50, %v4230_v52 }
 0x162   :  { %v4203_v7 = vadd.f32 %v4202_v62, %v4174_v30  ;;  %4701 = vmatpush.bf16.msra.mxu3 %v7551_v20  ;;  %v7292_v30 = vld [vmem:[#allocation2 + $0x790] sm:$0xf0] }
 0x163   :  { %v7295_v62 = vor.u32 %v8944_v37, %v7292_v30  ;;  %v8968_v37 = vld [vmem:[#allocation2 + $0x844] sm:$0xf]  ;;  %v7388_v30 = vld [vmem:[#allocation2 + $0x850] sm:$0xf0] }
 0x164   :  { %4615 = vmatpush.bf16.msra.mxu0 %v7151_v59 }
 0x165   :  { %4643 = vmatpush.bf16.msra.mxu1 %v7295_v62  ;;  %v8904_v62 = vld [vmem:[#allocation2 + $0x644] sm:$0xf] }
 0x166   :  { %v4231_v40 = vpop.f32.mrf.mxu2  ;;  %v4260_v55 = vpop.f32.mrf.mxu3  ;;  %4702 = vmatpush.bf16.msra.mxu3 %v7535_v27 }
 0x167   :  { %v4232_v61 = vadd.f32 %v4231_v40, %v4203_v7  ;;  %v10048_v13 = vpop.f32.mrf.mxu0  ;;  %v10050_v52 = vpop.f32.mrf.mxu1  ;;  %v7407_v7 = vor.u32 %v8972_v17, %v7404_v58  ;;  %v8940_v40 = vld [vmem:[#allocation2 + $0x764] sm:$0xf]  ;;  %v7391_v17 = vor.u32 %v8968_v37, %v7388_v30  ;;  %v7132_v58 = vld [vmem:[#allocation2 + $0x650] sm:$0xf0] }
 0x168   :  { %v7135_v28 = vor.u32 %v8904_v62, %v7132_v58  ;;  %v8900_v30 = vld [vmem:[#allocation2 + $0x624] sm:$0xf] }
 0x169   :  { %v10052_v50 = vadd.f32 %v4260_v55, %v4232_v61  ;;  %4673 = vmatpush.bf16.msra.mxu2 %v7407_v7  ;;  %v7276_v61 = vld [vmem:[#allocation2 + $0x770] sm:$0xf0]  ;;  %v8996_v58 = vld [vmem:[#allocation2 + $0x924] sm:$0xf] }
 0x16a   :  { %4503 = vmatmul.bf16.vlgmr.msrb.gmra.mxu0 %v9358_v54  ;;  %4532 = vmatmul.bf16.vlgmr.msrb.gmra.mxu1 %v9360_v57  ;;  %v7279_v55 = vor.u32 %v8940_v40, %v7276_v61  ;;  %v8936_v40 = vld [vmem:[#allocation2 + $0x744] sm:$0xf]  ;;  %v7260_v61 = vld [vmem:[#allocation2 + $0x750] sm:$0xf0] }
 0x16b   :  { %4561 = vmatmul.bf16.vlgmr.msrb.gmra.mxu2 %v9498_v0  ;;  %4590 = vmatmul.bf16.vlgmr.msrb.gmra.mxu3 %v9500_v1  ;;  %v9000_v1 = vld [vmem:[#allocation2 + $0x944] sm:$0xf]  ;;  %v7263_v37 = vor.u32 %v8936_v40, %v7260_v61 }
 0x16c   :  { %4644 = vmatpush.bf16.msra.mxu1 %v7279_v55  ;;  %v7519_v14 = vor.u32 %v9000_v1, %v7516_v43  ;;  %4616 = vmatpush.bf16.msra.mxu0 %v7135_v28  ;;  %v8964_v1 = vld [vmem:[#allocation2 + $0x824] sm:$0xf]  ;;  %v7372_v55 = vld [vmem:[#allocation2 + $0x830] sm:$0xf0] }
 0x16d   :  { %4674 = vmatpush.bf16.msra.mxu2 %v7391_v17  ;;  %v7375_v62 = vor.u32 %v8964_v1, %v7372_v55  ;;  %v7116_v17 = vld [vmem:[#allocation2 + $0x630] sm:$0xf0]  ;;  %v8960_v1 = vld [vmem:[#allocation2 + $0x804] sm:$0xf] }
 0x16e   :  { %v10058_v5 = vpop.f32.mrf.mxu2  ;;  %v10060_v4 = vpop.f32.mrf.mxu3  ;;  %4703 = vmatpush.bf16.msra.mxu3 %v7519_v14  ;;  %v7500_v43 = vld [vmem:[#allocation2 + $0x930] sm:$0xf0]  ;;  %v7119_v14 = vor.u32 %v8900_v30, %v7116_v17  ;;  %v8992_v57 = vld [vmem:[#allocation2 + $0x904] sm:$0xf] }
 0x16f   :  { %v10062_v6 = vpop.f32.mrf.mxu0  ;;  %v10064_v20 = vpop.f32.mrf.mxu1  ;;  %v7503_v0 = vor.u32 %v8996_v58, %v7500_v43  ;;  %v7356_v55 = vld [vmem:[#allocation2 + $0x810] sm:$0xf0] }
 0x170   :  { %4645 = vmatpush.bf16.msra.mxu1 %v7263_v37  ;;  %4617 = vmatpush.bf16.msra.mxu0 %v7119_v14  ;;  %v8932_v37 = vld [vmem:[#allocation2 + $0x724] sm:$0xf]  ;;  %v7484_v30 = vld [vmem:[#allocation2 + $0x910] sm:$0xf0] }
 0x171   :  { %4675 = vmatpush.bf16.msra.mxu2 %v7375_v62  ;;  %v7487_v58 = vor.u32 %v8992_v57, %v7484_v30  ;;  %v8928_v62 = vld [vmem:[#allocation2 + $0x704] sm:$0xf] }
 0x172   :  { %4704 = vmatpush.bf16.msra.mxu3 %v7503_v0  ;;  %v7228_v0 = vld [vmem:[#allocation2 + $0x710] sm:$0xf0]  ;;  %v9116_v57 = vld [vmem:[#allocation2 + $0xce4] sm:$0xf] }
 0x176   :  { %v10066_v60 = vpop.f32.mrf.mxu2  ;;  %v10068_v7 = vpop.f32.mrf.mxu3  ;;  %4705 = vmatpush.bf16.msra.mxu3 %v7487_v58 }
 0x177   :  { %v10070_v59 = vpop.f32.mrf.mxu0  ;;  %v10072_v27 = vpop.f32.mrf.mxu1 }
 0x17a   :  { %4508 = vmatmul.bf16.gmra.mxu0 %v9394_v51  ;;  %4537 = vmatmul.bf16.gmra.mxu1 %v9396_v56  ;;  %v7359_v56 = vor.u32 %v8960_v1, %v7356_v55  ;;  %v7100_v51 = vld [vmem:[#allocation2 + $0x610] sm:$0xf0]  ;;  %v9148_v1 = vld [vmem:[#allocation2 + $0xde4] sm:$0xf] }
 0x17b   :  { %4566 = vmatmul.bf16.gmra.mxu2 %v9534_v45  ;;  %4595 = vmatmul.bf16.gmra.mxu3 %v9536_v46  ;;  %v7244_v46 = vld [vmem:[#allocation2 + $0x730] sm:$0xf0]  ;;  %v7103_v17 = vor.u32 %v8896_v36, %v7100_v51 }
 0x17c   :  { %v7247_v45 = vor.u32 %v8932_v37, %v7244_v46  ;;  %4676 = vmatpush.bf16.msra.mxu2 %v7359_v56  ;;  %v7231_v37 = vor.u32 %v8928_v62, %v7228_v0  ;;  %v7980_v51 = vld [vmem:[#allocation2 + $0xcf0] sm:$0xf0]  ;;  %v9052_v56 = vld [vmem:[#allocation2 + $0xae4] sm:$0xf] }
 0x17d   :  { %4618 = vmatpush.bf16.msra.mxu0 %v7103_v17  ;;  %v7983_v36 = vor.u32 %v9116_v57, %v7980_v51  ;;  %v8108_v55 = vld [vmem:[#allocation2 + $0xdf0] sm:$0xf0]  ;;  %v9112_v57 = vld [vmem:[#allocation2 + $0xcc4] sm:$0xf] }
 0x17e   :  { %v10078_v28 = vpop.f32.mrf.mxu2  ;;  %v10080_v16 = vpop.f32.mrf.mxu3  ;;  %4646 = vmatpush.bf16.msra.mxu1 %v7247_v45  ;;  %v7724_v45 = vld [vmem:[#allocation2 + $0xaf0] sm:$0xf0]  ;;  %v8111_v58 = vor.u32 %v9148_v1, %v8108_v55 }
 0x17f   :  { %v10082_v40 = vpop.f32.mrf.mxu0  ;;  %v10084_v61 = vpop.f32.mrf.mxu1  ;;  %v7727_v17 = vor.u32 %v9052_v56, %v7724_v45  ;;  %v7964_v51 = vld [vmem:[#allocation2 + $0xcd0] sm:$0xf0]  ;;  %v9144_v56 = vld [vmem:[#allocation2 + $0xdc4] sm:$0xf] }
 0x180   :  { %4785 = vmatpush.bf16.msrb.mxu2 %v7983_v36  ;;  %4814 = vmatpush.bf16.msrb.mxu3 %v8111_v58  ;;  %v7967_v21 = vor.u32 %v9112_v57, %v7964_v51  ;;  %v8092_v45 = vld [vmem:[#allocation2 + $0xdd0] sm:$0xf0]  ;;  %v9044_v58 = vld [vmem:[#allocation2 + $0xaa4] sm:$0xf] }
 0x181   :  { %4727 = vmatpush.bf16.msrb.mxu0 %v7727_v17  ;;  %v8095_v41 = vor.u32 %v9144_v56, %v8092_v45  ;;  %v9140_v51 = vld [vmem:[#allocation2 + $0xda4] sm:$0xf]  ;;  %v8076_v56 = vld [vmem:[#allocation2 + $0xdb0] sm:$0xf0] }
 0x182   :  { %4647 = vmatpush.bf16.msra.mxu1 %v7231_v37 }
 0x184   :  { %4786 = vmatpush.bf16.msrb.mxu2 %v7967_v21  ;;  %4815 = vmatpush.bf16.msrb.mxu3 %v8095_v41  ;;  %v7948_v21 = vld [vmem:[#allocation2 + $0xcb0] sm:$0xf0] }
 0x185   :  { %v7692_v41 = vld [vmem:[#allocation2 + $0xab0] sm:$0xf0] }
 0x186   :  { %v10086_v43 = vpop.f32.mrf.mxu2  ;;  %v10088_v14 = vpop.f32.mrf.mxu3 }
 0x187   :  { %v10090_v46 = vpop.f32.mrf.mxu0  ;;  %v10092_v54 = vpop.f32.mrf.mxu1 }
 0x18a   :  { %4513 = vmatmul.bf16.gmra.mxu0 %v9430_v38  ;;  %4542 = vmatmul.bf16.gmra.mxu1 %v9432_v39  ;;  %v9048_v38 = vld [vmem:[#allocation2 + $0xac4] sm:$0xf] }
 0x18b   :  { %4571 = vmatmul.bf16.gmra.mxu2 %v9570_v32  ;;  %4600 = vmatmul.bf16.gmra.mxu3 %v9572_v33  ;;  %v9084_v33 = vld [vmem:[#allocation2 + $0xbe4] sm:$0xf]  ;;  %v7852_v32 = vld [vmem:[#allocation2 + $0xbf0] sm:$0xf0]  ;;  %v7711_v55 = vor.u32 %v9048_v38, %v7708_v44  ;;  %v4273_v38 = vadd.f32 %v10048_v13, %v9968_v9 }
 0x18c   :  { %v7855_v39 = vor.u32 %v9084_v33, %v7852_v32  ;;  %v7836_v32 = vld [vmem:[#allocation2 + $0xbd0] sm:$0xf0]  ;;  %v9108_v44 = vld [vmem:[#allocation2 + $0xca4] sm:$0xf] }
 0x18d   :  { %4728 = vmatpush.bf16.msrb.mxu0 %v7711_v55  ;;  %v7951_v57 = vor.u32 %v9108_v44, %v7948_v21  ;;  %v7695_v55 = vor.u32 %v9044_v58, %v7692_v41  ;;  %v4302_v9 = vadd.f32 %v10050_v52, %v4273_v38  ;;  %v7820_v44 = vld [vmem:[#allocation2 + $0xbb0] sm:$0xf0]  ;;  %v4275_v58 = vadd.f32 %v10062_v6, %v9987_v53  ;;  %v9104_v41 = vld [vmem:[#allocation2 + $0xc84] sm:$0xf] }
 0x18e   :  { %v10098_v30 = vpop.f32.mrf.mxu2  ;;  %v10100_v62 = vpop.f32.mrf.mxu3  ;;  %4756 = vmatpush.bf16.msrb.mxu1 %v7855_v39  ;;  %v9080_v39 = vld [vmem:[#allocation2 + $0xbc4] sm:$0xf]  ;;  %v8060_v52 = vld [vmem:[#allocation2 + $0xd90] sm:$0xf0] }
 0x18f   :  { %v10102_v0 = vpop.f32.mrf.mxu0  ;;  %v10104_v37 = vpop.f32.mrf.mxu1  ;;  %v7839_v33 = vor.u32 %v9080_v39, %v7836_v32  ;;  %v8079_v39 = vor.u32 %v9140_v51, %v8076_v56  ;;  %4787 = vmatpush.bf16.msrb.mxu2 %v7951_v57  ;;  %v7932_v51 = vld [vmem:[#allocation2 + $0xc90] sm:$0xf0]  ;;  %v9040_v56 = vld [vmem:[#allocation2 + $0xa84] sm:$0xf] }
 0x190   :  { %v7676_v57 = vld [vmem:[#allocation2 + $0xa90] sm:$0xf0] }
 0x191   :  { %4729 = vmatpush.bf16.msrb.mxu0 %v7695_v55  ;;  %4816 = vmatpush.bf16.msrb.mxu3 %v8079_v39  ;;  %v7679_v39 = vor.u32 %v9040_v56, %v7676_v57  ;;  %v8044_v56 = vld [vmem:[#allocation2 + $0xd70] sm:$0xf0] }
 0x192   :  { %4757 = vmatpush.bf16.msrb.mxu1 %v7839_v33  ;;  %v9076_v33 = vld [vmem:[#allocation2 + $0xba4] sm:$0xf] }
 0x193   :  { %v7823_v21 = vor.u32 %v9076_v33, %v7820_v44  ;;  %v9072_v44 = vld [vmem:[#allocation2 + $0xb84] sm:$0xf] }
 0x195   :  { %4730 = vmatpush.bf16.msrb.mxu0 %v7679_v39 }
 0x196   :  { %v10106_v1 = vpop.f32.mrf.mxu2  ;;  %v10108_v36 = vpop.f32.mrf.mxu3  ;;  %4758 = vmatpush.bf16.msrb.mxu1 %v7823_v21  ;;  %v7804_v21 = vld [vmem:[#allocation2 + $0xb90] sm:$0xf0] }
 0x197   :  { %v10110_v48 = vpop.f32.mrf.mxu0  ;;  %v10112_v17 = vpop.f32.mrf.mxu1 }
 0x19a   :  { %4518 = vmatmul.bf16.gmra.mxu0 %v9466_v18  ;;  %4547 = vmatmul.bf16.gmra.mxu1 %v9468_v19  ;;  %v7935_v19 = vor.u32 %v9104_v41, %v7932_v51  ;;  %v9136_v18 = vld [vmem:[#allocation2 + $0xd84] sm:$0xf]  ;;  %v7807_v41 = vor.u32 %v9072_v44, %v7804_v21  ;;  %v7788_v21 = vld [vmem:[#allocation2 + $0xb70] sm:$0xf0] }
 0x19b   :  { %4576 = vmatmul.bf16.gmra.mxu2 %v9606_v25  ;;  %4605 = vmatmul.bf16.gmra.mxu3 %v9608_v26  ;;  %v4331_v26 = vadd.f32 %v10058_v5, %v4302_v9  ;;  %v8063_v11 = vor.u32 %v9136_v18, %v8060_v52  ;;  %v4304_v9 = vadd.f32 %v10064_v20, %v4275_v58  ;;  %v9132_v58 = vld [vmem:[#allocation2 + $0xd64] sm:$0xf] }
 0x19c   :  { %4788 = vmatpush.bf16.msrb.mxu2 %v7935_v19  ;;  %v4278_v18 = vadd.f32 %v10070_v59, %v9994_v34  ;;  %4759 = vmatpush.bf16.msrb.mxu1 %v7807_v41  ;;  %v9100_v19 = vld [vmem:[#allocation2 + $0xc64] sm:$0xf]  ;;  %v8047_v39 = vor.u32 %v9132_v58, %v8044_v56 }
 0x19d   :  { %v4360_v38 = vadd.f32 %v10060_v4, %v4331_v26  ;;  %4817 = vmatpush.bf16.msrb.mxu3 %v8063_v11  ;;  %v4333_v51 = vadd.f32 %v10066_v60, %v4304_v9  ;;  %v7916_v11 = vld [vmem:[#allocation2 + $0xc70] sm:$0xf0]  ;;  %v9036_v4 = vld [vmem:[#allocation2 + $0xa64] sm:$0xf] }
 0x19e   :  { %v10120_v45 = vpop.f32.mrf.mxu2  ;;  %v10122_v32 = vpop.f32.mrf.mxu3  ;;  %v7919_v20 = vor.u32 %v9100_v19, %v7916_v11  ;;  %v7660_v60 = vld [vmem:[#allocation2 + $0xa70] sm:$0xf0]  ;;  %v9068_v44 = vld [vmem:[#allocation2 + $0xb64] sm:$0xf] }
 0x19f   :  { %v10124_v25 = vpop.f32.mrf.mxu0  ;;  %v10127_v13 = vpop.f32.mrf.mxu1  ;;  %v4362_v57 = vadd.f32 %v10068_v7, %v4333_v51  ;;  %v7791_v41 = vor.u32 %v9068_v44, %v7788_v21  ;;  %v4280_v51 = vadd.f32 %v10082_v40, %v10013_v24  ;;  %v9032_v11 = vld [vmem:[#allocation2 + $0xa44] sm:$0xf]  ;;  %v7884_v21 = vld [vmem:[#allocation2 + $0xc30] sm:$0xf0] }
 0x1a0   :  { %4789 = vmatpush.bf16.msrb.mxu2 %v7919_v20  ;;  %v9128_v20 = vld [vmem:[#allocation2 + $0xd44] sm:$0xf] }
 0x1a1   :  { %4818 = vmatpush.bf16.msrb.mxu3 %v8047_v39  ;;  %4760 = vmatpush.bf16.msrb.mxu1 %v7791_v41  ;;  %v4309_v24 = vadd.f32 %v10084_v61, %v4280_v51  ;;  %v4283_v61 = vadd.f32 %v10090_v46, %v10020_v10  ;;  %v9092_v44 = vld [vmem:[#allocation2 + $0xc24] sm:$0xf] }
 0x1a2   :  { %v9028_v41 = vld [vmem:[#allocation2 + $0xa24] sm:$0xf] }
 0x1a6   :  { %v10133_v55 = vpop.f32.mrf.mxu2  ;;  %v10135_v33 = vpop.f32.mrf.mxu3 }
 0x1a7   :  { %v4388_v5 = vpop.f32.mrf.mxu0  ;;  %v4417_v6 = vpop.f32.mrf.mxu1 }
 0x1a8   :  { %v4389_v53 = vadd.f32 %v4388_v5, %v4360_v38  ;;  %v7663_v38 = vor.u32 %v9036_v4, %v7660_v60  ;;  %v4307_v5 = vadd.f32 %v10072_v27, %v4278_v18  ;;  %v9096_v27 = vld [vmem:[#allocation2 + $0xc44] sm:$0xf]  ;;  %v7900_v18 = vld [vmem:[#allocation2 + $0xc50] sm:$0xf0] }
 0x1a9   :  { %v7903_v19 = vor.u32 %v9096_v27, %v7900_v18  ;;  %v7644_v4 = vld [vmem:[#allocation2 + $0xa50] sm:$0xf0] }
 0x1aa   :  { %v4418_v26 = vadd.f32 %v4417_v6, %v4389_v53  ;;  %4619 = vmatmul.bf16.vlgmr.msra.gmra.mxu0 %v9502_v2  ;;  %4648 = vmatmul.bf16.vlgmr.msra.gmra.mxu1 %v9504_v3  ;;  %v7647_v56 = vor.u32 %v9032_v11, %v7644_v4  ;;  %v4312_v4 = vadd.f32 %v10092_v54, %v4283_v61  ;;  %v9088_v54 = vld [vmem:[#allocation2 + $0xc04] sm:$0xf] }
 0x1ab   :  { %4677 = vmatmul.bf16.vlgmr.msra.gmra.mxu2 %v9642_v29  ;;  %4706 = vmatmul.bf16.vlgmr.msra.gmra.mxu3 %v9644_v31  ;;  %v9056_v61 = vld [vmem:[#allocation2 + $0xb04] sm:$0xf] }
 0x1ac   :  { %6003 = vst [vmem:[%s10904_s2] sm:$0xff] %v4418_v26  ;;  %4731 = vmatpush.bf16.msrb.mxu0 %v7663_v38  ;;  %v4336_v26 = vadd.f32 %v10078_v28, %v4307_v5  ;;  %v8028_v28 = vld [vmem:[#allocation2 + $0xd50] sm:$0xf0]  ;;  %4790 = vmatpush.bf16.msrb.mxu2 %v7903_v19 }
 0x1ad   :  { %v8031_v38 = vor.u32 %v9128_v20, %v8028_v28  ;;  %v7772_v5 = vld [vmem:[#allocation2 + $0xb50] sm:$0xf0] }
 0x1ae   :  { %v4446_v52 = vpop.f32.mrf.mxu2  ;;  %v4475_v34 = vpop.f32.mrf.mxu3  ;;  %v4365_v60 = vadd.f32 %v10080_v16, %v4336_v26  ;;  %v4338_v16 = vadd.f32 %v10086_v43, %v4309_v24  ;;  %v7887_v43 = vor.u32 %v9092_v44, %v7884_v21  ;;  %v7628_v26 = vld [vmem:[#allocation2 + $0xa30] sm:$0xf0] }
 0x1af   :  { %v4390_v59 = vpop.f32.mrf.mxu0  ;;  %v10150_v9 = vadd.f32 %v4475_v34, %v4446_v52  ;;  %v4419_v6 = vpop.f32.mrf.mxu1  ;;  %4819 = vmatpush.bf16.msrb.mxu3 %v8031_v38  ;;  %v7631_v18 = vor.u32 %v9028_v41, %v7628_v26  ;;  %v8012_v19 = vld [vmem:[#allocation2 + $0xd30] sm:$0xf0]  ;;  %v4285_v38 = vadd.f32 %v10102_v0, %v10039_v15 }
 0x1b0   :  { %v4391_v53 = vadd.f32 %v4390_v59, %v4362_v57  ;;  %4732 = vmatpush.bf16.msrb.mxu0 %v7647_v56  ;;  %v9064_v59 = vld [vmem:[#allocation2 + $0xb44] sm:$0xf]  ;;  %v4367_v51 = vadd.f32 %v10088_v14, %v4338_v16  ;;  %4791 = vmatpush.bf16.msrb.mxu2 %v7887_v43  ;;  %v7756_v28 = vld [vmem:[#allocation2 + $0xb30] sm:$0xf0]  ;;  %v4341_v14 = vadd.f32 %v10098_v30, %v4312_v4 }
 0x1b1   :  { %v9060_v56 = vld [vmem:[#allocation2 + $0xb24] sm:$0xf]  ;;  %v7868_v24 = vld [vmem:[#allocation2 + $0xc10] sm:$0xf0]  ;;  %v4314_v41 = vadd.f32 %v10104_v37, %v4285_v38 }
 0x1b2   :  { %v4420_v7 = vadd.f32 %v4419_v6, %v4391_v53  ;;  %v7775_v53 = vor.u32 %v9064_v59, %v7772_v5  ;;  %v7612_v59 = vld [vmem:[#allocation2 + $0xa10] sm:$0xf0]  ;;  %v9120_v5 = vld [vmem:[#allocation2 + $0xd04] sm:$0xf] }
 0x1b3   :  { %v7996_v30 = vld [vmem:[#allocation2 + $0xd10] sm:$0xf0]  ;;  %v11110_v37 = vld [vmem:[#allocation41_spill] sm:$0xff] }
 0x1b4   :  { %6007 = vst [vmem:[%s10904_s2 + $0x20] sm:$0xff] %v4420_v7  ;;  %4761 = vmatpush.bf16.msrb.mxu1 %v7775_v53  ;;  %v9124_v7 = vld [vmem:[#allocation2 + $0xd24] sm:$0xf]  ;;  %4733 = vmatpush.bf16.msrb.mxu0 %v7631_v18  ;;  %v4370_v53 = vadd.f32 %v10100_v62, %v4341_v14  ;;  %v7740_v44 = vld [vmem:[#allocation2 + $0xb10] sm:$0xf0]  ;;  %v7999_v15 = vor.u32 %v9120_v5, %v7996_v30  ;;  %v11107_v18 = vld [vmem:[#allocation28_spill] sm:$0xff] }
 0x1b5   :  { %v8015_v46 = vor.u32 %v9124_v7, %v8012_v19  ;;  %v7743_v0 = vor.u32 %v9056_v61, %v7740_v44  ;;  %v4343_v62 = vadd.f32 %v10106_v1, %v4314_v41  ;;  %v11108_v19 = vld [vmem:[#allocation29_spill] sm:$0xff]  ;;  %v8492_v4 = vld [vmem:[#allocation2 + $0x10f0] sm:$0xf0] }
 0x1b6   :  { %v4448_v58 = vpop.f32.mrf.mxu2  ;;  %v4477_v57 = vpop.f32.mrf.mxu3  ;;  %v9180_v1 = vld [vmem:[#allocation2 + $0xee4] sm:$0xf]  ;;  %v8364_v5 = vld [vmem:[#allocation2 + $0xff0] sm:$0xf0] }
 0x1b7   :  { %v4393_v52 = vpop.f32.mrf.mxu0  ;;  %v10160_v40 = vadd.f32 %v4477_v57, %v4448_v58  ;;  %v4422_v34 = vpop.f32.mrf.mxu1  ;;  %4820 = vmatpush.bf16.msrb.mxu3 %v8015_v46  ;;  %v7759_v57 = vor.u32 %v9060_v56, %v7756_v28  ;;  %v9244_v46 = vld [vmem:[#allocation2 + $0x10e4] sm:$0xf]  ;;  %v4372_v28 = vadd.f32 %v10108_v36, %v4343_v62  ;;  %v8476_v30 = vld [vmem:[#allocation2 + $0x10d0] sm:$0xf0] }
 0x1b8   :  { %v4394_v39 = vadd.f32 %v4393_v52, %v4365_v60  ;;  %v9276_v56 = vld [vmem:[#allocation2 + $0x11e4] sm:$0xf] }
 0x1b9   :  { %4762 = vmatpush.bf16.msrb.mxu1 %v7759_v57  ;;  %v9176_v61 = vld [vmem:[#allocation2 + $0xec4] sm:$0xf] }
 0x1ba   :  { %v4423_v6 = vadd.f32 %v4422_v34, %v4394_v39  ;;  %4624 = vmatmul.bf16.gmra.mxu0 %v9538_v47  ;;  %4653 = vmatmul.bf16.gmra.mxu1 %v9540_v49  ;;  %v7871_v39 = vor.u32 %v9088_v54, %v7868_v24  ;;  %v9024_v34 = vld [vmem:[#allocation2 + $0xa04] sm:$0xf] }
 0x1bb   :  { %4682 = vmatmul.bf16.gmra.mxu2 %v9680_v8  ;;  %4711 = vmatmul.bf16.gmra.mxu3 %v9682_v12  ;;  %v7810_v8 = vld [vmem:[#allocation2 + $0xb88] sm:$0xf] }
 0x1bc   :  { %6011 = vst [vmem:[%s10904_s2 + $0x40] sm:$0xff] %v4423_v6  ;;  %v7615_v6 = vor.u32 %v9024_v34, %v7612_v59  ;;  %4792 = vmatpush.bf16.msrb.mxu2 %v7871_v39  ;;  %4821 = vmatpush.bf16.msrb.mxu3 %v7999_v15  ;;  %v9212_v59 = vld [vmem:[#allocation2 + $0xfe4] sm:$0xf]  ;;  %v8604_v15 = vld [vmem:[#allocation2 + $0x11d0] sm:$0xf0] }
 0x1bd   :  { %4763 = vmatpush.bf16.msrb.mxu1 %v7743_v0 }
 0x1be   :  { %v4451_v27 = vpop.f32.mrf.mxu2  ;;  %v4480_v11 = vpop.f32.mrf.mxu3  ;;  %4734 = vmatpush.bf16.msrb.mxu0 %v7615_v6  ;;  %v9240_v6 = vld [vmem:[#allocation2 + $0x10c4] sm:$0xf] }
 0x1bf   :  { %v4395_v10 = vpop.f32.mrf.mxu0  ;;  %v10174_v20 = vadd.f32 %v4480_v11, %v4451_v27  ;;  %v4424_v58 = vpop.f32.mrf.mxu1  ;;  %v11109_v11 = vld [vmem:[#allocation40_spill] sm:$0xff]  ;;  %v8479_v44 = vor.u32 %v9240_v6, %v8476_v30  ;;  %v9204_v30 = vld [vmem:[#allocation2 + $0xfa4] sm:$0xf] }
 0x1c0   :  { %v4396_v60 = vadd.f32 %v4395_v10, %v4367_v51  ;;  %v4288_v10 = vadd.f32 %v10110_v48, %v10046_v23 }
 0x1c2   :  { %v4425_v52 = vadd.f32 %v4424_v58, %v4396_v60  ;;  %v8495_v60 = vor.u32 %v9244_v46, %v8492_v4  ;;  %v8236_v58 = vld [vmem:[#allocation2 + $0xef0] sm:$0xf0]  ;;  %v4317_v23 = vadd.f32 %v10112_v17, %v4288_v10  ;;  %v4290_v17 = vadd.f32 %v10124_v25, %v10052_v50  ;;  %v9208_v46 = vld [vmem:[#allocation2 + $0xfc4] sm:$0xf] }
 0x1c3   :  { %v8239_v14 = vor.u32 %v9180_v1, %v8236_v58  ;;  %v8348_v4 = vld [vmem:[#allocation2 + $0xfd0] sm:$0xf0]  ;;  %v11111_v58 = vld [vmem:[#allocation32_spill] sm:$0xff] }
 0x1c4   :  { %6015 = vst [vmem:[%s10904_s2 + $0x60] sm:$0xff] %v4425_v52  ;;  %v8620_v52 = vld [vmem:[#allocation2 + $0x11f0] sm:$0xf0]  ;;  %4901 = vmatpush.bf16.msra.mxu2 %v8495_v60 }
 0x1c5   :  { %v8623_v48 = vor.u32 %v9276_v56, %v8620_v52  ;;  %4843 = vmatpush.bf16.msra.mxu0 %v8239_v14  ;;  %v8351_v56 = vor.u32 %v9208_v46, %v8348_v4  ;;  %v8460_v14 = vld [vmem:[#allocation2 + $0x10b0] sm:$0xf0] }
 0x1c6   :  { %v4453_v16 = vpop.f32.mrf.mxu2  ;;  %v4482_v21 = vpop.f32.mrf.mxu3 }
 0x1c7   :  { %v4398_v43 = vpop.f32.mrf.mxu0  ;;  %v10184_v26 = vadd.f32 %v4482_v21, %v4453_v16  ;;  %v4427_v51 = vpop.f32.mrf.mxu1  ;;  %4930 = vmatpush.bf16.msra.mxu3 %v8623_v48  ;;  %v8367_v16 = vor.u32 %v9212_v59, %v8364_v5  ;;  %v8220_v21 = vld [vmem:[#allocation2 + $0xed0] sm:$0xf0] }
 0x1c8   :  { %v4399_v7 = vadd.f32 %v4398_v43, %v4370_v53  ;;  %v4346_v53 = vadd.f32 %v10120_v45, %v4317_v23  ;;  %v9272_v43 = vld [vmem:[#allocation2 + $0x11c4] sm:$0xf]  ;;  %v8223_v0 = vor.u32 %v9176_v61, %v8220_v21  ;;  %4902 = vmatpush.bf16.msra.mxu2 %v8479_v44  ;;  %v8332_v61 = vld [vmem:[#allocation2 + $0xfb0] sm:$0xf0] }
 0x1c9   :  { %4872 = vmatpush.bf16.msra.mxu1 %v8367_v16  ;;  %v8607_v41 = vor.u32 %v9272_v43, %v8604_v15  ;;  %v8335_v21 = vor.u32 %v9204_v30, %v8332_v61  ;;  %v9232_v43 = vld [vmem:[#allocation2 + $0x1084] sm:$0xf]  ;;  %v8444_v15 = vld [vmem:[#allocation2 + $0x1090] sm:$0xf0] }
 0x1ca   :  { %v4428_v27 = vadd.f32 %v4427_v51, %v4399_v7  ;;  %4629 = vmatmul.bf16.gmra.mxu0 %v11107_v18  ;;  %4658 = vmatmul.bf16.gmra.mxu1 %v11108_v19  ;;  %v4375_v45 = vadd.f32 %v10122_v32, %v4346_v53  ;;  %v11112_v32 = vld [vmem:[#allocation33_spill] sm:$0xff] }
 0x1cb   :  { %4687 = vmatmul.bf16.gmra.mxu2 %v11109_v11  ;;  %4716 = vmatmul.bf16.gmra.mxu3 %v11110_v37  ;;  %v8983_v11 = vld [vmem:[#allocation2 + $0x8b4] sm:$0xf0] }
 0x1cc   :  { %6019 = vst [vmem:[%s10904_s2 + $0x80] sm:$0xff] %v4428_v27  ;;  %4844 = vmatpush.bf16.msra.mxu0 %v8223_v0  ;;  %4931 = vmatpush.bf16.msra.mxu3 %v8607_v41  ;;  %v4319_v27 = vadd.f32 %v10127_v13, %v4290_v17  ;;  %v11114_v13 = vld [vmem:[#allocation45_spill] sm:$0xff]  ;;  %v8447_v17 = vor.u32 %v9232_v43, %v8444_v15  ;;  %v8188_v0 = vld [vmem:[#allocation2 + $0xe90] sm:$0xf0] }
 0x1cd   :  { %4873 = vmatpush.bf16.msra.mxu1 %v8351_v56  ;;  %v9264_v41 = vld [vmem:[#allocation2 + $0x1184] sm:$0xf] }
 0x1ce   :  { %v4456_v57 = vpop.f32.mrf.mxu2  ;;  %v4485_v38 = vpop.f32.mrf.mxu3  ;;  %v4348_v60 = vadd.f32 %v10133_v55, %v4319_v27  ;;  %v8204_v55 = vld [vmem:[#allocation2 + $0xeb0] sm:$0xf0]  ;;  %v9196_v15 = vld [vmem:[#allocation2 + $0xf64] sm:$0xf] }
 0x1cf   :  { %v4400_v54 = vpop.f32.mrf.mxu0  ;;  %v10198_v24 = vadd.f32 %v4485_v38, %v4456_v57  ;;  %v4429_v34 = vpop.f32.mrf.mxu1  ;;  %v9236_v57 = vld [vmem:[#allocation2 + $0x10a4] sm:$0xf] }
 0x1d0   :  { %v4401_v39 = vadd.f32 %v4400_v54, %v4372_v28  ;;  %v11113_v28 = vld [vmem:[#allocation44_spill] sm:$0xff]  ;;  %v8463_v52 = vor.u32 %v9236_v57, %v8460_v14  ;;  %v9172_v38 = vld [vmem:[#allocation2 + $0xea4] sm:$0xf]  ;;  %v4377_v48 = vadd.f32 %v10135_v33, %v4348_v60  ;;  %v11115_v57 = vld [vmem:[#allocation34_spill] sm:$0xff] }
 0x1d1   :  { %v9268_v54 = vld [vmem:[#allocation2 + $0x11a4] sm:$0xf]  ;;  %4874 = vmatpush.bf16.msra.mxu1 %v8335_v21 }
 0x1d2   :  { %v4430_v36 = vadd.f32 %v4429_v34, %v4401_v39  ;;  %v8207_v39 = vor.u32 %v9172_v38, %v8204_v55  ;;  %v8588_v34 = vld [vmem:[#allocation2 + $0x11b0] sm:$0xf0]  ;;  %4903 = vmatpush.bf16.msra.mxu2 %v8463_v52  ;;  %v9168_v33 = vld [vmem:[#allocation2 + $0xe84] sm:$0xf]  ;;  %v11117_v38 = vld [vmem:[#allocation48_spill] sm:$0xff] }
 0x1d3   :  { %v8591_v53 = vor.u32 %v9268_v54, %v8588_v34  ;;  %v9200_v60 = vld [vmem:[#allocation2 + $0xf84] sm:$0xf]  ;;  %v11116_v52 = vld [vmem:[#allocation35_spill] sm:$0xff] }
 0x1d4   :  { %6023 = vst [vmem:[%s10904_s2 + $0xa0] sm:$0xff] %v4430_v36  ;;  %4845 = vmatpush.bf16.msra.mxu0 %v8207_v39  ;;  %v11118_v55 = vld [vmem:[#allocation49_spill] sm:$0xff]  ;;  %v8172_v34 = vld [vmem:[#allocation2 + $0xe70] sm:$0xf0] }
 0x1d5   :  { %4932 = vmatpush.bf16.msra.mxu3 %v8591_v53  ;;  %v9228_v54 = vld [vmem:[#allocation2 + $0x1064] sm:$0xf] }
 0x1d6   :  { %v4458_v7 = vpop.f32.mrf.mxu2  ;;  %v4487_v51 = vpop.f32.mrf.mxu3  ;;  %4904 = vmatpush.bf16.msra.mxu2 %v8447_v17 }
 0x1d7   :  { %v4403_v62 = vpop.f32.mrf.mxu0  ;;  %v10208_v10 = vadd.f32 %v4487_v51, %v4458_v7  ;;  %v4432_v50 = vpop.f32.mrf.mxu1  ;;  %v8191_v7 = vor.u32 %v9168_v33, %v8188_v0  ;;  %v8300_v33 = vld [vmem:[#allocation2 + $0xf70] sm:$0xf0] }
 0x1d8   :  { %v4404_v25 = vadd.f32 %v4403_v62, %v4375_v45  ;;  %v8572_v45 = vld [vmem:[#allocation2 + $0x1190] sm:$0xf0]  ;;  %v8303_v0 = vor.u32 %v9196_v15, %v8300_v33 }
 0x1d9   :  { %v8575_v51 = vor.u32 %v9264_v41, %v8572_v45  ;;  %4846 = vmatpush.bf16.msra.mxu0 %v8191_v7  ;;  %v9224_v41 = vld [vmem:[#allocation2 + $0x1044] sm:$0xf]  ;;  %v8412_v45 = vld [vmem:[#allocation2 + $0x1050] sm:$0xf0] }
 0x1da   :  { %v4433_v1 = vadd.f32 %v4432_v50, %v4404_v25  ;;  %4634 = vmatmul.bf16.gmra.mxu0 %v11111_v58  ;;  %4663 = vmatmul.bf16.gmra.mxu1 %v11112_v32  ;;  %v9160_v7 = vld [vmem:[#allocation2 + $0xe44] sm:$0xf]  ;;  %v8524_v15 = vld [vmem:[#allocation2 + $0x1130] sm:$0xf0] }
 0x1db   :  { %4692 = vmatmul.bf16.gmra.mxu2 %v11113_v28  ;;  %4721 = vmatmul.bf16.gmra.mxu3 %v11114_v13  ;;  %v7458_v13 = vld [vmem:[#allocation2 + $0x8c8] sm:$0xf]  ;;  %v8987_v28 = vld [vmem:[#allocation2 + $0x8d4] sm:$0xf0] }
 0x1dc   :  { %6027 = vst [vmem:[%s10904_s2 + $0xc0] sm:$0xff] %v4433_v1  ;;  %4933 = vmatpush.bf16.msra.mxu3 %v8575_v51  ;;  %v8316_v1 = vld [vmem:[#allocation2 + $0xf90] sm:$0xf0]  ;;  %v8415_v51 = vor.u32 %v9224_v41, %v8412_v45 }
 0x1dd   :  { %v8319_v14 = vor.u32 %v9200_v60, %v8316_v1 }
 0x1de   :  { %v4461_v23 = vpop.f32.mrf.mxu2  ;;  %v4490_v59 = vpop.f32.mrf.mxu3 }
 0x1df   :  { %v4405_v5 = vpop.f32.mrf.mxu0  ;;  %v10219_v36 = vadd.f32 %v4490_v59, %v4461_v23  ;;  %v4434_v6 = vpop.f32.mrf.mxu1  ;;  %4875 = vmatpush.bf16.msra.mxu1 %v8319_v14  ;;  %v9164_v23 = vld [vmem:[#allocation2 + $0xe64] sm:$0xf]  ;;  %v8556_v59 = vld [vmem:[#allocation2 + $0x1170] sm:$0xf0] }
 0x1e0   :  { %v4406_v16 = vadd.f32 %v4405_v5, %v4377_v48  ;;  %v8428_v48 = vld [vmem:[#allocation2 + $0x1070] sm:$0xf0]  ;;  %v8175_v53 = vor.u32 %v9164_v23, %v8172_v34  ;;  %v9192_v23 = vld [vmem:[#allocation2 + $0xf44] sm:$0xf] }
 0x1e1   :  { %v8431_v39 = vor.u32 %v9228_v54, %v8428_v48 }
 0x1e2   :  { %v4435_v44 = vadd.f32 %v4434_v6, %v4406_v16  ;;  %4847 = vmatpush.bf16.msra.mxu0 %v8175_v53  ;;  %v11121_v53 = vld [vmem:[#allocation52_spill] sm:$0xff] }
 0x1e3   :  { %4905 = vmatpush.bf16.msra.mxu2 %v8431_v39  ;;  %4876 = vmatpush.bf16.msra.mxu1 %v8303_v0  ;;  %v8284_v39 = vld [vmem:[#allocation2 + $0xf50] sm:$0xf0] }
 0x1e4   :  { %6031 = vst [vmem:[%s10904_s2 + $0xe0] sm:$0xff] %v4435_v44 }
 0x1e6   :  { %v4463_v62 = vpop.f32.mrf.mxu2  ;;  %v4492_v27 = vpop.f32.mrf.mxu3 }
 0x1e7   :  { %v4504_v25 = vpop.f32.mrf.mxu0  ;;  %v10224_v50 = vadd.f32 %v4492_v27, %v4463_v62  ;;  %v4533_v4 = vpop.f32.mrf.mxu1  ;;  %v8156_v62 = vld [vmem:[#allocation2 + $0xe50] sm:$0xf0]  ;;  %v9256_v27 = vld [vmem:[#allocation2 + $0x1144] sm:$0xf]  ;;  %4906 = vmatpush.bf16.msra.mxu2 %v8415_v51 }
 0x1e8   :  { %v4505_v46 = vadd.f32 %v4504_v25, %v10150_v9  ;;  %v9260_v9 = vld [vmem:[#allocation2 + $0x1164] sm:$0xf]  ;;  %v8540_v25 = vld [vmem:[#allocation2 + $0x1150] sm:$0xf0] }
 0x1e9   :  { %v8559_v16 = vor.u32 %v9260_v9, %v8556_v59  ;;  %v11119_v9 = vld [vmem:[#allocation38_spill] sm:$0xff]  ;;  %v8287_v59 = vor.u32 %v9192_v23, %v8284_v39  ;;  %v9248_v23 = vld [vmem:[#allocation2 + $0x1104] sm:$0xf]  ;;  %v8508_v39 = vld [vmem:[#allocation2 + $0x1110] sm:$0xf0] }
 0x1ea   :  { %v4534_v56 = vadd.f32 %v4533_v4, %v4505_v46  ;;  %4735 = vmatmul.bf16.vlgmr.msrb.gmra.mxu0 %v11115_v57  ;;  %4764 = vmatmul.bf16.vlgmr.msrb.gmra.mxu1 %v11116_v52  ;;  %v8159_v46 = vor.u32 %v9160_v7, %v8156_v62  ;;  %v8543_v4 = vor.u32 %v9256_v27, %v8540_v25  ;;  %v9188_v25 = vld [vmem:[#allocation2 + $0xf24] sm:$0xf]  ;;  %v9075_v52 = vld [vmem:[#allocation2 + $0xb94] sm:$0xf0] }
 0x1eb   :  { %4793 = vmatmul.bf16.vlgmr.msrb.gmra.mxu2 %v11117_v38  ;;  %4822 = vmatmul.bf16.vlgmr.msrb.gmra.mxu3 %v11118_v55  ;;  %v9087_v38 = vld [vmem:[#allocation2 + $0xbf4] sm:$0xf0] }
 0x1ec   :  { %4934 = vmatpush.bf16.msra.mxu3 %v8559_v16  ;;  %4848 = vmatpush.bf16.msra.mxu0 %v8159_v46  ;;  %v11122_v16 = vld [vmem:[#allocation53_spill] sm:$0xff]  ;;  %v8268_v46 = vld [vmem:[#allocation2 + $0xf30] sm:$0xf0] }
 0x1ed   :  { %4877 = vmatpush.bf16.msra.mxu1 %v8287_v59  ;;  %v8511_v59 = vor.u32 %v9248_v23, %v8508_v39 }
 0x1ee   :  { %v4562_v5 = vpop.f32.mrf.mxu2  ;;  %v4591_v30 = vpop.f32.mrf.mxu3 }
 0x1ef   :  { %v4563_v6 = vadd.f32 %v4562_v5, %v4534_v56  ;;  %v4506_v61 = vpop.f32.mrf.mxu0  ;;  %v4535_v21 = vpop.f32.mrf.mxu1  ;;  %v11120_v5 = vld [vmem:[#allocation39_spill] sm:$0xff] }
 0x1f0   :  { %v4507_v44 = vadd.f32 %v4506_v61, %v10160_v40  ;;  %4935 = vmatpush.bf16.msra.mxu3 %v8543_v4  ;;  %v9156_v61 = vld [vmem:[#allocation2 + $0xe24] sm:$0xf] }
 0x1f1   :  { %v10232_v43 = vadd.f32 %v4591_v30, %v4563_v6  ;;  %v9220_v6 = vld [vmem:[#allocation2 + $0x1024] sm:$0xf]  ;;  %v8396_v30 = vld [vmem:[#allocation2 + $0x1030] sm:$0xf0] }
 0x1f2   :  { %v4536_v17 = vadd.f32 %v4535_v21, %v4507_v44  ;;  %v8140_v44 = vld [vmem:[#allocation2 + $0xe30] sm:$0xf0]  ;;  %v9252_v21 = vld [vmem:[#allocation2 + $0x1124] sm:$0xf] }
 0x1f3   :  { %v8527_v0 = vor.u32 %v9252_v21, %v8524_v15 }
 0x1f5   :  { %4936 = vmatpush.bf16.msra.mxu3 %v8527_v0 }
 0x1f6   :  { %v4564_v40 = vpop.f32.mrf.mxu2  ;;  %v4593_v1 = vpop.f32.mrf.mxu3 }
 0x1f7   :  { %v4565_v60 = vadd.f32 %v4564_v40, %v4536_v17  ;;  %v4509_v56 = vpop.f32.mrf.mxu0  ;;  %v4538_v54 = vpop.f32.mrf.mxu1  ;;  %v8143_v17 = vor.u32 %v9156_v61, %v8140_v44  ;;  %v8271_v40 = vor.u32 %v9188_v25, %v8268_v46  ;;  %v6450_v25 = vld [vmem:[#allocation2 + $0xe8] sm:$0xf] }
 0x1f8   :  { %v4510_v14 = vadd.f32 %v4509_v56, %v10174_v20  ;;  %v8399_v20 = vor.u32 %v9220_v6, %v8396_v30  ;;  %v9152_v56 = vld [vmem:[#allocation2 + $0xe04] sm:$0xf]  ;;  %v8252_v30 = vld [vmem:[#allocation2 + $0xf10] sm:$0xf0] }
 0x1f9   :  { %v10235_v48 = vadd.f32 %v4593_v1, %v4565_v60  ;;  %4849 = vmatpush.bf16.msra.mxu0 %v8143_v17  ;;  %v9216_v60 = vld [vmem:[#allocation2 + $0x1004] sm:$0xf]  ;;  %v8380_v1 = vld [vmem:[#allocation2 + $0x1010] sm:$0xf0]  ;;  %4878 = vmatpush.bf16.msra.mxu1 %v8271_v40  ;;  %v6834_v40 = vld [vmem:[#allocation2 + $0x3e8] sm:$0xf] }
 0x1fa   :  { %v4539_v34 = vadd.f32 %v4538_v54, %v4510_v14  ;;  %4740 = vmatmul.bf16.gmra.mxu0 %v11119_v9  ;;  %4769 = vmatmul.bf16.gmra.mxu1 %v11120_v5  ;;  %v8383_v14 = vor.u32 %v9216_v60, %v8380_v1  ;;  %v8124_v54 = vld [vmem:[#allocation2 + $0xe10] sm:$0xf0]  ;;  %v9184_v6 = vld [vmem:[#allocation2 + $0xf04] sm:$0xf]  ;;  %v9079_v5 = vld [vmem:[#allocation2 + $0xbb4] sm:$0xf0] }
 0x1fb   :  { %4798 = vmatmul.bf16.gmra.mxu2 %v11121_v53  ;;  %4827 = vmatmul.bf16.gmra.mxu3 %v11122_v16  ;;  %v8255_v21 = vor.u32 %v9184_v6, %v8252_v30  ;;  %v8767_v6 = vld [vmem:[#allocation2 + $0x1f4] sm:$0xf0] }
 0x1fc   :  { %4907 = vmatpush.bf16.msra.mxu2 %v8399_v20  ;;  %4937 = vmatpush.bf16.msra.mxu3 %v8511_v59 }
 0x1fd   :  { %4879 = vmatpush.bf16.msra.mxu1 %v8255_v21  ;;  %v6434_v21 = vld [vmem:[#allocation2 + $0xc8] sm:$0xf] }
 0x1fe   :  { %v4567_v33 = vpop.f32.mrf.mxu2  ;;  %v4596_v45 = vpop.f32.mrf.mxu3 }
 0x1ff   :  { %v4568_v41 = vadd.f32 %v4567_v33, %v4539_v34  ;;  %v4511_v7 = vpop.f32.mrf.mxu0  ;;  %v4540_v62 = vpop.f32.mrf.mxu1  ;;  %v8127_v34 = vor.u32 %v9152_v56, %v8124_v54 }
 0x200   :  { %v4512_v51 = vadd.f32 %v4511_v7, %v10184_v26  ;;  %4908 = vmatpush.bf16.msra.mxu2 %v8383_v14  ;;  %v11125_v7 = vld [vmem:[#allocation57_spill] sm:$0xff] }
 0x201   :  { %v10242_v27 = vadd.f32 %v4596_v45, %v4568_v41  ;;  %4850 = vmatpush.bf16.msra.mxu0 %v8127_v34  ;;  %v11123_v41 = vld [vmem:[#allocation42_spill] sm:$0xff]  ;;  %v11124_v45 = vld [vmem:[#allocation43_spill] sm:$0xff] }
 0x202   :  { %v4541_v4 = vadd.f32 %v4540_v62, %v4512_v51  ;;  %v6706_v51 = vld [vmem:[#allocation2 + $0x2e8] sm:$0xf]  ;;  %v8799_v62 = vld [vmem:[#allocation2 + $0x2f4] sm:$0xf0] }
 0x203   :  { %v6707_v46 = vor.u32 %v8799_v62, %v6706_v51  ;;  %v8827_v51 = vld [vmem:[#allocation2 + $0x3d4] sm:$0xf0] }
 0x205   :  { %5017 = vmatpush.bf16.msrb.mxu2 %v6707_v46 }
 0x206   :  { %v4569_v26 = vpop.f32.mrf.mxu2  ;;  %v4598_v20 = vpop.f32.mrf.mxu3 }
 0x207   :  { %v4570_v61 = vadd.f32 %v4569_v26, %v4541_v4  ;;  %v4514_v44 = vpop.f32.mrf.mxu0  ;;  %v4543_v33 = vpop.f32.mrf.mxu1  ;;  %v8735_v4 = vld [vmem:[#allocation2 + $0xf4] sm:$0xf0]  ;;  %v6578_v26 = vld [vmem:[#allocation2 + $0x1e8] sm:$0xf] }
 0x208   :  { %v4515_v15 = vadd.f32 %v4514_v44, %v10198_v24  ;;  %v8831_v24 = vld [vmem:[#allocation2 + $0x3f4] sm:$0xf0]  ;;  %v6451_v1 = vor.u32 %v8735_v4, %v6450_v25 }
 0x209   :  { %v10245_v17 = vadd.f32 %v4598_v20, %v4570_v61  ;;  %v6835_v56 = vor.u32 %v8831_v24, %v6834_v40  ;;  %v6579_v61 = vor.u32 %v8767_v6, %v6578_v26  ;;  %v6690_v20 = vld [vmem:[#allocation2 + $0x2c8] sm:$0xf]  ;;  %v8795_v44 = vld [vmem:[#allocation2 + $0x2d4] sm:$0xf0]  ;;  %v11128_v26 = vld [vmem:[#allocation61_spill] sm:$0xff] }
 0x20a   :  { %v4544_v0 = vadd.f32 %v4543_v33, %v4515_v15  ;;  %4745 = vmatmul.bf16.gmra.mxu0 %v11123_v41  ;;  %4774 = vmatmul.bf16.gmra.mxu1 %v11124_v45  ;;  %v6691_v15 = vor.u32 %v8795_v44, %v6690_v20  ;;  %v8731_v33 = vld [vmem:[#allocation2 + $0xd4] sm:$0xf0]  ;;  %v6674_v6 = vld [vmem:[#allocation2 + $0x2a8] sm:$0xf]  ;;  %v7459_v41 = vor.u32 %v8987_v28, %v7458_v13  ;;  %v11157_v28 = vld [vmem:[#allocation19_spill] sm:$0xff] }
 0x20b   :  { %4803 = vmatmul.bf16.gmra.mxu2 %v9884_v42  ;;  %4832 = vmatmul.bf16.gmra.mxu3 %v11125_v7  ;;  %v6435_v62 = vor.u32 %v8731_v33, %v6434_v21  ;;  %v8727_v20 = vld [vmem:[#allocation2 + $0xb4] sm:$0xf0]  ;;  %v6802_v44 = vld [vmem:[#allocation2 + $0x3a8] sm:$0xf] }
 0x20c   :  { %4959 = vmatpush.bf16.msrb.mxu0 %v6451_v1  ;;  %5046 = vmatpush.bf16.msrb.mxu3 %v6835_v56  ;;  %v6562_v56 = vld [vmem:[#allocation2 + $0x1c8] sm:$0xf]  ;;  %v8823_v21 = vld [vmem:[#allocation2 + $0x3b4] sm:$0xf0] }
 0x20d   :  { %4988 = vmatpush.bf16.msrb.mxu1 %v6579_v61  ;;  %5018 = vmatpush.bf16.msrb.mxu2 %v6691_v15  ;;  %v6418_v61 = vld [vmem:[#allocation2 + $0xa8] sm:$0xf]  ;;  %v8935_v42 = vld [vmem:[#allocation2 + $0x734] sm:$0xf0] }
 0x20e   :  { %v4572_v60 = vpop.f32.mrf.mxu2  ;;  %v4601_v54 = vpop.f32.mrf.mxu3  ;;  %v6419_v33 = vor.u32 %v8727_v20, %v6418_v61  ;;  %v8723_v61 = vld [vmem:[#allocation2 + $0x94] sm:$0xf0]  ;;  %v11148_v7 = vld [vmem:[#allocation10_spill] sm:$0xff] }
 0x20f   :  { %v4573_v14 = vadd.f32 %v4572_v60, %v4544_v0  ;;  %v4516_v23 = vpop.f32.mrf.mxu0  ;;  %v4545_v34 = vpop.f32.mrf.mxu1  ;;  %v6818_v0 = vld [vmem:[#allocation2 + $0x3c8] sm:$0xf]  ;;  %v8819_v20 = vld [vmem:[#allocation2 + $0x394] sm:$0xf0] }
 0x210   :  { %v4517_v39 = vadd.f32 %v4516_v23, %v10208_v10  ;;  %v6819_v25 = vor.u32 %v8827_v51, %v6818_v0  ;;  %4960 = vmatpush.bf16.msrb.mxu0 %v6435_v62  ;;  %v11126_v23 = vld [vmem:[#allocation46_spill] sm:$0xff]  ;;  %v6803_v0 = vor.u32 %v8823_v21, %v6802_v44 }
 0x211   :  { %v10252_v59 = vadd.f32 %v4601_v54, %v4573_v14  ;;  %v8763_v14 = vld [vmem:[#allocation2 + $0x1d4] sm:$0xf0]  ;;  %v7586_v13 = vld [vmem:[#allocation2 + $0x9c8] sm:$0xf] }
 0x212   :  { %v4546_v30 = vadd.f32 %v4545_v34, %v4517_v39  ;;  %5047 = vmatpush.bf16.msrb.mxu3 %v6819_v25  ;;  %v6563_v39 = vor.u32 %v8763_v14, %v6562_v56  ;;  %v11127_v34 = vld [vmem:[#allocation47_spill] sm:$0xff]  ;;  %v6658_v14 = vld [vmem:[#allocation2 + $0x288] sm:$0xf] }
 0x214   :  { %4989 = vmatpush.bf16.msrb.mxu1 %v6563_v39  ;;  %4961 = vmatpush.bf16.msrb.mxu0 %v6419_v33  ;;  %v8787_v39 = vld [vmem:[#allocation2 + $0x294] sm:$0xf0] }
 0x216   :  { %v4574_v10 = vpop.f32.mrf.mxu2  ;;  %v4603_v4 = vpop.f32.mrf.mxu3  ;;  %5048 = vmatpush.bf16.msrb.mxu3 %v6803_v0 }
 0x217   :  { %v4575_v46 = vadd.f32 %v4574_v10, %v4546_v30  ;;  %v4519_v40 = vpop.f32.mrf.mxu0  ;;  %v4548_v60 = vpop.f32.mrf.mxu1  ;;  %v8791_v30 = vld [vmem:[#allocation2 + $0x2b4] sm:$0xf0] }
 0x218   :  { %v4520_v24 = vadd.f32 %v4519_v40, %v10219_v36  ;;  %v6675_v36 = vor.u32 %v8791_v30, %v6674_v6  ;;  %v6546_v40 = vld [vmem:[#allocation2 + $0x1a8] sm:$0xf]  ;;  %v6659_v30 = vor.u32 %v8787_v39, %v6658_v14  ;;  %v8783_v14 = vld [vmem:[#allocation2 + $0x274] sm:$0xf0] }
 0x219   :  { %v10255_v1 = vadd.f32 %v4603_v4, %v4575_v46  ;;  %v6402_v6 = vld [vmem:[#allocation2 + $0x88] sm:$0xf] }
 0x21a   :  { %v4549_v54 = vadd.f32 %v4548_v60, %v4520_v24  ;;  %4750 = vmatmul.bf16.gmra.mxu0 %v11126_v23  ;;  %4779 = vmatmul.bf16.gmra.mxu1 %v11127_v34  ;;  %v8759_v24 = vld [vmem:[#allocation2 + $0x1b4] sm:$0xf0]  ;;  %v6386_v39 = vld [vmem:[#allocation2 + $0x68] sm:$0xf] }
 0x21b   :  { %4808 = vmatmul.bf16.gmra.mxu2 %v9926_v35  ;;  %4837 = vmatmul.bf16.gmra.mxu3 %v11128_v26  ;;  %v6547_v56 = vor.u32 %v8759_v24, %v6546_v40  ;;  %v11129_v40 = vld [vmem:[#allocation50_spill] sm:$0xff]  ;;  %v8923_v35 = vld [vmem:[#allocation2 + $0x6d4] sm:$0xf0] }
 0x21c   :  { %5019 = vmatpush.bf16.msrb.mxu2 %v6675_v36  ;;  %v6403_v36 = vor.u32 %v8723_v61, %v6402_v6  ;;  %v8719_v6 = vld [vmem:[#allocation2 + $0x74] sm:$0xf0]  ;;  %v6338_v26 = vld [vmem:[#allocation2 + $0x8] sm:$0xf] }
 0x21d   :  { %4990 = vmatpush.bf16.msrb.mxu1 %v6547_v56  ;;  %v11130_v56 = vld [vmem:[#allocation51_spill] sm:$0xff]  ;;  %v8815_v61 = vld [vmem:[#allocation2 + $0x374] sm:$0xf0]  ;;  %v7714_v23 = vld [vmem:[#allocation2 + $0xac8] sm:$0xf] }
 0x21e   :  { %v4577_v15 = vpop.f32.mrf.mxu2  ;;  %v4606_v62 = vpop.f32.mrf.mxu3  ;;  %4962 = vmatpush.bf16.msrb.mxu0 %v6403_v36 }
 0x21f   :  { %v4578_v51 = vadd.f32 %v4577_v15, %v4549_v54  ;;  %v4521_v25 = vpop.f32.mrf.mxu0  ;;  %v4550_v46 = vpop.f32.mrf.mxu1  ;;  %v6786_v54 = vld [vmem:[#allocation2 + $0x388] sm:$0xf] }
 0x220   :  { %v4522_v10 = vadd.f32 %v4521_v25, %v10224_v50  ;;  %v6787_v44 = vor.u32 %v8819_v20, %v6786_v54  ;;  %5020 = vmatpush.bf16.msrb.mxu2 %v6659_v30  ;;  %v6530_v25 = vld [vmem:[#allocation2 + $0x188] sm:$0xf]  ;;  %v6387_v20 = vor.u32 %v8719_v6, %v6386_v39  ;;  %v8715_v6 = vld [vmem:[#allocation2 + $0x54] sm:$0xf0] }
 0x221   :  { %v10262_v4 = vadd.f32 %v4606_v62, %v4578_v51  ;;  %v6770_v30 = vld [vmem:[#allocation2 + $0x368] sm:$0xf] }
 0x222   :  { %v4551_v60 = vadd.f32 %v4550_v46, %v4522_v10  ;;  %5049 = vmatpush.bf16.msrb.mxu3 %v6787_v44  ;;  %v8755_v10 = vld [vmem:[#allocation2 + $0x194] sm:$0xf0]  ;;  %v6771_v36 = vor.u32 %v8815_v61, %v6770_v30  ;;  %4963 = vmatpush.bf16.msrb.mxu0 %v6387_v20 }
 0x223   :  { %v6531_v24 = vor.u32 %v8755_v10, %v6530_v25  ;;  %v8751_v25 = vld [vmem:[#allocation2 + $0x174] sm:$0xf0] }
 0x224   :  { %v8811_v30 = vld [vmem:[#allocation2 + $0x354] sm:$0xf0] }
 0x225   :  { %4991 = vmatpush.bf16.msrb.mxu1 %v6531_v24 }
 0x226   :  { %v4579_v50 = vpop.f32.mrf.mxu2  ;;  %v4608_v15 = vpop.f32.mrf.mxu3  ;;  %5050 = vmatpush.bf16.msrb.mxu3 %v6771_v36 }
 0x227   :  { %v4580_v21 = vadd.f32 %v4579_v50, %v4551_v60  ;;  %v4620_v33 = vpop.f32.mrf.mxu0  ;;  %v4649_v51 = vpop.f32.mrf.mxu1  ;;  %v6642_v60 = vld [vmem:[#allocation2 + $0x268] sm:$0xf] }
 0x228   :  { %v4621_v0 = vadd.f32 %v4620_v33, %v10232_v43  ;;  %v6643_v43 = vor.u32 %v8783_v14, %v6642_v60  ;;  %v6626_v60 = vld [vmem:[#allocation2 + $0x248] sm:$0xf]  ;;  %v8779_v14 = vld [vmem:[#allocation2 + $0x254] sm:$0xf0] }
 0x229   :  { %v10265_v62 = vadd.f32 %v4608_v15, %v4580_v21  ;;  %v6627_v39 = vor.u32 %v8779_v14, %v6626_v60  ;;  %v11133_v60 = vld [vmem:[#allocation66_spill] sm:$0xff]  ;;  %v11134_v14 = vld [vmem:[#allocation67_spill] sm:$0xff] }
 0x22a   :  { %v4650_v46 = vadd.f32 %v4649_v51, %v4621_v0  ;;  %4851 = vmatmul.bf16.vlgmr.msra.gmra.mxu0 %v11129_v40  ;;  %4880 = vmatmul.bf16.vlgmr.msra.gmra.mxu1 %v11130_v56  ;;  %v6514_v51 = vld [vmem:[#allocation2 + $0x168] sm:$0xf]  ;;  %v8835_v56 = vld [vmem:[#allocation2 + $0x414] sm:$0xf0] }
 0x22b   :  { %4909 = vmatmul.bf16.vlgmr.msra.gmra.mxu2 %v9956_v63  ;;  %4938 = vmatmul.bf16.vlgmr.msra.gmra.mxu3 %v9958_v22  ;;  %v6515_v24 = vor.u32 %v8751_v25, %v6514_v51  ;;  %v6370_v22 = vld [vmem:[#allocation2 + $0x48] sm:$0xf]  ;;  %v8771_v63 = vld [vmem:[#allocation2 + $0x214] sm:$0xf0] }
 0x22c   :  { %5021 = vmatpush.bf16.msrb.mxu2 %v6643_v43  ;;  %v6371_v43 = vor.u32 %v8715_v6, %v6370_v22  ;;  %v11131_v25 = vld [vmem:[#allocation54_spill] sm:$0xff]  ;;  %v11132_v22 = vld [vmem:[#allocation55_spill] sm:$0xff] }
 0x22d   :  { %4992 = vmatpush.bf16.msrb.mxu1 %v6515_v24  ;;  %v6354_v6 = vld [vmem:[#allocation2 + $0x28] sm:$0xf] }
 0x22e   :  { %v4678_v54 = vpop.f32.mrf.mxu2  ;;  %v4707_v50 = vpop.f32.mrf.mxu3  ;;  %4964 = vmatpush.bf16.msrb.mxu0 %v6371_v43  ;;  %v8807_v43 = vld [vmem:[#allocation2 + $0x334] sm:$0xf0]  ;;  %v7234_v40 = vld [vmem:[#allocation2 + $0x708] sm:$0xf] }
 0x22f   :  { %v4679_v44 = vadd.f32 %v4678_v54, %v4650_v46  ;;  %v4622_v21 = vpop.f32.mrf.mxu0  ;;  %v4651_v33 = vpop.f32.mrf.mxu1  ;;  %v6754_v46 = vld [vmem:[#allocation2 + $0x348] sm:$0xf] }
 0x230   :  { %v4623_v15 = vadd.f32 %v4622_v21, %v10235_v48  ;;  %v6755_v61 = vor.u32 %v8811_v30, %v6754_v46  ;;  %5022 = vmatpush.bf16.msrb.mxu2 %v6627_v39  ;;  %v8775_v39 = vld [vmem:[#allocation2 + $0x234] sm:$0xf0]  ;;  %v6738_v30 = vld [vmem:[#allocation2 + $0x328] sm:$0xf] }
 0x231   :  { %v10272_v0 = vadd.f32 %v4707_v50, %v4679_v44  ;;  %v8711_v46 = vld [vmem:[#allocation2 + $0x34] sm:$0xf0] }
 0x232   :  { %v4652_v10 = vadd.f32 %v4651_v33, %v4623_v15  ;;  %5051 = vmatpush.bf16.msrb.mxu3 %v6755_v61  ;;  %v6498_v15 = vld [vmem:[#allocation2 + $0x148] sm:$0xf]  ;;  %v8747_v33 = vld [vmem:[#allocation2 + $0x154] sm:$0xf0] }
 0x233   :  { %v6499_v24 = vor.u32 %v8747_v33, %v6498_v15 }
 0x235   :  { %4993 = vmatpush.bf16.msrb.mxu1 %v6499_v24  ;;  %v6482_v24 = vld [vmem:[#allocation2 + $0x128] sm:$0xf] }
 0x236   :  { %v4680_v48 = vpop.f32.mrf.mxu2  ;;  %v4709_v20 = vpop.f32.mrf.mxu3 }
 0x237   :  { %v4681_v54 = vadd.f32 %v4680_v48, %v4652_v10  ;;  %v4625_v36 = vpop.f32.mrf.mxu0  ;;  %v4654_v50 = vpop.f32.mrf.mxu1  ;;  %v6610_v10 = vld [vmem:[#allocation2 + $0x228] sm:$0xf]  ;;  %v6355_v48 = vor.u32 %v8711_v46, %v6354_v6  ;;  %v8707_v46 = vld [vmem:[#allocation2 + $0x14] sm:$0xf0] }
 0x238   :  { %v4626_v44 = vadd.f32 %v4625_v36, %v10242_v27  ;;  %v6611_v27 = vor.u32 %v8775_v39, %v6610_v10 }
 0x239   :  { %v10275_v21 = vadd.f32 %v4709_v20, %v4681_v54  ;;  %v6739_v54 = vor.u32 %v8807_v43, %v6738_v30  ;;  %4965 = vmatpush.bf16.msrb.mxu0 %v6355_v48  ;;  %v8803_v30 = vld [vmem:[#allocation2 + $0x314] sm:$0xf0] }
 0x23a   :  { %v4655_v51 = vadd.f32 %v4654_v50, %v4626_v44  ;;  %4856 = vmatmul.bf16.gmra.mxu0 %v11131_v25  ;;  %4885 = vmatmul.bf16.gmra.mxu1 %v11132_v22  ;;  %v8739_v48 = vld [vmem:[#allocation2 + $0x114] sm:$0xf0] }
 0x23b   :  { %4914 = vmatmul.bf16.gmra.mxu2 %v11133_v60  ;;  %4943 = vmatmul.bf16.gmra.mxu3 %v11134_v14  ;;  %v8743_v14 = vld [vmem:[#allocation2 + $0x134] sm:$0xf0]  ;;  %v6594_v60 = vld [vmem:[#allocation2 + $0x208] sm:$0xf] }
 0x23c   :  { %5023 = vmatpush.bf16.msrb.mxu2 %v6611_v27  ;;  %5052 = vmatpush.bf16.msrb.mxu3 %v6739_v54  ;;  %v6483_v39 = vor.u32 %v8743_v14, %v6482_v24  ;;  %v6595_v6 = vor.u32 %v8771_v63, %v6594_v60  ;;  %v6339_v27 = vor.u32 %v8707_v46, %v6338_v26  ;;  %v11136_v26 = vld [vmem:[#allocation59_spill] sm:$0xff]  ;;  %v11137_v24 = vld [vmem:[#allocation68_spill] sm:$0xff]  ;;  %v6962_v46 = vld [vmem:[#allocation2 + $0x4e8] sm:$0xf] }
 0x23e   :  { %v4683_v61 = vpop.f32.mrf.mxu2  ;;  %v4712_v36 = vpop.f32.mrf.mxu3  ;;  %4994 = vmatpush.bf16.msrb.mxu1 %v6483_v39  ;;  %4966 = vmatpush.bf16.msrb.mxu0 %v6339_v27  ;;  %v11138_v39 = vld [vmem:[#allocation69_spill] sm:$0xff]  ;;  %v7346_v27 = vld [vmem:[#allocation2 + $0x7e8] sm:$0xf] }
 0x23f   :  { %v4684_v20 = vadd.f32 %v4683_v61, %v4655_v51  ;;  %v4627_v44 = vpop.f32.mrf.mxu0  ;;  %v4656_v15 = vpop.f32.mrf.mxu1  ;;  %v6722_v51 = vld [vmem:[#allocation2 + $0x308] sm:$0xf] }
 0x240   :  { %v4628_v50 = vadd.f32 %v4627_v44, %v10245_v17  ;;  %v6723_v43 = vor.u32 %v8803_v30, %v6722_v51  ;;  %5024 = vmatpush.bf16.msrb.mxu2 %v6595_v6  ;;  %v6466_v61 = vld [vmem:[#allocation2 + $0x108] sm:$0xf]  ;;  %v8863_v30 = vld [vmem:[#allocation2 + $0x4f4] sm:$0xf0] }
 0x241   :  { %v10282_v33 = vadd.f32 %v4712_v36, %v4684_v20  ;;  %v6467_v14 = vor.u32 %v8739_v48, %v6466_v61  ;;  %v7218_v6 = vld [vmem:[#allocation2 + $0x6e8] sm:$0xf] }
 0x242   :  { %v4657_v10 = vadd.f32 %v4656_v15, %v4628_v50  ;;  %5053 = vmatpush.bf16.msrb.mxu3 %v6723_v43  ;;  %v11135_v15 = vld [vmem:[#allocation58_spill] sm:$0xff] }
 0x243   :  { %4995 = vmatpush.bf16.msrb.mxu1 %v6467_v14 }
 0x246   :  { %v4685_v17 = vpop.f32.mrf.mxu2  ;;  %v4714_v20 = vpop.f32.mrf.mxu3 }
 0x247   :  { %v4686_v54 = vadd.f32 %v4685_v17, %v4657_v10  ;;  %v4630_v36 = vpop.f32.mrf.mxu0  ;;  %v4659_v50 = vpop.f32.mrf.mxu1  ;;  %v8927_v10 = vld [vmem:[#allocation2 + $0x6f4] sm:$0xf0]  ;;  %v6963_v17 = vor.u32 %v8863_v30, %v6962_v46 }
 0x248   :  { %v4631_v44 = vadd.f32 %v4630_v36, %v10252_v59  ;;  %v7219_v51 = vor.u32 %v8927_v10, %v7218_v6  ;;  %v8959_v59 = vld [vmem:[#allocation2 + $0x7f4] sm:$0xf0] }
 0x249   :  { %v10285_v63 = vadd.f32 %v4714_v20, %v4686_v54  ;;  %v7347_v61 = vor.u32 %v8959_v59, %v7346_v27  ;;  %5075 = vmatpush.bf16.msra.mxu0 %v6963_v17  ;;  %v8859_v30 = vld [vmem:[#allocation2 + $0x4d4] sm:$0xf0] }
 0x24a   :  { %v4660_v60 = vadd.f32 %v4659_v50, %v4631_v44  ;;  %4861 = vmatmul.bf16.gmra.mxu0 %v11135_v15  ;;  %4890 = vmatmul.bf16.gmra.mxu1 %v11136_v26  ;;  %v7090_v50 = vld [vmem:[#allocation2 + $0x5e8] sm:$0xf]  ;;  %v8955_v27 = vld [vmem:[#allocation2 + $0x7d4] sm:$0xf0] }
 0x24b   :  { %4919 = vmatmul.bf16.gmra.mxu2 %v11137_v24  ;;  %4948 = vmatmul.bf16.gmra.mxu3 %v11138_v39  ;;  %v8895_v39 = vld [vmem:[#allocation2 + $0x5f4] sm:$0xf0]  ;;  %v7202_v24 = vld [vmem:[#allocation2 + $0x6c8] sm:$0xf] }
 0x24c   :  { %5133 = vmatpush.bf16.msra.mxu2 %v7219_v51  ;;  %5162 = vmatpush.bf16.msra.mxu3 %v7347_v61  ;;  %v7091_v10 = vor.u32 %v8895_v39, %v7090_v50  ;;  %v6946_v26 = vld [vmem:[#allocation2 + $0x4c8] sm:$0xf]  ;;  %v7203_v46 = vor.u32 %v8923_v35, %v7202_v24  ;;  %v8891_v35 = vld [vmem:[#allocation2 + $0x5d4] sm:$0xf0] }
 0x24d   :  { %v6947_v51 = vor.u32 %v8859_v30, %v6946_v26  ;;  %v11140_v26 = vld [vmem:[#allocation63_spill] sm:$0xff]  ;;  %v11141_v50 = vld [vmem:[#allocation70_spill] sm:$0xff] }
 0x24e   :  { %v4688_v43 = vpop.f32.mrf.mxu2  ;;  %v4717_v54 = vpop.f32.mrf.mxu3  ;;  %5104 = vmatpush.bf16.msra.mxu1 %v7091_v10  ;;  %v11142_v10 = vld [vmem:[#allocation71_spill] sm:$0xff]  ;;  %v6930_v30 = vld [vmem:[#allocation2 + $0x4a8] sm:$0xf] }
 0x24f   :  { %v4689_v48 = vadd.f32 %v4688_v43, %v4660_v60  ;;  %v4632_v20 = vpop.f32.mrf.mxu0  ;;  %v4661_v14 = vpop.f32.mrf.mxu1  ;;  %v7330_v60 = vld [vmem:[#allocation2 + $0x7c8] sm:$0xf]  ;;  %5076 = vmatpush.bf16.msra.mxu0 %v6947_v51  ;;  %v8951_v51 = vld [vmem:[#allocation2 + $0x7b4] sm:$0xf0] }
 0x250   :  { %v4633_v36 = vadd.f32 %v4632_v20, %v10255_v1  ;;  %v7331_v59 = vor.u32 %v8955_v27, %v7330_v60  ;;  %5134 = vmatpush.bf16.msra.mxu2 %v7203_v46  ;;  %v7074_v20 = vld [vmem:[#allocation2 + $0x5c8] sm:$0xf]  ;;  %v8919_v46 = vld [vmem:[#allocation2 + $0x6b4] sm:$0xf0] }
 0x251   :  { %v10292_v44 = vadd.f32 %v4717_v54, %v4689_v48  ;;  %v8855_v60 = vld [vmem:[#allocation2 + $0x4b4] sm:$0xf0]  ;;  %v7314_v27 = vld [vmem:[#allocation2 + $0x7a8] sm:$0xf] }
 0x252   :  { %v4662_v6 = vadd.f32 %v4661_v14, %v4633_v36  ;;  %5163 = vmatpush.bf16.msra.mxu3 %v7331_v59  ;;  %v11139_v36 = vld [vmem:[#allocation62_spill] sm:$0xff]  ;;  %v7075_v14 = vor.u32 %v8891_v35, %v7074_v20 }
 0x253   :  { %v7266_v15 = vld [vmem:[#allocation2 + $0x748] sm:$0xf] }
 0x254   :  { %5105 = vmatpush.bf16.msra.mxu1 %v7075_v14  ;;  %v7058_v14 = vld [vmem:[#allocation2 + $0x5a8] sm:$0xf] }
 0x256   :  { %v4690_v1 = vpop.f32.mrf.mxu2  ;;  %v4719_v17 = vpop.f32.mrf.mxu3 }
 0x257   :  { %v4691_v43 = vadd.f32 %v4690_v1, %v4662_v6  ;;  %v4635_v61 = vpop.f32.mrf.mxu0  ;;  %v4664_v39 = vpop.f32.mrf.mxu1  ;;  %v7186_v6 = vld [vmem:[#allocation2 + $0x6a8] sm:$0xf]  ;;  %v6931_v1 = vor.u32 %v8855_v60, %v6930_v30  ;;  %v8851_v60 = vld [vmem:[#allocation2 + $0x494] sm:$0xf0] }
 0x258   :  { %v4636_v48 = vadd.f32 %v4635_v61, %v10262_v4  ;;  %v7187_v4 = vor.u32 %v8919_v46, %v7186_v6 }
 0x259   :  { %v10295_v54 = vadd.f32 %v4719_v17, %v4691_v43  ;;  %v7315_v43 = vor.u32 %v8951_v51, %v7314_v27  ;;  %5077 = vmatpush.bf16.msra.mxu0 %v6931_v1  ;;  %v8947_v27 = vld [vmem:[#allocation2 + $0x794] sm:$0xf0] }
 0x25a   :  { %v4665_v24 = vadd.f32 %v4664_v39, %v4636_v48  ;;  %4866 = vmatmul.bf16.gmra.mxu0 %v11139_v36  ;;  %4895 = vmatmul.bf16.gmra.mxu1 %v11140_v26  ;;  %v8915_v26 = vld [vmem:[#allocation2 + $0x694] sm:$0xf0]  ;;  %v6914_v36 = vld [vmem:[#allocation2 + $0x488] sm:$0xf] }
 0x25b   :  { %4924 = vmatmul.bf16.gmra.mxu2 %v11141_v50  ;;  %4953 = vmatmul.bf16.gmra.mxu3 %v11142_v10  ;;  %v8887_v10 = vld [vmem:[#allocation2 + $0x5b4] sm:$0xf0]  ;;  %v7170_v50 = vld [vmem:[#allocation2 + $0x688] sm:$0xf] }
 0x25c   :  { %5135 = vmatpush.bf16.msra.mxu2 %v7187_v4  ;;  %5164 = vmatpush.bf16.msra.mxu3 %v7315_v43  ;;  %v7059_v46 = vor.u32 %v8887_v10, %v7058_v14  ;;  %v7171_v30 = vor.u32 %v8915_v26, %v7170_v50  ;;  %v6915_v4 = vor.u32 %v8851_v60, %v6914_v36  ;;  %v8883_v26 = vld [vmem:[#allocation2 + $0x594] sm:$0xf0]  ;;  %v11143_v50 = vld [vmem:[#allocation5_spill] sm:$0xff]  ;;  %v11145_v36 = vld [vmem:[#allocation7_spill] sm:$0xff] }
 0x25d   :  { %v7154_v14 = vld [vmem:[#allocation2 + $0x668] sm:$0xf]  ;;  %v8847_v60 = vld [vmem:[#allocation2 + $0x474] sm:$0xf0] }
 0x25e   :  { %v4693_v59 = vpop.f32.mrf.mxu2  ;;  %v4722_v61 = vpop.f32.mrf.mxu3  ;;  %5106 = vmatpush.bf16.msra.mxu1 %v7059_v46  ;;  %5078 = vmatpush.bf16.msra.mxu0 %v6915_v4  ;;  %v6898_v46 = vld [vmem:[#allocation2 + $0x468] sm:$0xf] }
 0x25f   :  { %v4694_v17 = vadd.f32 %v4693_v59, %v4665_v24  ;;  %v4637_v48 = vpop.f32.mrf.mxu0  ;;  %v4666_v20 = vpop.f32.mrf.mxu1  ;;  %v7298_v24 = vld [vmem:[#allocation2 + $0x788] sm:$0xf] }
 0x260   :  { %v4638_v39 = vadd.f32 %v4637_v48, %v10265_v62  ;;  %v7299_v51 = vor.u32 %v8947_v27, %v7298_v24  ;;  %5136 = vmatpush.bf16.msra.mxu2 %v7171_v30  ;;  %v7282_v24 = vld [vmem:[#allocation2 + $0x768] sm:$0xf]  ;;  %v8943_v27 = vld [vmem:[#allocation2 + $0x774] sm:$0xf0] }
 0x261   :  { %v10302_v35 = vadd.f32 %v4722_v61, %v4694_v17  ;;  %v7042_v61 = vld [vmem:[#allocation2 + $0x588] sm:$0xf] }
 0x262   :  { %v4667_v6 = vadd.f32 %v4666_v20, %v4638_v39  ;;  %5165 = vmatpush.bf16.msra.mxu3 %v7299_v51  ;;  %v7043_v48 = vor.u32 %v8883_v26, %v7042_v61  ;;  %v11144_v39 = vld [vmem:[#allocation6_spill] sm:$0xff]  ;;  %v11146_v20 = vld [vmem:[#allocation8_spill] sm:$0xff]  ;;  %v6899_v51 = vor.u32 %v8847_v60, %v6898_v46 }
 0x263   :  { %v7026_v26 = vld [vmem:[#allocation2 + $0x568] sm:$0xf]  ;;  %v8939_v46 = vld [vmem:[#allocation2 + $0x754] sm:$0xf0] }
 0x264   :  { %5107 = vmatpush.bf16.msra.mxu1 %v7043_v48  ;;  %5079 = vmatpush.bf16.msra.mxu0 %v6899_v51  ;;  %v8879_v48 = vld [vmem:[#allocation2 + $0x574] sm:$0xf0] }
 0x266   :  { %v4695_v62 = vpop.f32.mrf.mxu2  ;;  %v4724_v1 = vpop.f32.mrf.mxu3 }
 0x267   :  { %v4696_v59 = vadd.f32 %v4695_v62, %v4667_v6  ;;  %v10304_v43 = vpop.f32.mrf.mxu0  ;;  %v10306_v17 = vpop.f32.mrf.mxu1  ;;  %v8911_v6 = vld [vmem:[#allocation2 + $0x674] sm:$0xf0]  ;;  %v7283_v62 = vor.u32 %v8943_v27, %v7282_v24  ;;  %v7267_v24 = vor.u32 %v8939_v46, %v7266_v15 }
 0x268   :  { %v7155_v30 = vor.u32 %v8911_v6, %v7154_v14  ;;  %v7138_v14 = vld [vmem:[#allocation2 + $0x648] sm:$0xf]  ;;  %v8907_v6 = vld [vmem:[#allocation2 + $0x654] sm:$0xf0] }
 0x269   :  { %v10308_v10 = vadd.f32 %v4724_v1, %v4696_v59  ;;  %5166 = vmatpush.bf16.msra.mxu3 %v7283_v62  ;;  %v11150_v15 = vld [vmem:[#allocation12_spill] sm:$0xff] }
 0x26a   :  { %4967 = vmatmul.bf16.vlgmr.msrb.gmra.mxu0 %v11143_v50  ;;  %4996 = vmatmul.bf16.vlgmr.msrb.gmra.mxu1 %v11144_v39  ;;  %v7139_v39 = vor.u32 %v8907_v6, %v7138_v14  ;;  %v8843_v50 = vld [vmem:[#allocation2 + $0x454] sm:$0xf0]  ;;  %v11147_v14 = vld [vmem:[#allocation9_spill] sm:$0xff] }
 0x26b   :  { %5025 = vmatmul.bf16.vlgmr.msrb.gmra.mxu2 %v11145_v36  ;;  %5054 = vmatmul.bf16.vlgmr.msrb.gmra.mxu3 %v11146_v20  ;;  %v7027_v20 = vor.u32 %v8879_v48, %v7026_v26  ;;  %v6882_v36 = vld [vmem:[#allocation2 + $0x448] sm:$0xf]  ;;  %v8875_v48 = vld [vmem:[#allocation2 + $0x554] sm:$0xf0] }
 0x26c   :  { %5137 = vmatpush.bf16.msra.mxu2 %v7155_v30  ;;  %v6883_v60 = vor.u32 %v8843_v50, %v6882_v36  ;;  %v7010_v26 = vld [vmem:[#allocation2 + $0x548] sm:$0xf]  ;;  %v11149_v50 = vld [vmem:[#allocation11_spill] sm:$0xff]  ;;  %v8903_v36 = vld [vmem:[#allocation2 + $0x634] sm:$0xf0] }
 0x26d   :  { %5108 = vmatpush.bf16.msra.mxu1 %v7027_v20  ;;  %5167 = vmatpush.bf16.msra.mxu3 %v7267_v24  ;;  %v7011_v6 = vor.u32 %v8875_v48, %v7010_v26  ;;  %v6866_v20 = vld [vmem:[#allocation2 + $0x428] sm:$0xf] }
 0x26e   :  { %v10314_v4 = vpop.f32.mrf.mxu2  ;;  %v10316_v59 = vpop.f32.mrf.mxu3  ;;  %5080 = vmatpush.bf16.msra.mxu0 %v6883_v60  ;;  %v8839_v60 = vld [vmem:[#allocation2 + $0x434] sm:$0xf0]  ;;  %v7250_v24 = vld [vmem:[#allocation2 + $0x728] sm:$0xf] }
 0x26f   :  { %v10318_v1 = vpop.f32.mrf.mxu0  ;;  %v10320_v61 = vpop.f32.mrf.mxu1  ;;  %v6867_v25 = vor.u32 %v8839_v60, %v6866_v20  ;;  %v7251_v16 = vor.u32 %v8935_v42, %v7250_v24  ;;  %v8931_v20 = vld [vmem:[#allocation2 + $0x714] sm:$0xf0] }
 0x270   :  { %5138 = vmatpush.bf16.msra.mxu2 %v7139_v39  ;;  %v7122_v39 = vld [vmem:[#allocation2 + $0x628] sm:$0xf]  ;;  %v7235_v60 = vor.u32 %v8931_v20, %v7234_v40 }
 0x271   :  { %5109 = vmatpush.bf16.msra.mxu1 %v7011_v6  ;;  %v7123_v46 = vor.u32 %v8903_v36, %v7122_v39  ;;  %5168 = vmatpush.bf16.msra.mxu3 %v7251_v16  ;;  %v6994_v6 = vld [vmem:[#allocation2 + $0x528] sm:$0xf]  ;;  %v8899_v36 = vld [vmem:[#allocation2 + $0x614] sm:$0xf0] }
 0x272   :  { %5081 = vmatpush.bf16.msra.mxu0 %v6867_v25  ;;  %v7106_v39 = vld [vmem:[#allocation2 + $0x608] sm:$0xf]  ;;  %v8867_v16 = vld [vmem:[#allocation2 + $0x514] sm:$0xf0] }
 0x273   :  { %v7107_v53 = vor.u32 %v8899_v36, %v7106_v39  ;;  %v6978_v25 = vld [vmem:[#allocation2 + $0x508] sm:$0xf]  ;;  %v11151_v39 = vld [vmem:[#allocation13_spill] sm:$0xff] }
 0x274   :  { %5139 = vmatpush.bf16.msra.mxu2 %v7123_v46  ;;  %v7730_v40 = vld [vmem:[#allocation2 + $0xae8] sm:$0xf] }
 0x275   :  { %5169 = vmatpush.bf16.msra.mxu3 %v7235_v60  ;;  %v7474_v36 = vld [vmem:[#allocation2 + $0x8e8] sm:$0xf] }
 0x276   :  { %v10322_v27 = vpop.f32.mrf.mxu2  ;;  %v10324_v30 = vpop.f32.mrf.mxu3  ;;  %v7858_v60 = vld [vmem:[#allocation2 + $0xbe8] sm:$0xf] }
 0x277   :  { %v10326_v51 = vpop.f32.mrf.mxu0  ;;  %v10328_v62 = vpop.f32.mrf.mxu1 }
 0x278   :  { %5140 = vmatpush.bf16.msra.mxu2 %v7107_v53  ;;  %v11154_v53 = vld [vmem:[#allocation16_spill] sm:$0xff] }
 0x27a   :  { %4972 = vmatmul.bf16.gmra.mxu0 %v11147_v14  ;;  %5001 = vmatmul.bf16.gmra.mxu1 %v11148_v7  ;;  %v6850_v7 = vld [vmem:[#allocation2 + $0x408] sm:$0xf] }
 0x27b   :  { %5030 = vmatmul.bf16.gmra.mxu2 %v11149_v50  ;;  %5059 = vmatmul.bf16.gmra.mxu3 %v11150_v15  ;;  %v8871_v15 = vld [vmem:[#allocation2 + $0x534] sm:$0xf0]  ;;  %v6851_v42 = vor.u32 %v8835_v56, %v6850_v7  ;;  %v11153_v7 = vld [vmem:[#allocation15_spill] sm:$0xff] }
 0x27c   :  { %v6995_v50 = vor.u32 %v8871_v15, %v6994_v6  ;;  %v6979_v6 = vor.u32 %v8867_v16, %v6978_v25  ;;  %v9055_v56 = vld [vmem:[#allocation2 + $0xaf4] sm:$0xf0]  ;;  %v7859_v16 = vor.u32 %v9087_v38, %v7858_v60 }
 0x27d   :  { %5082 = vmatpush.bf16.msra.mxu0 %v6851_v42  ;;  %v7731_v20 = vor.u32 %v9055_v56, %v7730_v40  ;;  %v8991_v42 = vld [vmem:[#allocation2 + $0x8f4] sm:$0xf0] }
 0x27e   :  { %v10334_v22 = vpop.f32.mrf.mxu2  ;;  %v10336_v14 = vpop.f32.mrf.mxu3  ;;  %5110 = vmatpush.bf16.msra.mxu1 %v6995_v50  ;;  %v11152_v50 = vld [vmem:[#allocation14_spill] sm:$0xff]  ;;  %v7475_v25 = vor.u32 %v8991_v42, %v7474_v36  ;;  %5278 = vmatpush.bf16.msrb.mxu3 %v7859_v16  ;;  %v9051_v56 = vld [vmem:[#allocation2 + $0xad4] sm:$0xf0] }
 0x27f   :  { %v10338_v26 = vpop.f32.mrf.mxu0  ;;  %v10340_v48 = vpop.f32.mrf.mxu1  ;;  %5249 = vmatpush.bf16.msrb.mxu2 %v7731_v20  ;;  %v7715_v45 = vor.u32 %v9051_v56, %v7714_v23  ;;  %v7842_v36 = vld [vmem:[#allocation2 + $0xbc8] sm:$0xf]  ;;  %v9083_v38 = vld [vmem:[#allocation2 + $0xbd4] sm:$0xf0] }
 0x280   :  { %v7843_v60 = vor.u32 %v9083_v38, %v7842_v36  ;;  %v9019_v23 = vld [vmem:[#allocation2 + $0x9d4] sm:$0xf0]  ;;  %v7698_v56 = vld [vmem:[#allocation2 + $0xaa8] sm:$0xf] }
 0x281   :  { %5191 = vmatpush.bf16.msrb.mxu0 %v7475_v25  ;;  %v11158_v16 = vld [vmem:[#allocation20_spill] sm:$0xff]  ;;  %v7442_v38 = vld [vmem:[#allocation2 + $0x8a8] sm:$0xf] }
 0x282   :  { %5111 = vmatpush.bf16.msra.mxu1 %v6979_v6  ;;  %5279 = vmatpush.bf16.msrb.mxu3 %v7843_v60  ;;  %v9047_v36 = vld [vmem:[#allocation2 + $0xab4] sm:$0xf0]  ;;  %v7826_v60 = vld [vmem:[#allocation2 + $0xba8] sm:$0xf] }
 0x283   :  { %5250 = vmatpush.bf16.msrb.mxu2 %v7715_v45  ;;  %v7699_v45 = vor.u32 %v9047_v36, %v7698_v56  ;;  %v9015_v56 = vld [vmem:[#allocation2 + $0x9b4] sm:$0xf0]  ;;  %v7682_v36 = vld [vmem:[#allocation2 + $0xa88] sm:$0xf] }
 0x285   :  { %5192 = vmatpush.bf16.msrb.mxu0 %v7459_v41  ;;  %v4737_v41 = vadd.f32 %v10304_v43, %v10272_v0 }
 0x286   :  { %v10342_v24 = vpop.f32.mrf.mxu2  ;;  %v10344_v46 = vpop.f32.mrf.mxu3 }
 0x287   :  { %v10346_v15 = vpop.f32.mrf.mxu0  ;;  %v10348_v55 = vpop.f32.mrf.mxu1  ;;  %5251 = vmatpush.bf16.msrb.mxu2 %v7699_v45  ;;  %v4766_v0 = vadd.f32 %v10306_v17, %v4737_v41  ;;  %v7811_v17 = vor.u32 %v9075_v52, %v7810_v8  ;;  %v7554_v8 = vld [vmem:[#allocation2 + $0x988] sm:$0xf]  ;;  %v9011_v52 = vld [vmem:[#allocation2 + $0x994] sm:$0xf0] }
 0x289   :  { %v4795_v43 = vadd.f32 %v10314_v4, %v4766_v0 }
 0x28a   :  { %4977 = vmatmul.bf16.gmra.mxu0 %v11151_v39  ;;  %5006 = vmatmul.bf16.gmra.mxu1 %v11152_v50 }
 0x28b   :  { %5035 = vmatmul.bf16.gmra.mxu2 %v11153_v7  ;;  %5064 = vmatmul.bf16.gmra.mxu3 %v11154_v53  ;;  %v7602_v53 = vld [vmem:[#allocation2 + $0x9e8] sm:$0xf]  ;;  %v9023_v7 = vld [vmem:[#allocation2 + $0x9f4] sm:$0xf0]  ;;  %v4824_v4 = vadd.f32 %v10316_v59, %v4795_v43  ;;  %v7555_v59 = vor.u32 %v9011_v52, %v7554_v8 }
 0x28c   :  { %v7603_v40 = vor.u32 %v9023_v7, %v7602_v53  ;;  %v11155_v7 = vld [vmem:[#allocation17_spill] sm:$0xff]  ;;  %v11156_v53 = vld [vmem:[#allocation18_spill] sm:$0xff]  ;;  %v9039_v43 = vld [vmem:[#allocation2 + $0xa74] sm:$0xf0] }
 0x28e   :  { %v10354_v34 = vpop.f32.mrf.mxu2  ;;  %v10356_v6 = vpop.f32.mrf.mxu3  ;;  %5220 = vmatpush.bf16.msrb.mxu1 %v7603_v40  ;;  %v7587_v40 = vor.u32 %v9019_v23, %v7586_v13  ;;  %v7570_v23 = vld [vmem:[#allocation2 + $0x9a8] sm:$0xf] }
 0x28f   :  { %v10358_v39 = vpop.f32.mrf.mxu0  ;;  %v10360_v50 = vpop.f32.mrf.mxu1 }
 0x292   :  { %5221 = vmatpush.bf16.msrb.mxu1 %v7587_v40  ;;  %v9043_v40 = vld [vmem:[#allocation2 + $0xa94] sm:$0xf0] }
 0x296   :  { %v10362_v42 = vpop.f32.mrf.mxu2  ;;  %v10364_v20 = vpop.f32.mrf.mxu3 }
 0x297   :  { %v10366_v37 = vpop.f32.mrf.mxu0  ;;  %v10368_v25 = vpop.f32.mrf.mxu1 }
 0x29a   :  { %4982 = vmatmul.bf16.gmra.mxu0 %v11155_v7  ;;  %5011 = vmatmul.bf16.gmra.mxu1 %v11156_v53  ;;  %v7443_v53 = vor.u32 %v8983_v11, %v7442_v38  ;;  %v7426_v11 = vld [vmem:[#allocation2 + $0x888] sm:$0xf]  ;;  %v4739_v38 = vadd.f32 %v10318_v1, %v10275_v21  ;;  %v11159_v1 = vld [vmem:[#allocation21_spill] sm:$0xff] }
 0x29b   :  { %5040 = vmatmul.bf16.gmra.mxu2 %v11157_v28  ;;  %5069 = vmatmul.bf16.gmra.mxu3 %v11158_v16  ;;  %v7827_v28 = vor.u32 %v9079_v5, %v7826_v60  ;;  %v7571_v16 = vor.u32 %v9015_v56, %v7570_v23  ;;  %v8979_v5 = vld [vmem:[#allocation2 + $0x894] sm:$0xf0]  ;;  %v7683_v60 = vor.u32 %v9043_v40, %v7682_v36  ;;  %v11160_v36 = vld [vmem:[#allocation22_spill] sm:$0xff] }
 0x29c   :  { %5193 = vmatpush.bf16.msrb.mxu0 %v7443_v53  ;;  %v7427_v45 = vor.u32 %v8979_v5, %v7426_v11  ;;  %v4768_v23 = vadd.f32 %v10320_v61, %v4739_v38  ;;  %v7410_v40 = vld [vmem:[#allocation2 + $0x868] sm:$0xf]  ;;  %v4742_v61 = vadd.f32 %v10326_v51, %v10282_v33  ;;  %v8975_v38 = vld [vmem:[#allocation2 + $0x874] sm:$0xf0] }
 0x29d   :  { %5280 = vmatpush.bf16.msrb.mxu3 %v7827_v28  ;;  %5222 = vmatpush.bf16.msrb.mxu1 %v7571_v16  ;;  %v7666_v16 = vld [vmem:[#allocation2 + $0xa68] sm:$0xf] }
 0x29e   :  { %v10376_v7 = vpop.f32.mrf.mxu2  ;;  %v10378_v9 = vpop.f32.mrf.mxu3  ;;  %5252 = vmatpush.bf16.msrb.mxu2 %v7683_v60  ;;  %v4797_v56 = vadd.f32 %v10322_v27, %v4768_v23  ;;  %v7667_v5 = vor.u32 %v9039_v43, %v7666_v16  ;;  %v7794_v60 = vld [vmem:[#allocation2 + $0xb68] sm:$0xf]  ;;  %v9071_v27 = vld [vmem:[#allocation2 + $0xb74] sm:$0xf0]  ;;  %v4771_v33 = vadd.f32 %v10328_v62, %v4742_v61 }
 0x29f   :  { %v10380_v12 = vpop.f32.mrf.mxu0  ;;  %v10382_v13 = vpop.f32.mrf.mxu1  ;;  %v9007_v16 = vld [vmem:[#allocation2 + $0x974] sm:$0xf0] }
 0x2a0   :  { %5194 = vmatpush.bf16.msrb.mxu0 %v7427_v45  ;;  %v9035_v43 = vld [vmem:[#allocation2 + $0xa54] sm:$0xf0] }
 0x2a1   :  { %5281 = vmatpush.bf16.msrb.mxu3 %v7811_v17  ;;  %5223 = vmatpush.bf16.msrb.mxu1 %v7555_v59  ;;  %v7411_v17 = vor.u32 %v8975_v38, %v7410_v40  ;;  %v7538_v59 = vld [vmem:[#allocation2 + $0x968] sm:$0xf]  ;;  %v8971_v62 = vld [vmem:[#allocation2 + $0x854] sm:$0xf0] }
 0x2a2   :  { %5253 = vmatpush.bf16.msrb.mxu2 %v7667_v5  ;;  %v7394_v40 = vld [vmem:[#allocation2 + $0x848] sm:$0xf]  ;;  %v9067_v61 = vld [vmem:[#allocation2 + $0xb54] sm:$0xf0] }
 0x2a4   :  { %5195 = vmatpush.bf16.msrb.mxu0 %v7411_v17 }
 0x2a6   :  { %v10388_v53 = vpop.f32.mrf.mxu2  ;;  %v10391_v28 = vpop.f32.mrf.mxu3 }
 0x2a7   :  { %v4852_v41 = vpop.f32.mrf.mxu0  ;;  %v4881_v0 = vpop.f32.mrf.mxu1 }
 0x2a8   :  { %v4853_v21 = vadd.f32 %v4852_v41, %v4824_v4  ;;  %v7795_v4 = vor.u32 %v9071_v27, %v7794_v60  ;;  %v4826_v41 = vadd.f32 %v10324_v30, %v4797_v56  ;;  %v7539_v30 = vor.u32 %v9007_v16, %v7538_v59  ;;  %v7650_v56 = vld [vmem:[#allocation2 + $0xa48] sm:$0xf]  ;;  %v9031_v59 = vld [vmem:[#allocation2 + $0xa34] sm:$0xf0] }
 0x2a9   :  { %v7651_v38 = vor.u32 %v9035_v43, %v7650_v56  ;;  %v7378_v16 = vld [vmem:[#allocation2 + $0x828] sm:$0xf]  ;;  %v8967_v43 = vld [vmem:[#allocation2 + $0x834] sm:$0xf0] }
 0x2aa   :  { %5083 = vmatmul.bf16.vlgmr.msra.gmra.mxu0 %v11159_v1  ;;  %5112 = vmatmul.bf16.vlgmr.msra.gmra.mxu1 %v11160_v36  ;;  %v4882_v11 = vadd.f32 %v4881_v0, %v4853_v21  ;;  %v4800_v21 = vadd.f32 %v10334_v22, %v4771_v33  ;;  %v7395_v22 = vor.u32 %v8971_v62, %v7394_v40  ;;  %v7762_v40 = vld [vmem:[#allocation2 + $0xb28] sm:$0xf] }
 0x2ab   :  { %5141 = vmatmul.bf16.vlgmr.msra.gmra.mxu2 %v9502_v2  ;;  %5170 = vmatmul.bf16.vlgmr.msra.gmra.mxu3 %v9504_v3 }
 0x2ac   :  { %5282 = vmatpush.bf16.msrb.mxu3 %v7795_v4  ;;  %5224 = vmatpush.bf16.msrb.mxu1 %v7539_v30  ;;  %v4747_v30 = vadd.f32 %v10346_v15, %v10292_v44 }
 0x2ad   :  { %5254 = vmatpush.bf16.msrb.mxu2 %v7651_v38  ;;  %5196 = vmatpush.bf16.msrb.mxu0 %v7395_v22  ;;  %v7379_v38 = vor.u32 %v8967_v43, %v7378_v16  ;;  %v7490_v16 = vld [vmem:[#allocation2 + $0x908] sm:$0xf] }
 0x2ae   :  { %v4910_v45 = vpop.f32.mrf.mxu2  ;;  %v4939_v3 = vpop.f32.mrf.mxu3  ;;  %v4776_v44 = vadd.f32 %v10348_v55, %v4747_v30  ;;  %v4749_v55 = vadd.f32 %v10358_v39, %v10295_v54  ;;  %v8995_v30 = vld [vmem:[#allocation2 + $0x914] sm:$0xf0] }
 0x2af   :  { %v4911_v23 = vadd.f32 %v4910_v45, %v4882_v11  ;;  %v4854_v8 = vpop.f32.mrf.mxu0  ;;  %v4883_v52 = vpop.f32.mrf.mxu1  ;;  %v4744_v11 = vadd.f32 %v10338_v26, %v10285_v63  ;;  %v4829_v45 = vadd.f32 %v10336_v14, %v4800_v21  ;;  %v11162_v14 = vld [vmem:[#allocation25_spill] sm:$0xff] }
 0x2b0   :  { %v4855_v0 = vadd.f32 %v4854_v8, %v4826_v41  ;;  %v4778_v54 = vadd.f32 %v10360_v50, %v4749_v55  ;;  %v7986_v50 = vld [vmem:[#allocation2 + $0xce8] sm:$0xf]  ;;  %v9151_v55 = vld [vmem:[#allocation2 + $0xdf4] sm:$0xf0] }
 0x2b1   :  { %v4940_v51 = vadd.f32 %v4939_v3, %v4911_v23  ;;  %v7778_v3 = vld [vmem:[#allocation2 + $0xb48] sm:$0xf]  ;;  %v4773_v63 = vadd.f32 %v10340_v48, %v4744_v11  ;;  %v9063_v11 = vld [vmem:[#allocation2 + $0xb34] sm:$0xf0]  ;;  %5197 = vmatpush.bf16.msrb.mxu0 %v7379_v38 }
 0x2b2   :  { %v4884_v5 = vadd.f32 %v4883_v52, %v4855_v0  ;;  %v7779_v27 = vor.u32 %v9067_v61, %v7778_v3  ;;  %v11161_v52 = vld [vmem:[#allocation24_spill] sm:$0xff]  ;;  %v7634_v48 = vld [vmem:[#allocation2 + $0xa28] sm:$0xf]  ;;  %v7763_v62 = vor.u32 %v9063_v11, %v7762_v40  ;;  %v7491_v11 = vor.u32 %v8995_v30, %v7490_v16 }
 0x2b3   :  { %6004 = vst [vmem:[%s10904_s2 + $0x8] sm:$0xff] %v4940_v51  ;;  %v4802_v33 = vadd.f32 %v10342_v24, %v4773_v63  ;;  %v7522_v51 = vld [vmem:[#allocation2 + $0x948] sm:$0xf]  ;;  %v9003_v0 = vld [vmem:[#allocation2 + $0x954] sm:$0xf0]  ;;  %v7635_v56 = vor.u32 %v9031_v59, %v7634_v48 }
 0x2b4   :  { %5283 = vmatpush.bf16.msrb.mxu3 %v7779_v27  ;;  %v7523_v21 = vor.u32 %v9003_v0, %v7522_v51  ;;  %v9027_v63 = vld [vmem:[#allocation2 + $0xa14] sm:$0xf0]  ;;  %v7746_v51 = vld [vmem:[#allocation2 + $0xb08] sm:$0xf] }
 0x2b5   :  { %v4831_v3 = vadd.f32 %v10344_v46, %v4802_v33  ;;  %5255 = vmatpush.bf16.msrb.mxu2 %v7635_v56  ;;  %v8963_v33 = vld [vmem:[#allocation2 + $0x814] sm:$0xf0] }
 0x2b6   :  { %v4912_v60 = vpop.f32.mrf.mxu2  ;;  %v4941_v4 = vpop.f32.mrf.mxu3  ;;  %5225 = vmatpush.bf16.msrb.mxu1 %v7523_v21  ;;  %v9059_v48 = vld [vmem:[#allocation2 + $0xb14] sm:$0xf0] }
 0x2b7   :  { %v4913_v17 = vadd.f32 %v4912_v60, %v4884_v5  ;;  %v4857_v41 = vpop.f32.mrf.mxu0  ;;  %v4886_v23 = vpop.f32.mrf.mxu1 }
 0x2b8   :  { %v4858_v8 = vadd.f32 %v4857_v41, %v4829_v45  ;;  %5284 = vmatpush.bf16.msrb.mxu3 %v7763_v62  ;;  %v4805_v41 = vadd.f32 %v10354_v34, %v4776_v44  ;;  %v7747_v34 = vor.u32 %v9059_v48, %v7746_v51  ;;  %v11163_v62 = vld [vmem:[#allocation26_spill] sm:$0xff]  ;;  %v9179_v48 = vld [vmem:[#allocation2 + $0xed4] sm:$0xf0] }
 0x2b9   :  { %v4942_v26 = vadd.f32 %v4941_v4, %v4913_v17  ;;  %v7506_v17 = vld [vmem:[#allocation2 + $0x928] sm:$0xf]  ;;  %v8999_v4 = vld [vmem:[#allocation2 + $0x934] sm:$0xf0] }
 0x2ba   :  { %5088 = vmatmul.bf16.gmra.mxu0 %v11161_v52  ;;  %5117 = vmatmul.bf16.gmra.mxu1 %v11162_v14  ;;  %v4887_v24 = vadd.f32 %v4886_v23, %v4858_v8  ;;  %v7507_v46 = vor.u32 %v8999_v4, %v7506_v17  ;;  %v7618_v23 = vld [vmem:[#allocation2 + $0xa08] sm:$0xf] }
 0x2bb   :  { %6008 = vst [vmem:[%s10904_s2 + $0x28] sm:$0xff] %v4942_v26  ;;  %5146 = vmatmul.bf16.gmra.mxu2 %v9538_v47  ;;  %5175 = vmatmul.bf16.gmra.mxu3 %v9540_v49  ;;  %v7619_v26 = vor.u32 %v9027_v63, %v7618_v23  ;;  %v7362_v8 = vld [vmem:[#allocation2 + $0x808] sm:$0xf] }
 0x2bc   :  { %5226 = vmatpush.bf16.msrb.mxu1 %v7507_v46  ;;  %v7363_v21 = vor.u32 %v8963_v33, %v7362_v8  ;;  %5285 = vmatpush.bf16.msrb.mxu3 %v7747_v34  ;;  %v8114_v51 = vld [vmem:[#allocation2 + $0xde8] sm:$0xf]  ;;  %v9115_v34 = vld [vmem:[#allocation2 + $0xcd4] sm:$0xf0] }
 0x2bd   :  { %5256 = vmatpush.bf16.msrb.mxu2 %v7619_v26 }
 0x2be   :  { %v4915_v5 = vpop.f32.mrf.mxu2  ;;  %v4944_v60 = vpop.f32.mrf.mxu3  ;;  %5198 = vmatpush.bf16.msrb.mxu0 %v7363_v21  ;;  %v8115_v21 = vor.u32 %v9151_v55, %v8114_v51  ;;  %v8082_v55 = vld [vmem:[#allocation2 + $0xda8] sm:$0xf] }
 0x2bf   :  { %v4916_v61 = vadd.f32 %v4915_v5, %v4887_v24  ;;  %v4859_v22 = vpop.f32.mrf.mxu0  ;;  %v4888_v27 = vpop.f32.mrf.mxu1  ;;  %v4834_v24 = vadd.f32 %v10356_v6, %v4805_v41  ;;  %v11164_v6 = vld [vmem:[#allocation27_spill] sm:$0xff] }
 0x2c0   :  { %v4860_v45 = vadd.f32 %v4859_v22, %v4831_v3  ;;  %5227 = vmatpush.bf16.msrb.mxu1 %v7491_v11  ;;  %v4807_v3 = vadd.f32 %v10362_v42, %v4778_v54  ;;  %v4752_v22 = vadd.f32 %v10366_v37, %v10302_v35  ;;  %v8370_v42 = vld [vmem:[#allocation2 + $0xfe8] sm:$0xf] }
 0x2c1   :  { %v4945_v15 = vadd.f32 %v4944_v60, %v4916_v61  ;;  %v8242_v61 = vld [vmem:[#allocation2 + $0xee8] sm:$0xf]  ;;  %v9183_v60 = vld [vmem:[#allocation2 + $0xef4] sm:$0xf0] }
 0x2c2   :  { %v4889_v0 = vadd.f32 %v4888_v27, %v4860_v45  ;;  %v8243_v44 = vor.u32 %v9183_v60, %v8242_v61  ;;  %v9215_v45 = vld [vmem:[#allocation2 + $0xff4] sm:$0xf0]  ;;  %v4836_v46 = vadd.f32 %v10364_v20, %v4807_v3  ;;  %v4781_v33 = vadd.f32 %v10368_v25, %v4752_v22 }
 0x2c3   :  { %6012 = vst [vmem:[%s10904_s2 + $0x48] sm:$0xff] %v4945_v15  ;;  %v9119_v15 = vld [vmem:[#allocation2 + $0xcf4] sm:$0xf0]  ;;  %v8371_v41 = vor.u32 %v9215_v45, %v8370_v42 }
 0x2c4   :  { %v7987_v4 = vor.u32 %v9119_v15, %v7986_v50  ;;  %5365 = vmatpush.bf16.msra.mxu2 %v8243_v44  ;;  %v4810_v20 = vadd.f32 %v10376_v7, %v4781_v33  ;;  %5336 = vmatpush.bf16.msra.mxu1 %v8115_v21  ;;  %v8098_v50 = vld [vmem:[#allocation2 + $0xdc8] sm:$0xf]  ;;  %v9147_v22 = vld [vmem:[#allocation2 + $0xdd4] sm:$0xf0] }
 0x2c5   :  { %5394 = vmatpush.bf16.msra.mxu3 %v8371_v41  ;;  %v9175_v44 = vld [vmem:[#allocation2 + $0xeb4] sm:$0xf0]  ;;  %v7954_v15 = vld [vmem:[#allocation2 + $0xca8] sm:$0xf] }
 0x2c6   :  { %v4917_v59 = vpop.f32.mrf.mxu2  ;;  %v4946_v43 = vpop.f32.mrf.mxu3  ;;  %5307 = vmatpush.bf16.msra.mxu0 %v7987_v4  ;;  %v4839_v7 = vadd.f32 %v10378_v9, %v4810_v20  ;;  %v11166_v9 = vld [vmem:[#allocation31_spill] sm:$0xff]  ;;  %v8338_v4 = vld [vmem:[#allocation2 + $0xfa8] sm:$0xf]  ;;  %v9207_v41 = vld [vmem:[#allocation2 + $0xfb4] sm:$0xf0] }
 0x2c7   :  { %v4918_v56 = vadd.f32 %v4917_v59, %v4889_v0  ;;  %v4862_v40 = vpop.f32.mrf.mxu0  ;;  %v4891_v5 = vpop.f32.mrf.mxu1  ;;  %v8226_v0 = vld [vmem:[#allocation2 + $0xec8] sm:$0xf]  ;;  %v9107_v20 = vld [vmem:[#allocation2 + $0xc94] sm:$0xf0] }
 0x2c8   :  { %v4863_v38 = vadd.f32 %v4862_v40, %v4834_v24  ;;  %v7970_v59 = vld [vmem:[#allocation2 + $0xcc8] sm:$0xf]  ;;  %v8227_v16 = vor.u32 %v9179_v48, %v8226_v0  ;;  %v9143_v0 = vld [vmem:[#allocation2 + $0xdb4] sm:$0xf0] }
 0x2c9   :  { %v4947_v39 = vadd.f32 %v4946_v43, %v4918_v56  ;;  %v7971_v30 = vor.u32 %v9115_v34, %v7970_v59  ;;  %v8354_v24 = vld [vmem:[#allocation2 + $0xfc8] sm:$0xf]  ;;  %v9211_v56 = vld [vmem:[#allocation2 + $0xfd4] sm:$0xf0]  ;;  %v4754_v43 = vadd.f32 %v10380_v12, %v10308_v10  ;;  %v8099_v12 = vor.u32 %v9147_v22, %v8098_v50 }
 0x2ca   :  { %5093 = vmatmul.bf16.gmra.mxu0 %v11163_v62  ;;  %5122 = vmatmul.bf16.gmra.mxu1 %v11164_v6  ;;  %v4892_v27 = vadd.f32 %v4891_v5, %v4863_v38  ;;  %v8355_v25 = vor.u32 %v9211_v56, %v8354_v24  ;;  %v8194_v21 = vld [vmem:[#allocation2 + $0xe88] sm:$0xf]  ;;  %v8083_v48 = vor.u32 %v9143_v0, %v8082_v55  ;;  %v9171_v59 = vld [vmem:[#allocation2 + $0xe94] sm:$0xf0] }
 0x2cb   :  { %6016 = vst [vmem:[%s10904_s2 + $0x68] sm:$0xff] %v4947_v39  ;;  %5151 = vmatmul.bf16.gmra.mxu2 %v11107_v18  ;;  %5180 = vmatmul.bf16.gmra.mxu3 %v11108_v19  ;;  %v4783_v3 = vadd.f32 %v10382_v13, %v4754_v43  ;;  %v8210_v13 = vld [vmem:[#allocation2 + $0xea8] sm:$0xf]  ;;  %v9203_v24 = vld [vmem:[#allocation2 + $0xf94] sm:$0xf0] }
 0x2cc   :  { %5366 = vmatpush.bf16.msra.mxu2 %v8227_v16  ;;  %5308 = vmatpush.bf16.msra.mxu0 %v7971_v30  ;;  %v8211_v45 = vor.u32 %v9175_v44, %v8210_v13  ;;  %v7938_v34 = vld [vmem:[#allocation2 + $0xc88] sm:$0xf]  ;;  %v9167_v22 = vld [vmem:[#allocation2 + $0xe74] sm:$0xf0] }
 0x2cd   :  { %5395 = vmatpush.bf16.msra.mxu3 %v8355_v25  ;;  %v4812_v10 = vadd.f32 %v10388_v53, %v4783_v3  ;;  %5337 = vmatpush.bf16.msra.mxu1 %v8099_v12  ;;  %v7939_v16 = vor.u32 %v9107_v20, %v7938_v34  ;;  %v8322_v30 = vld [vmem:[#allocation2 + $0xf88] sm:$0xf]  ;;  %v9139_v3 = vld [vmem:[#allocation2 + $0xd94] sm:$0xf0] }
 0x2ce   :  { %v4920_v17 = vpop.f32.mrf.mxu2  ;;  %v4949_v63 = vpop.f32.mrf.mxu3  ;;  %v8323_v56 = vor.u32 %v9203_v24, %v8322_v30  ;;  %v8178_v50 = vld [vmem:[#allocation2 + $0xe68] sm:$0xf]  ;;  %v9103_v13 = vld [vmem:[#allocation2 + $0xc74] sm:$0xf0] }
 0x2cf   :  { %v4921_v23 = vadd.f32 %v4920_v17, %v4892_v27  ;;  %v4864_v26 = vpop.f32.mrf.mxu0  ;;  %v4893_v8 = vpop.f32.mrf.mxu1  ;;  %v11165_v27 = vld [vmem:[#allocation30_spill] sm:$0xff]  ;;  %v9111_v17 = vld [vmem:[#allocation2 + $0xcb4] sm:$0xf0] }
 0x2d0   :  { %v4865_v35 = vadd.f32 %v4864_v26, %v4836_v46  ;;  %v7955_v46 = vor.u32 %v9111_v17, %v7954_v15  ;;  %5367 = vmatpush.bf16.msra.mxu2 %v8211_v45  ;;  %v7922_v12 = vld [vmem:[#allocation2 + $0xc68] sm:$0xf]  ;;  %v9199_v15 = vld [vmem:[#allocation2 + $0xf74] sm:$0xf0] }
 0x2d1   :  { %v4950_v37 = vadd.f32 %v4949_v63, %v4921_v23  ;;  %v8339_v23 = vor.u32 %v9207_v41, %v8338_v4  ;;  %v4841_v63 = vadd.f32 %v10391_v28, %v4812_v10  ;;  %v8195_v28 = vor.u32 %v9171_v59, %v8194_v21  ;;  %5338 = vmatpush.bf16.msra.mxu1 %v8083_v48  ;;  %v8306_v44 = vld [vmem:[#allocation2 + $0xf68] sm:$0xf]  ;;  %v9099_v55 = vld [vmem:[#allocation2 + $0xc54] sm:$0xf0] }
 0x2d2   :  { %v4894_v40 = vadd.f32 %v4893_v8, %v4865_v35  ;;  %5309 = vmatpush.bf16.msra.mxu0 %v7955_v46  ;;  %v8179_v10 = vor.u32 %v9167_v22, %v8178_v50  ;;  %v7923_v45 = vor.u32 %v9103_v13, %v7922_v12  ;;  %v8307_v17 = vor.u32 %v9199_v15, %v8306_v44  ;;  %v8290_v48 = vld [vmem:[#allocation2 + $0xf48] sm:$0xf]  ;;  %v9195_v59 = vld [vmem:[#allocation2 + $0xf54] sm:$0xf0] }
 0x2d3   :  { %6020 = vst [vmem:[%s10904_s2 + $0x88] sm:$0xff] %v4950_v37  ;;  %5396 = vmatpush.bf16.msra.mxu3 %v8339_v23  ;;  %v8291_v34 = vor.u32 %v9195_v59, %v8290_v48  ;;  %v9095_v22 = vld [vmem:[#allocation2 + $0xc34] sm:$0xf0]  ;;  %v8274_v12 = vld [vmem:[#allocation2 + $0xf28] sm:$0xf] }
 0x2d4   :  { %5368 = vmatpush.bf16.msra.mxu2 %v8195_v28 }
 0x2d6   :  { %v4922_v11 = vpop.f32.mrf.mxu2  ;;  %v4951_v54 = vpop.f32.mrf.mxu3  ;;  %5310 = vmatpush.bf16.msra.mxu0 %v7939_v16 }
 0x2d7   :  { %v4923_v5 = vadd.f32 %v4922_v11, %v4894_v40  ;;  %v4867_v39 = vpop.f32.mrf.mxu0  ;;  %v4896_v38 = vpop.f32.mrf.mxu1  ;;  %5397 = vmatpush.bf16.msra.mxu3 %v8323_v56 }
 0x2d8   :  { %v4868_v60 = vadd.f32 %v4867_v39, %v4839_v7  ;;  %5369 = vmatpush.bf16.msra.mxu2 %v8179_v10  ;;  %v9191_v10 = vld [vmem:[#allocation2 + $0xf34] sm:$0xf0] }
 0x2d9   :  { %v4952_v61 = vadd.f32 %v4951_v54, %v4923_v5  ;;  %v8275_v15 = vor.u32 %v9191_v10, %v8274_v12  ;;  %v8498_v12 = vld [vmem:[#allocation2 + $0x10e8] sm:$0xf] }
 0x2da   :  { %5098 = vmatmul.bf16.gmra.mxu0 %v11165_v27  ;;  %5127 = vmatmul.bf16.gmra.mxu1 %v11166_v9  ;;  %v4897_v42 = vadd.f32 %v4896_v38, %v4868_v60  ;;  %v8066_v38 = vld [vmem:[#allocation2 + $0xd88] sm:$0xf]  ;;  %v11167_v60 = vld [vmem:[#allocation35_spill] sm:$0xff] }
 0x2db   :  { %6024 = vst [vmem:[%s10904_s2 + $0xa8] sm:$0xff] %v4952_v61  ;;  %5156 = vmatmul.bf16.gmra.mxu2 %v11111_v58  ;;  %5185 = vmatmul.bf16.gmra.mxu3 %v11112_v32  ;;  %v8067_v61 = vor.u32 %v9139_v3, %v8066_v38  ;;  %v8146_v38 = vld [vmem:[#allocation2 + $0xe28] sm:$0xf]  ;;  %v9159_v3 = vld [vmem:[#allocation2 + $0xe34] sm:$0xf0] }
 0x2dc   :  { %5311 = vmatpush.bf16.msra.mxu0 %v7923_v45  ;;  %5398 = vmatpush.bf16.msra.mxu3 %v8307_v17  ;;  %v8147_v50 = vor.u32 %v9159_v3, %v8146_v38  ;;  %v11173_v38 = vld [vmem:[#allocation41_spill] sm:$0xff]  ;;  %v11174_v3 = vld [vmem:[#allocation42_spill] sm:$0xff] }
 0x2dd   :  { %5339 = vmatpush.bf16.msra.mxu1 %v8067_v61  ;;  %v7890_v61 = vld [vmem:[#allocation2 + $0xc28] sm:$0xf] }
 0x2de   :  { %v4925_v53 = vpop.f32.mrf.mxu2  ;;  %v4954_v8 = vpop.f32.mrf.mxu3  ;;  %v7891_v44 = vor.u32 %v9095_v22, %v7890_v61  ;;  %v11175_v61 = vld [vmem:[#allocation43_spill] sm:$0xff]  ;;  %v6452_v22 = vld [vmem:[#allocation2 + $0xf8] sm:$0xf0] }
 0x2df   :  { %v4926_v26 = vadd.f32 %v4925_v53, %v4897_v42  ;;  %v4869_v33 = vpop.f32.mrf.mxu0  ;;  %v4898_v37 = vpop.f32.mrf.mxu1 }
 0x2e0   :  { %v4870_v51 = vadd.f32 %v4869_v33, %v4841_v63  ;;  %v8162_v33 = vld [vmem:[#allocation2 + $0xe48] sm:$0xf]  ;;  %5399 = vmatpush.bf16.msra.mxu3 %v8291_v34 }
 0x2e1   :  { %v4955_v35 = vadd.f32 %v4954_v8, %v4926_v26  ;;  %v8050_v26 = vld [vmem:[#allocation2 + $0xd68] sm:$0xf]  ;;  %v9135_v8 = vld [vmem:[#allocation2 + $0xd74] sm:$0xf0] }
 0x2e2   :  { %v4899_v25 = vadd.f32 %v4898_v37, %v4870_v51  ;;  %v8051_v37 = vor.u32 %v9135_v8, %v8050_v26  ;;  %v7906_v51 = vld [vmem:[#allocation2 + $0xc48] sm:$0xf] }
 0x2e3   :  { %6028 = vst [vmem:[%s10904_s2 + $0xc8] sm:$0xff] %v4955_v35  ;;  %v9163_v35 = vld [vmem:[#allocation2 + $0xe54] sm:$0xf0]  ;;  %v7907_v21 = vor.u32 %v9099_v55, %v7906_v51  ;;  %v8130_v26 = vld [vmem:[#allocation2 + $0xe08] sm:$0xf] }
 0x2e4   :  { %v8163_v0 = vor.u32 %v9163_v35, %v8162_v33  ;;  %5340 = vmatpush.bf16.msra.mxu1 %v8051_v37  ;;  %5400 = vmatpush.bf16.msra.mxu3 %v8275_v15  ;;  %v9155_v33 = vld [vmem:[#allocation2 + $0xe14] sm:$0xf0]  ;;  %v7874_v37 = vld [vmem:[#allocation2 + $0xc08] sm:$0xf]  ;;  %v6580_v15 = vld [vmem:[#allocation2 + $0x1f8] sm:$0xf0] }
 0x2e5   :  { %5312 = vmatpush.bf16.msra.mxu0 %v7907_v21  ;;  %v9091_v35 = vld [vmem:[#allocation2 + $0xc14] sm:$0xf0]  ;;  %v8131_v51 = vor.u32 %v9155_v33, %v8130_v26  ;;  %v8002_v34 = vld [vmem:[#allocation2 + $0xd08] sm:$0xf] }
 0x2e6   :  { %v4927_v43 = vpop.f32.mrf.mxu2  ;;  %v4956_v11 = vpop.f32.mrf.mxu3  ;;  %5370 = vmatpush.bf16.msra.mxu2 %v8163_v0  ;;  %v7875_v55 = vor.u32 %v9091_v35, %v7874_v37  ;;  %v8258_v0 = vld [vmem:[#allocation2 + $0xf08] sm:$0xf]  ;;  %v9187_v21 = vld [vmem:[#allocation2 + $0xf14] sm:$0xf0] }
 0x2e7   :  { %v4928_v40 = vadd.f32 %v4927_v43, %v4899_v25  ;;  %v4968_v7 = vpop.f32.mrf.mxu0  ;;  %v4997_v5 = vpop.f32.mrf.mxu1  ;;  %v8034_v43 = vld [vmem:[#allocation2 + $0xd48] sm:$0xf]  ;;  %v8259_v48 = vor.u32 %v9187_v21, %v8258_v0  ;;  %v9279_v37 = vld [vmem:[#allocation2 + $0x11f4] sm:$0xf0] }
 0x2e8   :  { %v4998_v39 = vadd.f32 %v4997_v5, %v4968_v7  ;;  %v11169_v5 = vld [vmem:[#allocation37_spill] sm:$0xff]  ;;  %v8626_v33 = vld [vmem:[#allocation2 + $0x11e8] sm:$0xf] }
 0x2e9   :  { %v4957_v54 = vadd.f32 %v4956_v11, %v4928_v40  ;;  %v9131_v40 = vld [vmem:[#allocation2 + $0xd54] sm:$0xf0]  ;;  %5313 = vmatpush.bf16.msra.mxu0 %v7891_v44  ;;  %5401 = vmatpush.bf16.msra.mxu3 %v8259_v48  ;;  %v8765_v44 = vld [vmem:[#allocation2 + $0x1ec] sm:$0xf]  ;;  %v8627_v35 = vor.u32 %v9279_v37, %v8626_v33  ;;  %v8482_v0 = vld [vmem:[#allocation2 + $0x10c8] sm:$0xf] }
 0x2ea   :  { %5199 = vmatmul.bf16.vlgmr.msrb.gmra.mxu0 %v9642_v29  ;;  %5228 = vmatmul.bf16.vlgmr.msrb.gmra.mxu1 %v9644_v31  ;;  %v11168_v11 = vld [vmem:[#allocation36_spill] sm:$0xff]  ;;  %v8035_v7 = vor.u32 %v9131_v40, %v8034_v43 }
 0x2eb   :  { %6032 = vst [vmem:[%s10904_s2 + $0xe8] sm:$0xff] %v4957_v54  ;;  %5257 = vmatmul.bf16.vlgmr.msrb.gmra.mxu2 %v11115_v57  ;;  %5286 = vmatmul.bf16.vlgmr.msrb.gmra.mxu3 %v11167_v60  ;;  %v11170_v54 = vld [vmem:[#allocation38_spill] sm:$0xff]  ;;  %v9243_v48 = vld [vmem:[#allocation2 + $0x10d4] sm:$0xf0]  ;;  %v6548_v33 = vld [vmem:[#allocation2 + $0x1b8] sm:$0xf0] }
 0x2ec   :  { %5341 = vmatpush.bf16.msra.mxu1 %v8035_v7  ;;  %5371 = vmatpush.bf16.msra.mxu2 %v8147_v50  ;;  %v11172_v7 = vld [vmem:[#allocation40_spill] sm:$0xff]  ;;  %v8733_v50 = vld [vmem:[#allocation2 + $0xec] sm:$0xf] }
 0x2ed   :  { %5314 = vmatpush.bf16.msra.mxu0 %v7875_v55  ;;  %v6455_v10 = vor.u32 %v8733_v50, %v6452_v22  ;;  %v6436_v55 = vld [vmem:[#allocation2 + $0xd8] sm:$0xf0] }
 0x2ee   :  { %v5026_v42 = vpop.f32.mrf.mxu2  ;;  %v5055_v41 = vpop.f32.mrf.mxu3 }
 0x2ef   :  { %v5027_v4 = vadd.f32 %v5026_v42, %v4998_v39  ;;  %v4970_v53 = vpop.f32.mrf.mxu0  ;;  %v4999_v46 = vpop.f32.mrf.mxu1  ;;  %v11171_v39 = vld [vmem:[#allocation39_spill] sm:$0xff] }
 0x2f0   :  { %v5000_v63 = vadd.f32 %v4999_v46, %v4970_v53  ;;  %v8018_v46 = vld [vmem:[#allocation2 + $0xd28] sm:$0xf]  ;;  %5372 = vmatpush.bf16.msra.mxu2 %v8131_v51  ;;  %v8729_v51 = vld [vmem:[#allocation2 + $0xcc] sm:$0xf] }
 0x2f1   :  { %v10470_v23 = vadd.f32 %v5055_v41, %v5027_v4  ;;  %v6439_v21 = vor.u32 %v8729_v51, %v6436_v55 }
 0x2f4   :  { %5481 = vmatpush.bf16.msrb.mxu2 %v6455_v10  ;;  %v9275_v10 = vld [vmem:[#allocation2 + $0x11d4] sm:$0xf0] }
 0x2f6   :  { %v5028_v20 = vpop.f32.mrf.mxu2  ;;  %v5057_v16 = vpop.f32.mrf.mxu3 }
 0x2f7   :  { %v5029_v28 = vadd.f32 %v5028_v20, %v5000_v63  ;;  %v4973_v30 = vpop.f32.mrf.mxu0  ;;  %v5002_v24 = vpop.f32.mrf.mxu1  ;;  %v9127_v63 = vld [vmem:[#allocation2 + $0xd34] sm:$0xf0] }
 0x2f8   :  { %v5003_v25 = vadd.f32 %v5002_v24, %v4973_v30  ;;  %v8019_v8 = vor.u32 %v9127_v63, %v8018_v46  ;;  %v9123_v20 = vld [vmem:[#allocation2 + $0xd14] sm:$0xf0]  ;;  %5482 = vmatpush.bf16.msrb.mxu2 %v6439_v21 }
 0x2f9   :  { %v10472_v56 = vadd.f32 %v5057_v16, %v5029_v28  ;;  %v8003_v24 = vor.u32 %v9123_v20, %v8002_v34  ;;  %v6564_v34 = vld [vmem:[#allocation2 + $0x1d8] sm:$0xf0]  ;;  %v8483_v20 = vor.u32 %v9243_v48, %v8482_v0 }
 0x2fa   :  { %5204 = vmatmul.bf16.gmra.mxu0 %v11168_v11  ;;  %5233 = vmatmul.bf16.gmra.mxu1 %v11169_v5 }
 0x2fb   :  { %5262 = vmatmul.bf16.gmra.mxu2 %v11170_v54  ;;  %5291 = vmatmul.bf16.gmra.mxu3 %v11171_v39  ;;  %v9049_v54 = vld [vmem:[#allocation2 + $0xacc] sm:$0xf] }
 0x2fc   :  { %5342 = vmatpush.bf16.msra.mxu1 %v8019_v8 }
 0x2fe   :  { %v5031_v13 = vpop.f32.mrf.mxu2  ;;  %v5060_v45 = vpop.f32.mrf.mxu3 }
 0x2ff   :  { %v5032_v42 = vadd.f32 %v5031_v13, %v5003_v25  ;;  %v4975_v17 = vpop.f32.mrf.mxu0  ;;  %v5004_v4 = vpop.f32.mrf.mxu1  ;;  %v9247_v13 = vld [vmem:[#allocation2 + $0x10f4] sm:$0xf0] }
 0x300   :  { %v5005_v53 = vadd.f32 %v5004_v4, %v4975_v17  ;;  %5343 = vmatpush.bf16.msra.mxu1 %v8003_v24  ;;  %v6583_v17 = vor.u32 %v8765_v44, %v6580_v15  ;;  %v11177_v15 = vld [vmem:[#allocation45_spill] sm:$0xff] }
 0x301   :  { %v10478_v41 = vadd.f32 %v5060_v45, %v5032_v42  ;;  %v8499_v45 = vor.u32 %v9247_v13, %v8498_v12  ;;  %v8610_v12 = vld [vmem:[#allocation2 + $0x11c8] sm:$0xf]  ;;  %v11176_v13 = vld [vmem:[#allocation44_spill] sm:$0xff] }
 0x302   :  { %5510 = vmatpush.bf16.msrb.mxu3 %v6583_v17  ;;  %v8611_v44 = vor.u32 %v9275_v10, %v8610_v12  ;;  %v8725_v17 = vld [vmem:[#allocation2 + $0xac] sm:$0xf]  ;;  %v9235_v12 = vld [vmem:[#allocation2 + $0x1094] sm:$0xf0] }
 0x303   :  { %5423 = vmatpush.bf16.msrb.mxu0 %v8499_v45  ;;  %v11179_v45 = vld [vmem:[#allocation47_spill] sm:$0xff]  ;;  %v8753_v10 = vld [vmem:[#allocation2 + $0x18c] sm:$0xf] }
 0x304   :  { %5452 = vmatpush.bf16.msrb.mxu1 %v8627_v35 }
 0x306   :  { %v5033_v59 = vpop.f32.mrf.mxu2  ;;  %v5062_v16 = vpop.f32.mrf.mxu3 }
 0x307   :  { %v5034_v28 = vadd.f32 %v5033_v59, %v5005_v53  ;;  %v4978_v30 = vpop.f32.mrf.mxu0  ;;  %v5007_v25 = vpop.f32.mrf.mxu1  ;;  %v8761_v59 = vld [vmem:[#allocation2 + $0x1cc] sm:$0xf]  ;;  %5424 = vmatpush.bf16.msrb.mxu0 %v8483_v20  ;;  %v8594_v20 = vld [vmem:[#allocation2 + $0x11a8] sm:$0xf] }
 0x308   :  { %v5008_v40 = vadd.f32 %v5007_v25, %v4978_v30  ;;  %5453 = vmatpush.bf16.msrb.mxu1 %v8611_v44  ;;  %v6532_v44 = vld [vmem:[#allocation2 + $0x198] sm:$0xf0] }
 0x309   :  { %v10480_v43 = vadd.f32 %v5062_v16, %v5034_v28  ;;  %v6567_v28 = vor.u32 %v8761_v59, %v6564_v34 }
 0x30a   :  { %5209 = vmatmul.bf16.gmra.mxu0 %v11172_v7  ;;  %5238 = vmatmul.bf16.gmra.mxu1 %v11173_v38 }
 0x30b   :  { %5267 = vmatmul.bf16.gmra.mxu2 %v11174_v3  ;;  %5296 = vmatmul.bf16.gmra.mxu3 %v11175_v61  ;;  %v7108_v3 = vld [vmem:[#allocation2 + $0x618] sm:$0xf0] }
 0x30c   :  { %5511 = vmatpush.bf16.msrb.mxu3 %v6567_v28  ;;  %v9271_v28 = vld [vmem:[#allocation2 + $0x11b4] sm:$0xf0] }
 0x30e   :  { %v5036_v42 = vpop.f32.mrf.mxu2  ;;  %v5065_v53 = vpop.f32.mrf.mxu3 }
 0x30f   :  { %v5037_v4 = vadd.f32 %v5036_v42, %v5008_v40  ;;  %v4980_v46 = vpop.f32.mrf.mxu0  ;;  %v5009_v63 = vpop.f32.mrf.mxu1  ;;  %v11178_v42 = vld [vmem:[#allocation46_spill] sm:$0xff] }
 0x310   :  { %v5010_v8 = vadd.f32 %v5009_v63, %v4980_v46  ;;  %v9239_v63 = vld [vmem:[#allocation2 + $0x10b4] sm:$0xf0] }
 0x311   :  { %v10486_v26 = vadd.f32 %v5065_v53, %v5037_v4  ;;  %v6420_v4 = vld [vmem:[#allocation2 + $0xb8] sm:$0xf0]  ;;  %v8466_v53 = vld [vmem:[#allocation2 + $0x10a8] sm:$0xf] }
 0x312   :  { %v6423_v46 = vor.u32 %v8725_v17, %v6420_v4  ;;  %v8467_v35 = vor.u32 %v9239_v63, %v8466_v53  ;;  %v6535_v17 = vor.u32 %v8753_v10, %v6532_v44 }
 0x314   :  { %5483 = vmatpush.bf16.msrb.mxu2 %v6423_v46  ;;  %5425 = vmatpush.bf16.msrb.mxu0 %v8467_v35  ;;  %v8578_v35 = vld [vmem:[#allocation2 + $0x1188] sm:$0xf] }
 0x316   :  { %v5038_v16 = vpop.f32.mrf.mxu2  ;;  %v5067_v24 = vpop.f32.mrf.mxu3 }
 0x317   :  { %v5039_v30 = vadd.f32 %v5038_v16, %v5010_v8  ;;  %v4983_v25 = vpop.f32.mrf.mxu0  ;;  %v5012_v40 = vpop.f32.mrf.mxu1  ;;  %v8757_v8 = vld [vmem:[#allocation2 + $0x1ac] sm:$0xf]  ;;  %v8595_v16 = vor.u32 %v9271_v28, %v8594_v20  ;;  %v11183_v28 = vld [vmem:[#allocation51_spill] sm:$0xff] }
 0x318   :  { %v5013_v22 = vadd.f32 %v5012_v40, %v4983_v25  ;;  %v6551_v51 = vor.u32 %v8757_v8, %v6548_v33  ;;  %v8450_v25 = vld [vmem:[#allocation2 + $0x1088] sm:$0xf] }
 0x319   :  { %v10488_v50 = vadd.f32 %v5067_v24, %v5039_v30  ;;  %v8721_v30 = vld [vmem:[#allocation2 + $0x8c] sm:$0xf]  ;;  %v6404_v24 = vld [vmem:[#allocation2 + $0x98] sm:$0xf0]  ;;  %5454 = vmatpush.bf16.msrb.mxu1 %v8595_v16 }
 0x31a   :  { %5214 = vmatmul.bf16.gmra.mxu0 %v11176_v13  ;;  %5243 = vmatmul.bf16.gmra.mxu1 %v11177_v15  ;;  %v6407_v40 = vor.u32 %v8721_v30, %v6404_v24  ;;  %v11182_v20 = vld [vmem:[#allocation50_spill] sm:$0xff]  ;;  %v6388_v16 = vld [vmem:[#allocation2 + $0x78] sm:$0xf0]  ;;  %v9231_v24 = vld [vmem:[#allocation2 + $0x1074] sm:$0xf0] }
 0x31b   :  { %5272 = vmatmul.bf16.gmra.mxu2 %v11178_v42  ;;  %5301 = vmatmul.bf16.gmra.mxu3 %v11179_v45  ;;  %v8434_v30 = vld [vmem:[#allocation2 + $0x1068] sm:$0xf]  ;;  %v6948_v45 = vld [vmem:[#allocation2 + $0x4d8] sm:$0xf0]  ;;  %v8793_v42 = vld [vmem:[#allocation2 + $0x2cc] sm:$0xf] }
 0x31c   :  { %5512 = vmatpush.bf16.msrb.mxu3 %v6551_v51  ;;  %5484 = vmatpush.bf16.msrb.mxu2 %v6407_v40  ;;  %v9267_v51 = vld [vmem:[#allocation2 + $0x1194] sm:$0xf0]  ;;  %v6516_v40 = vld [vmem:[#allocation2 + $0x178] sm:$0xf0]  ;;  %v8435_v10 = vor.u32 %v9231_v24, %v8434_v30  ;;  %v9137_v13 = vld [vmem:[#allocation2 + $0xd8c] sm:$0xf] }
 0x31d   :  { %v9227_v24 = vld [vmem:[#allocation2 + $0x1054] sm:$0xf0] }
 0x31e   :  { %v5041_v37 = vpop.f32.mrf.mxu2  ;;  %v5070_v0 = vpop.f32.mrf.mxu3 }
 0x31f   :  { %v5042_v55 = vadd.f32 %v5041_v37, %v5013_v22  ;;  %v4985_v21 = vpop.f32.mrf.mxu0  ;;  %v5014_v48 = vpop.f32.mrf.mxu1  ;;  %v8451_v22 = vor.u32 %v9235_v12, %v8450_v25  ;;  %v8749_v25 = vld [vmem:[#allocation2 + $0x16c] sm:$0xf] }
 0x320   :  { %v5015_v34 = vadd.f32 %v5014_v48, %v4985_v21  ;;  %5513 = vmatpush.bf16.msrb.mxu3 %v6535_v17  ;;  %v8579_v21 = vor.u32 %v9267_v51, %v8578_v35  ;;  %v11181_v48 = vld [vmem:[#allocation49_spill] sm:$0xff]  ;;  %v6519_v44 = vor.u32 %v8749_v25, %v6516_v40  ;;  %v6500_v25 = vld [vmem:[#allocation2 + $0x158] sm:$0xf0] }
 0x321   :  { %v10494_v59 = vadd.f32 %v5070_v0, %v5042_v55  ;;  %5426 = vmatpush.bf16.msrb.mxu0 %v8451_v22  ;;  %v11180_v0 = vld [vmem:[#allocation48_spill] sm:$0xff] }
 0x322   :  { %5455 = vmatpush.bf16.msrb.mxu1 %v8579_v21  ;;  %v8713_v21 = vld [vmem:[#allocation2 + $0x4c] sm:$0xf] }
 0x324   :  { %5514 = vmatpush.bf16.msrb.mxu3 %v6519_v44 }
 0x325   :  { %5427 = vmatpush.bf16.msrb.mxu0 %v8435_v10 }
 0x326   :  { %v5043_v4 = vpop.f32.mrf.mxu2  ;;  %v5072_v46 = vpop.f32.mrf.mxu3 }
 0x327   :  { %v5044_v53 = vadd.f32 %v5043_v4, %v5015_v34  ;;  %v5084_v63 = vpop.f32.mrf.mxu0  ;;  %v5113_v33 = vpop.f32.mrf.mxu1  ;;  %v8717_v34 = vld [vmem:[#allocation2 + $0x6c] sm:$0xf] }
 0x328   :  { %v5085_v8 = vadd.f32 %v5084_v63, %v10470_v23  ;;  %v6391_v23 = vor.u32 %v8717_v34, %v6388_v16  ;;  %v6372_v34 = vld [vmem:[#allocation2 + $0x58] sm:$0xf0]  ;;  %v8418_v16 = vld [vmem:[#allocation2 + $0x1048] sm:$0xf] }
 0x329   :  { %v10497_v37 = vadd.f32 %v5072_v46, %v5044_v53  ;;  %v6375_v30 = vor.u32 %v8713_v21, %v6372_v34  ;;  %v11185_v21 = vld [vmem:[#allocation53_spill] sm:$0xff]  ;;  %v11186_v34 = vld [vmem:[#allocation54_spill] sm:$0xff] }
 0x32a   :  { %v5114_v55 = vadd.f32 %v5113_v33, %v5085_v8  ;;  %5315 = vmatmul.bf16.vlgmr.msra.gmra.mxu0 %v11180_v0  ;;  %5344 = vmatmul.bf16.vlgmr.msra.gmra.mxu1 %v11181_v48  ;;  %v8562_v8 = vld [vmem:[#allocation2 + $0x1168] sm:$0xf]  ;;  %v9263_v33 = vld [vmem:[#allocation2 + $0x1174] sm:$0xf0]  ;;  %v7716_v0 = vld [vmem:[#allocation2 + $0xad8] sm:$0xf0] }
 0x32b   :  { %5373 = vmatmul.bf16.vlgmr.msra.gmra.mxu2 %v11182_v20  ;;  %5402 = vmatmul.bf16.vlgmr.msra.gmra.mxu3 %v11183_v28  ;;  %v8563_v51 = vor.u32 %v9263_v33, %v8562_v8  ;;  %v11184_v33 = vld [vmem:[#allocation52_spill] sm:$0xff]  ;;  %v8386_v20 = vld [vmem:[#allocation2 + $0x1008] sm:$0xf] }
 0x32c   :  { %5485 = vmatpush.bf16.msrb.mxu2 %v6391_v23  ;;  %v8419_v23 = vor.u32 %v9227_v24, %v8418_v16  ;;  %v11187_v16 = vld [vmem:[#allocation55_spill] sm:$0xff]  ;;  %v8402_v24 = vld [vmem:[#allocation2 + $0x1028] sm:$0xf]  ;;  %v6340_v28 = vld [vmem:[#allocation2 + $0x18] sm:$0xf0] }
 0x32d   :  { %5456 = vmatpush.bf16.msrb.mxu1 %v8563_v51 }
 0x32e   :  { %v5142_v12 = vpop.f32.mrf.mxu2  ;;  %v5171_v17 = vpop.f32.mrf.mxu3  ;;  %5428 = vmatpush.bf16.msrb.mxu0 %v8419_v23  ;;  %v6484_v23 = vld [vmem:[#allocation2 + $0x138] sm:$0xf0] }
 0x32f   :  { %v5143_v22 = vadd.f32 %v5142_v12, %v5114_v55  ;;  %v5086_v4 = vpop.f32.mrf.mxu0  ;;  %v5115_v46 = vpop.f32.mrf.mxu1  ;;  %v8745_v55 = vld [vmem:[#allocation2 + $0x14c] sm:$0xf] }
 0x330   :  { %v5087_v53 = vadd.f32 %v5086_v4, %v10472_v56  ;;  %v6503_v40 = vor.u32 %v8745_v55, %v6500_v25  ;;  %5486 = vmatpush.bf16.msrb.mxu2 %v6375_v30  ;;  %v6356_v30 = vld [vmem:[#allocation2 + $0x38] sm:$0xf0]  ;;  %v9223_v55 = vld [vmem:[#allocation2 + $0x1034] sm:$0xf0]  ;;  %v8741_v25 = vld [vmem:[#allocation2 + $0x12c] sm:$0xf] }
 0x331   :  { %v10504_v63 = vadd.f32 %v5171_v17, %v5143_v22 }
 0x332   :  { %v5116_v35 = vadd.f32 %v5115_v46, %v5087_v53  ;;  %5515 = vmatpush.bf16.msrb.mxu3 %v6503_v40  ;;  %v8546_v53 = vld [vmem:[#allocation2 + $0x1148] sm:$0xf]  ;;  %v9259_v46 = vld [vmem:[#allocation2 + $0x1154] sm:$0xf0] }
 0x333   :  { %v8547_v51 = vor.u32 %v9259_v46, %v8546_v53 }
 0x335   :  { %5457 = vmatpush.bf16.msrb.mxu1 %v8547_v51  ;;  %v8530_v51 = vld [vmem:[#allocation2 + $0x1128] sm:$0xf] }
 0x336   :  { %v5144_v56 = vpop.f32.mrf.mxu2  ;;  %v5173_v10 = vpop.f32.mrf.mxu3 }
 0x337   :  { %v5145_v12 = vadd.f32 %v5144_v56, %v5116_v35  ;;  %v5089_v44 = vpop.f32.mrf.mxu0  ;;  %v5118_v17 = vpop.f32.mrf.mxu1  ;;  %v8709_v35 = vld [vmem:[#allocation2 + $0x2c] sm:$0xf]  ;;  %v8403_v56 = vor.u32 %v9223_v55, %v8402_v24  ;;  %v9219_v55 = vld [vmem:[#allocation2 + $0x1014] sm:$0xf0] }
 0x338   :  { %v5090_v22 = vadd.f32 %v5089_v44, %v10478_v41  ;;  %v6359_v41 = vor.u32 %v8709_v35, %v6356_v30 }
 0x339   :  { %v10507_v4 = vadd.f32 %v5173_v10, %v5145_v12  ;;  %v6487_v12 = vor.u32 %v8741_v25, %v6484_v23  ;;  %5429 = vmatpush.bf16.msrb.mxu0 %v8403_v56  ;;  %v6468_v25 = vld [vmem:[#allocation2 + $0x118] sm:$0xf0]  ;;  %v9251_v56 = vld [vmem:[#allocation2 + $0x1114] sm:$0xf0] }
 0x33a   :  { %v5119_v8 = vadd.f32 %v5118_v17, %v5090_v22  ;;  %5320 = vmatmul.bf16.gmra.mxu0 %v11184_v33  ;;  %5349 = vmatmul.bf16.gmra.mxu1 %v11185_v21  ;;  %v8993_v21 = vld [vmem:[#allocation2 + $0x90c] sm:$0xf] }
 0x33b   :  { %5378 = vmatmul.bf16.gmra.mxu2 %v11186_v34  ;;  %5407 = vmatmul.bf16.gmra.mxu3 %v11187_v16  ;;  %v9255_v16 = vld [vmem:[#allocation2 + $0x1134] sm:$0xf0]  ;;  %v8705_v34 = vld [vmem:[#allocation2 + $0xc] sm:$0xf] }
 0x33c   :  { %5487 = vmatpush.bf16.msrb.mxu2 %v6359_v41  ;;  %5516 = vmatpush.bf16.msrb.mxu3 %v6487_v12  ;;  %v8531_v30 = vor.u32 %v9255_v16, %v8530_v51  ;;  %v6343_v24 = vor.u32 %v8705_v34, %v6340_v28  ;;  %v8387_v41 = vor.u32 %v9219_v55, %v8386_v20  ;;  %v11189_v20 = vld [vmem:[#allocation57_spill] sm:$0xff]  ;;  %v11190_v51 = vld [vmem:[#allocation58_spill] sm:$0xff] }
 0x33d   :  { %v8797_v55 = vld [vmem:[#allocation2 + $0x2ec] sm:$0xf] }
 0x33e   :  { %v5147_v40 = vpop.f32.mrf.mxu2  ;;  %v5176_v44 = vpop.f32.mrf.mxu3  ;;  %5458 = vmatpush.bf16.msrb.mxu1 %v8531_v30  ;;  %5430 = vmatpush.bf16.msrb.mxu0 %v8387_v41  ;;  %v11191_v30 = vld [vmem:[#allocation59_spill] sm:$0xff]  ;;  %v8893_v41 = vld [vmem:[#allocation2 + $0x5ec] sm:$0xf] }
 0x33f   :  { %v5148_v10 = vadd.f32 %v5147_v40, %v5119_v8  ;;  %v5091_v22 = vpop.f32.mrf.mxu0  ;;  %v5120_v53 = vpop.f32.mrf.mxu1  ;;  %v8737_v8 = vld [vmem:[#allocation2 + $0x10c] sm:$0xf]  ;;  %v8514_v40 = vld [vmem:[#allocation2 + $0x1108] sm:$0xf] }
 0x340   :  { %v5092_v17 = vadd.f32 %v5091_v22, %v10480_v43  ;;  %v6471_v23 = vor.u32 %v8737_v8, %v6468_v25  ;;  %5488 = vmatpush.bf16.msrb.mxu2 %v6343_v24  ;;  %v8515_v16 = vor.u32 %v9251_v56, %v8514_v40  ;;  %v8861_v24 = vld [vmem:[#allocation2 + $0x4ec] sm:$0xf]  ;;  %v6708_v25 = vld [vmem:[#allocation2 + $0x2f8] sm:$0xf0] }
 0x341   :  { %v10514_v46 = vadd.f32 %v5176_v44, %v5148_v10 }
 0x342   :  { %v5121_v35 = vadd.f32 %v5120_v53, %v5092_v17  ;;  %5517 = vmatpush.bf16.msrb.mxu3 %v6471_v23  ;;  %5459 = vmatpush.bf16.msrb.mxu1 %v8515_v16  ;;  %v11188_v53 = vld [vmem:[#allocation56_spill] sm:$0xff] }
 0x346   :  { %v5149_v43 = vpop.f32.mrf.mxu2  ;;  %v5178_v10 = vpop.f32.mrf.mxu3 }
 0x347   :  { %v5150_v12 = vadd.f32 %v5149_v43, %v5121_v35  ;;  %v5094_v44 = vpop.f32.mrf.mxu0  ;;  %v5123_v17 = vpop.f32.mrf.mxu1  ;;  %v6964_v35 = vld [vmem:[#allocation2 + $0x4f8] sm:$0xf0]  ;;  %v6711_v43 = vor.u32 %v8797_v55, %v6708_v25 }
 0x348   :  { %v5095_v22 = vadd.f32 %v5094_v44, %v10486_v26  ;;  %v6967_v8 = vor.u32 %v8861_v24, %v6964_v35  ;;  %v7092_v26 = vld [vmem:[#allocation2 + $0x5f8] sm:$0xf0] }
 0x349   :  { %v10517_v28 = vadd.f32 %v5178_v10, %v5150_v12  ;;  %v7095_v40 = vor.u32 %v8893_v41, %v7092_v26  ;;  %5539 = vmatpush.bf16.msra.mxu0 %v6711_v43  ;;  %v6692_v25 = vld [vmem:[#allocation2 + $0x2d8] sm:$0xf0] }
 0x34a   :  { %v5124_v34 = vadd.f32 %v5123_v17, %v5095_v22  ;;  %5325 = vmatmul.bf16.gmra.mxu0 %v11188_v53  ;;  %5354 = vmatmul.bf16.gmra.mxu1 %v11189_v20  ;;  %v8829_v17 = vld [vmem:[#allocation2 + $0x3ec] sm:$0xf]  ;;  %v7076_v41 = vld [vmem:[#allocation2 + $0x5d8] sm:$0xf0] }
 0x34b   :  { %5383 = vmatmul.bf16.gmra.mxu2 %v11190_v51  ;;  %5412 = vmatmul.bf16.gmra.mxu3 %v11191_v30  ;;  %v6836_v30 = vld [vmem:[#allocation2 + $0x3f8] sm:$0xf0]  ;;  %v8857_v51 = vld [vmem:[#allocation2 + $0x4cc] sm:$0xf] }
 0x34c   :  { %5597 = vmatpush.bf16.msra.mxu2 %v6967_v8  ;;  %5626 = vmatpush.bf16.msra.mxu3 %v7095_v40  ;;  %v6839_v35 = vor.u32 %v8829_v17, %v6836_v30  ;;  %v6951_v55 = vor.u32 %v8857_v51, %v6948_v45  ;;  %v6695_v8 = vor.u32 %v8793_v42, %v6692_v25  ;;  %v6820_v45 = vld [vmem:[#allocation2 + $0x3d8] sm:$0xf0]  ;;  %v11193_v42 = vld [vmem:[#allocation61_spill] sm:$0xff]  ;;  %v11194_v17 = vld [vmem:[#allocation62_spill] sm:$0xff] }
 0x34d   :  { %v8789_v25 = vld [vmem:[#allocation2 + $0x2ac] sm:$0xf] }
 0x34e   :  { %v5152_v23 = vpop.f32.mrf.mxu2  ;;  %v5181_v12 = vpop.f32.mrf.mxu3  ;;  %5568 = vmatpush.bf16.msra.mxu1 %v6839_v35  ;;  %5540 = vmatpush.bf16.msra.mxu0 %v6695_v8  ;;  %v11195_v35 = vld [vmem:[#allocation63_spill] sm:$0xff]  ;;  %v7060_v8 = vld [vmem:[#allocation2 + $0x5b8] sm:$0xf0] }
 0x34f   :  { %v5153_v56 = vadd.f32 %v5152_v23, %v5124_v34  ;;  %v5096_v10 = vpop.f32.mrf.mxu0  ;;  %v5125_v16 = vpop.f32.mrf.mxu1  ;;  %v8889_v34 = vld [vmem:[#allocation2 + $0x5cc] sm:$0xf] }
 0x350   :  { %v5097_v44 = vadd.f32 %v5096_v10, %v10488_v50  ;;  %v7079_v26 = vor.u32 %v8889_v34, %v7076_v41  ;;  %5598 = vmatpush.bf16.msra.mxu2 %v6951_v55  ;;  %v8825_v10 = vld [vmem:[#allocation2 + $0x3cc] sm:$0xf]  ;;  %v6932_v55 = vld [vmem:[#allocation2 + $0x4b8] sm:$0xf0] }
 0x351   :  { %v10524_v22 = vadd.f32 %v5181_v12, %v5153_v56  ;;  %v6676_v34 = vld [vmem:[#allocation2 + $0x2b8] sm:$0xf0]  ;;  %v8885_v41 = vld [vmem:[#allocation2 + $0x5ac] sm:$0xf] }
 0x352   :  { %v5126_v24 = vadd.f32 %v5125_v16, %v5097_v44  ;;  %5627 = vmatpush.bf16.msra.mxu3 %v7079_v26  ;;  %v11192_v44 = vld [vmem:[#allocation60_spill] sm:$0xff]  ;;  %v6823_v16 = vor.u32 %v8825_v10, %v6820_v45 }
 0x354   :  { %5569 = vmatpush.bf16.msra.mxu1 %v6823_v16  ;;  %v8821_v16 = vld [vmem:[#allocation2 + $0x3ac] sm:$0xf] }
 0x356   :  { %v5154_v50 = vpop.f32.mrf.mxu2  ;;  %v5183_v43 = vpop.f32.mrf.mxu3 }
 0x357   :  { %v5155_v23 = vadd.f32 %v5154_v50, %v5126_v24  ;;  %v5099_v40 = vpop.f32.mrf.mxu0  ;;  %v5128_v30 = vpop.f32.mrf.mxu1  ;;  %v8853_v24 = vld [vmem:[#allocation2 + $0x4ac] sm:$0xf]  ;;  %v6679_v50 = vor.u32 %v8789_v25, %v6676_v34  ;;  %v6660_v34 = vld [vmem:[#allocation2 + $0x298] sm:$0xf0] }
 0x358   :  { %v5100_v56 = vadd.f32 %v5099_v40, %v10494_v59  ;;  %v6935_v59 = vor.u32 %v8853_v24, %v6932_v55 }
 0x359   :  { %v10527_v12 = vadd.f32 %v5183_v43, %v5155_v23  ;;  %v7063_v23 = vor.u32 %v8885_v41, %v7060_v8  ;;  %5541 = vmatpush.bf16.msra.mxu0 %v6679_v50  ;;  %v7044_v41 = vld [vmem:[#allocation2 + $0x598] sm:$0xf0] }
 0x35a   :  { %v5129_v51 = vadd.f32 %v5128_v30, %v5100_v56  ;;  %5330 = vmatmul.bf16.gmra.mxu0 %v11192_v44  ;;  %5359 = vmatmul.bf16.gmra.mxu1 %v11193_v42  ;;  %v6916_v42 = vld [vmem:[#allocation2 + $0x498] sm:$0xf0]  ;;  %v8785_v44 = vld [vmem:[#allocation2 + $0x28c] sm:$0xf] }
 0x35b   :  { %5388 = vmatmul.bf16.gmra.mxu2 %v11194_v17  ;;  %5417 = vmatmul.bf16.gmra.mxu3 %v11195_v35  ;;  %v6804_v35 = vld [vmem:[#allocation2 + $0x3b8] sm:$0xf0]  ;;  %v8849_v17 = vld [vmem:[#allocation2 + $0x48c] sm:$0xf] }
 0x35c   :  { %5599 = vmatpush.bf16.msra.mxu2 %v6935_v59  ;;  %5628 = vmatpush.bf16.msra.mxu3 %v7063_v23  ;;  %v6807_v55 = vor.u32 %v8821_v16, %v6804_v35  ;;  %v6919_v25 = vor.u32 %v8849_v17, %v6916_v42  ;;  %v6663_v59 = vor.u32 %v8785_v44, %v6660_v34  ;;  %v6788_v42 = vld [vmem:[#allocation2 + $0x398] sm:$0xf0]  ;;  %v11197_v44 = vld [vmem:[#allocation65_spill] sm:$0xff]  ;;  %v8781_v34 = vld [vmem:[#allocation2 + $0x26c] sm:$0xf] }
 0x35d   :  { %v11198_v16 = vld [vmem:[#allocation5_spill] sm:$0xff] }
 0x35e   :  { %v5157_v26 = vpop.f32.mrf.mxu2  ;;  %v5186_v40 = vpop.f32.mrf.mxu3  ;;  %5570 = vmatpush.bf16.msra.mxu1 %v6807_v55  ;;  %5542 = vmatpush.bf16.msra.mxu0 %v6663_v59  ;;  %v11199_v55 = vld [vmem:[#allocation6_spill] sm:$0xff]  ;;  %v7028_v59 = vld [vmem:[#allocation2 + $0x578] sm:$0xf0] }
 0x35f   :  { %v5158_v43 = vadd.f32 %v5157_v26, %v5129_v51  ;;  %v5101_v56 = vpop.f32.mrf.mxu0  ;;  %v5130_v10 = vpop.f32.mrf.mxu1  ;;  %v8881_v51 = vld [vmem:[#allocation2 + $0x58c] sm:$0xf] }
 0x360   :  { %v5102_v30 = vadd.f32 %v5101_v56, %v10497_v37  ;;  %v7047_v8 = vor.u32 %v8881_v51, %v7044_v41  ;;  %5600 = vmatpush.bf16.msra.mxu2 %v6919_v25  ;;  %v8817_v56 = vld [vmem:[#allocation2 + $0x38c] sm:$0xf]  ;;  %v6900_v25 = vld [vmem:[#allocation2 + $0x478] sm:$0xf0] }
 0x361   :  { %v10534_v45 = vadd.f32 %v5186_v40, %v5158_v43  ;;  %v6644_v51 = vld [vmem:[#allocation2 + $0x278] sm:$0xf0]  ;;  %v8877_v41 = vld [vmem:[#allocation2 + $0x56c] sm:$0xf] }
 0x362   :  { %v5131_v24 = vadd.f32 %v5130_v10, %v5102_v30  ;;  %5629 = vmatpush.bf16.msra.mxu3 %v7047_v8  ;;  %v11196_v30 = vld [vmem:[#allocation64_spill] sm:$0xff]  ;;  %v6791_v10 = vor.u32 %v8817_v56, %v6788_v42 }
 0x364   :  { %5571 = vmatpush.bf16.msra.mxu1 %v6791_v10  ;;  %v8813_v10 = vld [vmem:[#allocation2 + $0x36c] sm:$0xf] }
 0x366   :  { %v5159_v37 = vpop.f32.mrf.mxu2  ;;  %v5188_v50 = vpop.f32.mrf.mxu3 }
 0x367   :  { %v5160_v26 = vadd.f32 %v5159_v37, %v5131_v24  ;;  %v5200_v23 = vpop.f32.mrf.mxu0  ;;  %v5229_v35 = vpop.f32.mrf.mxu1  ;;  %v8845_v24 = vld [vmem:[#allocation2 + $0x46c] sm:$0xf]  ;;  %v6647_v37 = vor.u32 %v8781_v34, %v6644_v51  ;;  %v6628_v51 = vld [vmem:[#allocation2 + $0x258] sm:$0xf0] }
 0x368   :  { %v5201_v43 = vadd.f32 %v5200_v23, %v10504_v63  ;;  %v6903_v63 = vor.u32 %v8845_v24, %v6900_v25  ;;  %v8841_v25 = vld [vmem:[#allocation2 + $0x44c] sm:$0xf] }
 0x369   :  { %v10537_v40 = vadd.f32 %v5188_v50, %v5160_v26  ;;  %v7031_v26 = vor.u32 %v8877_v41, %v7028_v59  ;;  %5543 = vmatpush.bf16.msra.mxu0 %v6647_v37  ;;  %v7012_v41 = vld [vmem:[#allocation2 + $0x558] sm:$0xf0] }
 0x36a   :  { %v5230_v17 = vadd.f32 %v5229_v35, %v5201_v43  ;;  %5431 = vmatmul.bf16.vlgmr.msrb.gmra.mxu0 %v11196_v30  ;;  %5460 = vmatmul.bf16.vlgmr.msrb.gmra.mxu1 %v11197_v44  ;;  %v6884_v44 = vld [vmem:[#allocation2 + $0x458] sm:$0xf0]  ;;  %v8777_v30 = vld [vmem:[#allocation2 + $0x24c] sm:$0xf] }
 0x36b   :  { %5489 = vmatmul.bf16.vlgmr.msrb.gmra.mxu2 %v11198_v16  ;;  %5518 = vmatmul.bf16.vlgmr.msrb.gmra.mxu3 %v11199_v55  ;;  %v6772_v16 = vld [vmem:[#allocation2 + $0x378] sm:$0xf0]  ;;  %v6887_v34 = vor.u32 %v8841_v25, %v6884_v44  ;;  %v11203_v25 = vld [vmem:[#allocation10_spill] sm:$0xff] }
 0x36c   :  { %5601 = vmatpush.bf16.msra.mxu2 %v6903_v63  ;;  %5630 = vmatpush.bf16.msra.mxu3 %v7031_v26  ;;  %v6775_v24 = vor.u32 %v8813_v10, %v6772_v16  ;;  %v6631_v63 = vor.u32 %v8777_v30, %v6628_v51  ;;  %v6756_v44 = vld [vmem:[#allocation2 + $0x358] sm:$0xf0]  ;;  %v11200_v10 = vld [vmem:[#allocation66_spill] sm:$0xff]  ;;  %v11201_v30 = vld [vmem:[#allocation67_spill] sm:$0xff] }
 0x36d   :  { %v8773_v51 = vld [vmem:[#allocation2 + $0x22c] sm:$0xf] }
 0x36e   :  { %v5258_v8 = vpop.f32.mrf.mxu2  ;;  %v5287_v23 = vpop.f32.mrf.mxu3  ;;  %5572 = vmatpush.bf16.msra.mxu1 %v6775_v24  ;;  %5544 = vmatpush.bf16.msra.mxu0 %v6631_v63  ;;  %v11202_v24 = vld [vmem:[#allocation9_spill] sm:$0xff]  ;;  %v6996_v63 = vld [vmem:[#allocation2 + $0x538] sm:$0xf0] }
 0x36f   :  { %v5259_v50 = vadd.f32 %v5258_v8, %v5230_v17  ;;  %v5202_v43 = vpop.f32.mrf.mxu0  ;;  %v5231_v56 = vpop.f32.mrf.mxu1  ;;  %v8873_v17 = vld [vmem:[#allocation2 + $0x54c] sm:$0xf] }
 0x370   :  { %v5203_v35 = vadd.f32 %v5202_v43, %v10507_v4  ;;  %v7015_v59 = vor.u32 %v8873_v17, %v7012_v41  ;;  %5602 = vmatpush.bf16.msra.mxu2 %v6887_v34  ;;  %v6868_v34 = vld [vmem:[#allocation2 + $0x438] sm:$0xf0]  ;;  %v8869_v41 = vld [vmem:[#allocation2 + $0x52c] sm:$0xf] }
 0x371   :  { %v10544_v42 = vadd.f32 %v5287_v23, %v5259_v50  ;;  %v6612_v17 = vld [vmem:[#allocation2 + $0x238] sm:$0xf0] }
 0x372   :  { %v5232_v55 = vadd.f32 %v5231_v56, %v5203_v35  ;;  %5631 = vmatpush.bf16.msra.mxu3 %v7015_v59  ;;  %v8809_v35 = vld [vmem:[#allocation2 + $0x34c] sm:$0xf] }
 0x373   :  { %v6759_v16 = vor.u32 %v8809_v35, %v6756_v44 }
 0x375   :  { %5573 = vmatpush.bf16.msra.mxu1 %v6759_v16  ;;  %v8805_v16 = vld [vmem:[#allocation2 + $0x32c] sm:$0xf] }
 0x376   :  { %v5260_v4 = vpop.f32.mrf.mxu2  ;;  %v5289_v37 = vpop.f32.mrf.mxu3 }
 0x377   :  { %v5261_v8 = vadd.f32 %v5260_v4, %v5232_v55  ;;  %v5205_v26 = vpop.f32.mrf.mxu0  ;;  %v5234_v23 = vpop.f32.mrf.mxu1  ;;  %v8837_v55 = vld [vmem:[#allocation2 + $0x42c] sm:$0xf]  ;;  %v6615_v4 = vor.u32 %v8773_v51, %v6612_v17  ;;  %v6596_v17 = vld [vmem:[#allocation2 + $0x218] sm:$0xf0] }
 0x378   :  { %v5206_v50 = vadd.f32 %v5205_v26, %v10514_v46  ;;  %v6871_v46 = vor.u32 %v8837_v55, %v6868_v34  ;;  %v8833_v34 = vld [vmem:[#allocation2 + $0x40c] sm:$0xf] }
 0x379   :  { %v10547_v43 = vadd.f32 %v5289_v37, %v5261_v8  ;;  %v6999_v8 = vor.u32 %v8869_v41, %v6996_v63  ;;  %5545 = vmatpush.bf16.msra.mxu0 %v6615_v4  ;;  %v6980_v41 = vld [vmem:[#allocation2 + $0x518] sm:$0xf0] }
 0x37a   :  { %v5235_v56 = vadd.f32 %v5234_v23, %v5206_v50  ;;  %5436 = vmatmul.bf16.gmra.mxu0 %v11200_v10  ;;  %5465 = vmatmul.bf16.gmra.mxu1 %v11201_v30  ;;  %v6852_v30 = vld [vmem:[#allocation2 + $0x418] sm:$0xf0]  ;;  %v8769_v10 = vld [vmem:[#allocation2 + $0x20c] sm:$0xf] }
 0x37b   :  { %5494 = vmatmul.bf16.gmra.mxu2 %v11202_v24  ;;  %5523 = vmatmul.bf16.gmra.mxu3 %v11203_v25  ;;  %v6740_v24 = vld [vmem:[#allocation2 + $0x338] sm:$0xf0]  ;;  %v6855_v51 = vor.u32 %v8833_v34, %v6852_v30  ;;  %v11207_v34 = vld [vmem:[#allocation14_spill] sm:$0xff] }
 0x37c   :  { %5603 = vmatpush.bf16.msra.mxu2 %v6871_v46  ;;  %5632 = vmatpush.bf16.msra.mxu3 %v6999_v8  ;;  %v6743_v55 = vor.u32 %v8805_v16, %v6740_v24  ;;  %v6599_v46 = vor.u32 %v8769_v10, %v6596_v17  ;;  %v6724_v4 = vld [vmem:[#allocation2 + $0x318] sm:$0xf0]  ;;  %v11205_v10 = vld [vmem:[#allocation69_spill] sm:$0xff]  ;;  %v8925_v17 = vld [vmem:[#allocation2 + $0x6ec] sm:$0xf] }
 0x37d   :  { %v11204_v24 = vld [vmem:[#allocation68_spill] sm:$0xff] }
 0x37e   :  { %v5263_v59 = vpop.f32.mrf.mxu2  ;;  %v5292_v26 = vpop.f32.mrf.mxu3  ;;  %5574 = vmatpush.bf16.msra.mxu1 %v6743_v55  ;;  %5546 = vmatpush.bf16.msra.mxu0 %v6599_v46  ;;  %v11206_v55 = vld [vmem:[#allocation13_spill] sm:$0xff]  ;;  %v9021_v46 = vld [vmem:[#allocation2 + $0x9ec] sm:$0xf] }
 0x37f   :  { %v5264_v37 = vadd.f32 %v5263_v59, %v5235_v56  ;;  %v5207_v50 = vpop.f32.mrf.mxu0  ;;  %v5236_v35 = vpop.f32.mrf.mxu1  ;;  %v8865_v56 = vld [vmem:[#allocation2 + $0x50c] sm:$0xf] }
 0x380   :  { %v5208_v23 = vadd.f32 %v5207_v50, %v10517_v28  ;;  %v6983_v63 = vor.u32 %v8865_v56, %v6980_v41  ;;  %5604 = vmatpush.bf16.msra.mxu2 %v6855_v51  ;;  %v8801_v59 = vld [vmem:[#allocation2 + $0x30c] sm:$0xf]  ;;  %v7220_v41 = vld [vmem:[#allocation2 + $0x6f8] sm:$0xf0] }
 0x381   :  { %v10554_v44 = vadd.f32 %v5292_v26, %v5264_v37  ;;  %v6727_v50 = vor.u32 %v8801_v59, %v6724_v4  ;;  %v8989_v51 = vld [vmem:[#allocation2 + $0x8ec] sm:$0xf] }
 0x382   :  { %v5237_v25 = vadd.f32 %v5236_v35, %v5208_v23  ;;  %5633 = vmatpush.bf16.msra.mxu3 %v6983_v63 }
 0x383   :  { %5575 = vmatpush.bf16.msra.mxu1 %v6727_v50 }
 0x386   :  { %v5265_v28 = vpop.f32.mrf.mxu2  ;;  %v5294_v37 = vpop.f32.mrf.mxu3 }
 0x387   :  { %v5266_v8 = vadd.f32 %v5265_v28, %v5237_v25  ;;  %v5210_v26 = vpop.f32.mrf.mxu0  ;;  %v5239_v35 = vpop.f32.mrf.mxu1  ;;  %v7476_v25 = vld [vmem:[#allocation2 + $0x8f8] sm:$0xf0]  ;;  %v7223_v28 = vor.u32 %v8925_v17, %v7220_v41 }
 0x388   :  { %v5211_v23 = vadd.f32 %v5210_v26, %v10524_v22  ;;  %v7479_v56 = vor.u32 %v8989_v51, %v7476_v25  ;;  %v7604_v22 = vld [vmem:[#allocation2 + $0x9f8] sm:$0xf0]  ;;  %v8985_v25 = vld [vmem:[#allocation2 + $0x8cc] sm:$0xf] }
 0x389   :  { %v10557_v30 = vadd.f32 %v5294_v37, %v5266_v8  ;;  %v7607_v59 = vor.u32 %v9021_v46, %v7604_v22  ;;  %5655 = vmatpush.bf16.msrb.mxu0 %v7223_v28  ;;  %v7204_v41 = vld [vmem:[#allocation2 + $0x6d8] sm:$0xf0] }
 0x38a   :  { %v5240_v16 = vadd.f32 %v5239_v35, %v5211_v23  ;;  %5441 = vmatmul.bf16.gmra.mxu0 %v11204_v24  ;;  %5470 = vmatmul.bf16.gmra.mxu1 %v11205_v10  ;;  %v8957_v35 = vld [vmem:[#allocation2 + $0x7ec] sm:$0xf]  ;;  %v7460_v10 = vld [vmem:[#allocation2 + $0x8d8] sm:$0xf0] }
 0x38b   :  { %5499 = vmatmul.bf16.gmra.mxu2 %v11206_v55  ;;  %5528 = vmatmul.bf16.gmra.mxu3 %v11207_v34  ;;  %v7348_v55 = vld [vmem:[#allocation2 + $0x7f8] sm:$0xf0]  ;;  %v8921_v24 = vld [vmem:[#allocation2 + $0x6cc] sm:$0xf]  ;;  %v7463_v17 = vor.u32 %v8985_v25, %v7460_v10 }
 0x38c   :  { %5713 = vmatpush.bf16.msrb.mxu2 %v7479_v56  ;;  %5742 = vmatpush.bf16.msrb.mxu3 %v7607_v59  ;;  %v7351_v51 = vor.u32 %v8957_v35, %v7348_v55  ;;  %v7588_v46 = vld [vmem:[#allocation2 + $0x9d8] sm:$0xf0]  ;;  %v7207_v56 = vor.u32 %v8921_v24, %v7204_v41  ;;  %v11208_v35 = vld [vmem:[#allocation70_spill] sm:$0xff]  ;;  %v11209_v24 = vld [vmem:[#allocation71_spill] sm:$0xff] }
 0x38d   :  { %v7332_v10 = vld [vmem:[#allocation2 + $0x7d8] sm:$0xf0]  ;;  %v11211_v25 = vld [vmem:[#allocation18_spill] sm:$0xff] }
 0x38e   :  { %v5268_v63 = vpop.f32.mrf.mxu2  ;;  %v5297_v8 = vpop.f32.mrf.mxu3  ;;  %5684 = vmatpush.bf16.msrb.mxu1 %v7351_v51  ;;  %5656 = vmatpush.bf16.msrb.mxu0 %v7207_v56  ;;  %v11210_v51 = vld [vmem:[#allocation17_spill] sm:$0xff]  ;;  %v8917_v41 = vld [vmem:[#allocation2 + $0x6ac] sm:$0xf]  ;;  %v7572_v56 = vld [vmem:[#allocation2 + $0x9b8] sm:$0xf0] }
 0x38f   :  { %v5269_v4 = vadd.f32 %v5268_v63, %v5240_v16  ;;  %v5212_v37 = vpop.f32.mrf.mxu0  ;;  %v5241_v50 = vpop.f32.mrf.mxu1  ;;  %v9017_v16 = vld [vmem:[#allocation2 + $0x9cc] sm:$0xf] }
 0x390   :  { %v5213_v26 = vadd.f32 %v5212_v37, %v10527_v12  ;;  %v7591_v22 = vor.u32 %v9017_v16, %v7588_v46  ;;  %5714 = vmatpush.bf16.msrb.mxu2 %v7463_v17  ;;  %v7444_v17 = vld [vmem:[#allocation2 + $0x8b8] sm:$0xf0]  ;;  %v9013_v46 = vld [vmem:[#allocation2 + $0x9ac] sm:$0xf] }
 0x391   :  { %v10564_v23 = vadd.f32 %v5297_v8, %v5269_v4  ;;  %v7188_v16 = vld [vmem:[#allocation2 + $0x6b8] sm:$0xf0] }
 0x392   :  { %v5242_v34 = vadd.f32 %v5241_v50, %v5213_v26  ;;  %5743 = vmatpush.bf16.msrb.mxu3 %v7591_v22  ;;  %v8953_v26 = vld [vmem:[#allocation2 + $0x7cc] sm:$0xf] }
 0x393   :  { %v7335_v55 = vor.u32 %v8953_v26, %v7332_v10 }
 0x395   :  { %5685 = vmatpush.bf16.msrb.mxu1 %v7335_v55  ;;  %v8949_v55 = vld [vmem:[#allocation2 + $0x7ac] sm:$0xf] }
 0x396   :  { %v5270_v12 = vpop.f32.mrf.mxu2  ;;  %v5299_v28 = vpop.f32.mrf.mxu3 }
 0x397   :  { %v5271_v63 = vadd.f32 %v5270_v12, %v5242_v34  ;;  %v5215_v59 = vpop.f32.mrf.mxu0  ;;  %v5244_v8 = vpop.f32.mrf.mxu1  ;;  %v8981_v34 = vld [vmem:[#allocation2 + $0x8ac] sm:$0xf]  ;;  %v7191_v12 = vor.u32 %v8917_v41, %v7188_v16  ;;  %v7172_v16 = vld [vmem:[#allocation2 + $0x698] sm:$0xf0] }
 0x398   :  { %v5216_v4 = vadd.f32 %v5215_v59, %v10534_v45  ;;  %v7447_v45 = vor.u32 %v8981_v34, %v7444_v17  ;;  %v8977_v17 = vld [vmem:[#allocation2 + $0x88c] sm:$0xf] }
 0x399   :  { %v10567_v37 = vadd.f32 %v5299_v28, %v5271_v63  ;;  %v7575_v63 = vor.u32 %v9013_v46, %v7572_v56  ;;  %5657 = vmatpush.bf16.msrb.mxu0 %v7191_v12  ;;  %v7556_v46 = vld [vmem:[#allocation2 + $0x998] sm:$0xf0] }
 0x39a   :  { %v5245_v50 = vadd.f32 %v5244_v8, %v5216_v4  ;;  %5446 = vmatmul.bf16.gmra.mxu0 %v11208_v35  ;;  %5475 = vmatmul.bf16.gmra.mxu1 %v11209_v24  ;;  %v7428_v24 = vld [vmem:[#allocation2 + $0x898] sm:$0xf0]  ;;  %v8913_v35 = vld [vmem:[#allocation2 + $0x68c] sm:$0xf] }
 0x39b   :  { %5504 = vmatmul.bf16.gmra.mxu2 %v11210_v51  ;;  %5533 = vmatmul.bf16.gmra.mxu3 %v11211_v25  ;;  %v7316_v51 = vld [vmem:[#allocation2 + $0x7b8] sm:$0xf0]  ;;  %v7431_v41 = vor.u32 %v8977_v17, %v7428_v24 }
 0x39c   :  { %5715 = vmatpush.bf16.msrb.mxu2 %v7447_v45  ;;  %5744 = vmatpush.bf16.msrb.mxu3 %v7575_v63  ;;  %v7319_v34 = vor.u32 %v8949_v55, %v7316_v51  ;;  %v7175_v45 = vor.u32 %v8913_v35, %v7172_v16  ;;  %v7300_v24 = vld [vmem:[#allocation2 + $0x798] sm:$0xf0]  ;;  %v8973_v35 = vld [vmem:[#allocation2 + $0x86c] sm:$0xf] }
 0x39d   :  { %v11213_v55 = vld [vmem:[#allocation8_spill] sm:$0xff] }
 0x39e   :  { %v5273_v22 = vpop.f32.mrf.mxu2  ;;  %v5302_v59 = vpop.f32.mrf.mxu3  ;;  %5686 = vmatpush.bf16.msrb.mxu1 %v7319_v34  ;;  %5658 = vmatpush.bf16.msrb.mxu0 %v7175_v45  ;;  %v7412_v51 = vld [vmem:[#allocation2 + $0x878] sm:$0xf0] }
 0x39f   :  { %v5274_v28 = vadd.f32 %v5273_v22, %v5245_v50  ;;  %v5217_v4 = vpop.f32.mrf.mxu0  ;;  %v5246_v26 = vpop.f32.mrf.mxu1  ;;  %v9009_v50 = vld [vmem:[#allocation2 + $0x98c] sm:$0xf]  ;;  %v7415_v34 = vor.u32 %v8973_v35, %v7412_v51  ;;  %v7156_v17 = vld [vmem:[#allocation2 + $0x678] sm:$0xf0] }
 0x3a0   :  { %v5218_v8 = vadd.f32 %v5217_v4, %v10537_v40  ;;  %v7559_v56 = vor.u32 %v9009_v50, %v7556_v46  ;;  %5716 = vmatpush.bf16.msrb.mxu2 %v7431_v41  ;;  %v8945_v4 = vld [vmem:[#allocation2 + $0x78c] sm:$0xf]  ;;  %v7540_v16 = vld [vmem:[#allocation2 + $0x978] sm:$0xf0] }
 0x3a1   :  { %v10574_v10 = vadd.f32 %v5302_v59, %v5274_v28  ;;  %v9005_v41 = vld [vmem:[#allocation2 + $0x96c] sm:$0xf]  ;;  %v7524_v51 = vld [vmem:[#allocation2 + $0x958] sm:$0xf0] }
 0x3a2   :  { %v5247_v25 = vadd.f32 %v5246_v26, %v5218_v8  ;;  %5745 = vmatpush.bf16.msrb.mxu3 %v7559_v56  ;;  %v11212_v8 = vld [vmem:[#allocation7_spill] sm:$0xff]  ;;  %v7303_v26 = vor.u32 %v8945_v4, %v7300_v24  ;;  %v7543_v45 = vor.u32 %v9005_v41, %v7540_v16  ;;  %v8969_v4 = vld [vmem:[#allocation2 + $0x84c] sm:$0xf]  ;;  %v7396_v24 = vld [vmem:[#allocation2 + $0x858] sm:$0xf0] }
 0x3a3   :  { %v9001_v35 = vld [vmem:[#allocation2 + $0x94c] sm:$0xf] }
 0x3a4   :  { %5687 = vmatpush.bf16.msrb.mxu1 %v7303_v26  ;;  %5717 = vmatpush.bf16.msrb.mxu2 %v7415_v34  ;;  %v7399_v26 = vor.u32 %v8969_v4, %v7396_v24  ;;  %v11215_v24 = vld [vmem:[#allocation12_spill] sm:$0xff] }
 0x3a6   :  { %v5275_v40 = vpop.f32.mrf.mxu2  ;;  %v5304_v12 = vpop.f32.mrf.mxu3  ;;  %5746 = vmatpush.bf16.msrb.mxu3 %v7543_v45  ;;  %v8937_v45 = vld [vmem:[#allocation2 + $0x74c] sm:$0xf] }
 0x3a7   :  { %v5276_v22 = vadd.f32 %v5275_v40, %v5247_v25  ;;  %v10576_v63 = vpop.f32.mrf.mxu0  ;;  %v10578_v28 = vpop.f32.mrf.mxu1  ;;  %v8909_v25 = vld [vmem:[#allocation2 + $0x66c] sm:$0xf] }
 0x3a8   :  { %v7159_v46 = vor.u32 %v8909_v25, %v7156_v17  ;;  %v7527_v17 = vor.u32 %v9001_v35, %v7524_v51  ;;  %5718 = vmatpush.bf16.msrb.mxu2 %v7399_v26  ;;  %v8901_v26 = vld [vmem:[#allocation2 + $0x62c] sm:$0xf]  ;;  %v7124_v35 = vld [vmem:[#allocation2 + $0x638] sm:$0xf0] }
 0x3a9   :  { %v10580_v59 = vadd.f32 %v5304_v12, %v5276_v22  ;;  %v7284_v22 = vld [vmem:[#allocation2 + $0x778] sm:$0xf0]  ;;  %v8997_v51 = vld [vmem:[#allocation2 + $0x92c] sm:$0xf]  ;;  %v7127_v20 = vor.u32 %v8901_v26, %v7124_v35 }
 0x3aa   :  { %5547 = vmatmul.bf16.vlgmr.msra.gmra.mxu0 %v11212_v8  ;;  %5576 = vmatmul.bf16.vlgmr.msra.gmra.mxu1 %v11213_v55  ;;  %v8905_v8 = vld [vmem:[#allocation2 + $0x64c] sm:$0xf]  ;;  %v7140_v55 = vld [vmem:[#allocation2 + $0x658] sm:$0xf0] }
 0x3ab   :  { %5605 = vmatmul.bf16.vlgmr.msra.gmra.mxu2 %v11159_v1  ;;  %5634 = vmatmul.bf16.vlgmr.msra.gmra.mxu3 %v11160_v36  ;;  %v8941_v36 = vld [vmem:[#allocation2 + $0x76c] sm:$0xf]  ;;  %v7143_v25 = vor.u32 %v8905_v8, %v7140_v55  ;;  %v7380_v8 = vld [vmem:[#allocation2 + $0x838] sm:$0xf0] }
 0x3ac   :  { %5659 = vmatpush.bf16.msrb.mxu0 %v7159_v46  ;;  %v7287_v12 = vor.u32 %v8941_v36, %v7284_v22  ;;  %5747 = vmatpush.bf16.msrb.mxu3 %v7527_v17  ;;  %v7268_v36 = vld [vmem:[#allocation2 + $0x758] sm:$0xf0]  ;;  %v11214_v22 = vld [vmem:[#allocation11_spill] sm:$0xff] }
 0x3ad   :  { %v7271_v4 = vor.u32 %v8937_v45, %v7268_v36  ;;  %v7252_v36 = vld [vmem:[#allocation2 + $0x738] sm:$0xf0] }
 0x3ae   :  { %v10586_v50 = vpop.f32.mrf.mxu2  ;;  %v10588_v56 = vpop.f32.mrf.mxu3  ;;  %5688 = vmatpush.bf16.msrb.mxu1 %v7287_v12  ;;  %v8965_v12 = vld [vmem:[#allocation2 + $0x82c] sm:$0xf]  ;;  %v7492_v26 = vld [vmem:[#allocation2 + $0x918] sm:$0xf0] }
 0x3af   :  { %v10590_v40 = vpop.f32.mrf.mxu0  ;;  %v10592_v1 = vpop.f32.mrf.mxu1  ;;  %v7383_v55 = vor.u32 %v8965_v12, %v7380_v8  ;;  %v7364_v12 = vld [vmem:[#allocation2 + $0x818] sm:$0xf0]  ;;  %v8897_v8 = vld [vmem:[#allocation2 + $0x60c] sm:$0xf] }
 0x3b0   :  { %5660 = vmatpush.bf16.msrb.mxu0 %v7143_v25  ;;  %v7508_v25 = vld [vmem:[#allocation2 + $0x938] sm:$0xf0]  ;;  %v7111_v35 = vor.u32 %v8897_v8, %v7108_v3  ;;  %v9117_v3 = vld [vmem:[#allocation2 + $0xcec] sm:$0xf] }
 0x3b1   :  { %v7511_v53 = vor.u32 %v8997_v51, %v7508_v25  ;;  %5719 = vmatpush.bf16.msrb.mxu2 %v7383_v55  ;;  %v7495_v51 = vor.u32 %v8993_v21, %v7492_v26  ;;  %v9053_v21 = vld [vmem:[#allocation2 + $0xaec] sm:$0xf]  ;;  %v7732_v8 = vld [vmem:[#allocation2 + $0xaf8] sm:$0xf0] }
 0x3b2   :  { %5689 = vmatpush.bf16.msrb.mxu1 %v7271_v4  ;;  %v9149_v26 = vld [vmem:[#allocation2 + $0xdec] sm:$0xf] }
 0x3b3   :  { %5748 = vmatpush.bf16.msrb.mxu3 %v7511_v53  ;;  %v7236_v53 = vld [vmem:[#allocation2 + $0x718] sm:$0xf0] }
 0x3b4   :  { %5661 = vmatpush.bf16.msrb.mxu0 %v7127_v20  ;;  %v8929_v20 = vld [vmem:[#allocation2 + $0x70c] sm:$0xf] }
 0x3b6   :  { %v10594_v41 = vpop.f32.mrf.mxu2  ;;  %v10596_v34 = vpop.f32.mrf.mxu3 }
 0x3b7   :  { %v10598_v16 = vpop.f32.mrf.mxu0  ;;  %v10600_v46 = vpop.f32.mrf.mxu1  ;;  %5749 = vmatpush.bf16.msrb.mxu3 %v7495_v51 }
 0x3b8   :  { %5662 = vmatpush.bf16.msrb.mxu0 %v7111_v35  ;;  %v8116_v35 = vld [vmem:[#allocation2 + $0xdf8] sm:$0xf0] }
 0x3ba   :  { %5552 = vmatmul.bf16.gmra.mxu0 %v11214_v22  ;;  %5581 = vmatmul.bf16.gmra.mxu1 %v11215_v24  ;;  %v8961_v24 = vld [vmem:[#allocation2 + $0x80c] sm:$0xf] }
 0x3bb   :  { %5610 = vmatmul.bf16.gmra.mxu2 %v11161_v52  ;;  %5639 = vmatmul.bf16.gmra.mxu3 %v11162_v14  ;;  %v8933_v14 = vld [vmem:[#allocation2 + $0x72c] sm:$0xf]  ;;  %v7367_v61 = vor.u32 %v8961_v24, %v7364_v12  ;;  %v11216_v24 = vld [vmem:[#allocation15_spill] sm:$0xff] }
 0x3bc   :  { %v7255_v4 = vor.u32 %v8933_v14, %v7252_v36  ;;  %v7239_v36 = vor.u32 %v8929_v20, %v7236_v53  ;;  %v7735_v20 = vor.u32 %v9053_v21, %v7732_v8  ;;  %v8119_v53 = vor.u32 %v9149_v26, %v8116_v35  ;;  %v9145_v21 = vld [vmem:[#allocation2 + $0xdcc] sm:$0xf]  ;;  %v8100_v8 = vld [vmem:[#allocation2 + $0xdd8] sm:$0xf0] }
 0x3bd   :  { %5720 = vmatpush.bf16.msrb.mxu2 %v7367_v61  ;;  %v7988_v61 = vld [vmem:[#allocation2 + $0xcf8] sm:$0xf0]  ;;  %v7719_v35 = vor.u32 %v9049_v54, %v7716_v0  ;;  %v8103_v60 = vor.u32 %v9145_v21, %v8100_v8  ;;  %v5317_v54 = vadd.f32 %v10576_v63, %v10544_v42  ;;  %v9109_v0 = vld [vmem:[#allocation2 + $0xcac] sm:$0xf] }
 0x3be   :  { %v10606_v17 = vpop.f32.mrf.mxu2  ;;  %v10608_v22 = vpop.f32.mrf.mxu3  ;;  %5690 = vmatpush.bf16.msrb.mxu1 %v7255_v4  ;;  %v11217_v4 = vld [vmem:[#allocation16_spill] sm:$0xff]  ;;  %v7991_v12 = vor.u32 %v9117_v3, %v7988_v61  ;;  %5771 = vmatpush.bf16.msra.mxu0 %v7735_v20  ;;  %v9113_v3 = vld [vmem:[#allocation2 + $0xccc] sm:$0xf] }
 0x3bf   :  { %v10610_v45 = vpop.f32.mrf.mxu0  ;;  %v10612_v52 = vpop.f32.mrf.mxu1  ;;  %5858 = vmatpush.bf16.msra.mxu3 %v8119_v53  ;;  %v7972_v61 = vld [vmem:[#allocation2 + $0xcd8] sm:$0xf0]  ;;  %v9141_v8 = vld [vmem:[#allocation2 + $0xdac] sm:$0xf]  ;;  %v5346_v42 = vadd.f32 %v10578_v28, %v5317_v54 }
 0x3c0   :  { %v7975_v48 = vor.u32 %v9113_v3, %v7972_v61  ;;  %v7844_v53 = vld [vmem:[#allocation2 + $0xbd8] sm:$0xf0]  ;;  %v9045_v61 = vld [vmem:[#allocation2 + $0xaac] sm:$0xf] }
 0x3c1   :  { %5829 = vmatpush.bf16.msra.mxu2 %v7991_v12  ;;  %v11219_v3 = vld [vmem:[#allocation20_spill] sm:$0xff]  ;;  %v9077_v63 = vld [vmem:[#allocation2 + $0xbac] sm:$0xf] }
 0x3c2   :  { %5691 = vmatpush.bf16.msrb.mxu1 %v7239_v36  ;;  %5772 = vmatpush.bf16.msra.mxu0 %v7719_v35  ;;  %v8084_v35 = vld [vmem:[#allocation2 + $0xdb8] sm:$0xf0] }
 0x3c3   :  { %5859 = vmatpush.bf16.msra.mxu3 %v8103_v60  ;;  %v7700_v60 = vld [vmem:[#allocation2 + $0xab8] sm:$0xf0] }
 0x3c4   :  { %v8068_v28 = vld [vmem:[#allocation2 + $0xd98] sm:$0xf0] }
 0x3c5   :  { %5830 = vmatpush.bf16.msra.mxu2 %v7975_v48  ;;  %v7956_v48 = vld [vmem:[#allocation2 + $0xcb8] sm:$0xf0]  ;;  %v8071_v32 = vor.u32 %v9137_v13, %v8068_v28  ;;  %v5322_v13 = vadd.f32 %v10598_v16, %v10554_v44 }
 0x3c6   :  { %v10614_v25 = vpop.f32.mrf.mxu2  ;;  %v10616_v55 = vpop.f32.mrf.mxu3  ;;  %v7959_v21 = vor.u32 %v9109_v0, %v7956_v48  ;;  %v5375_v48 = vadd.f32 %v10586_v50, %v5346_v42  ;;  %v8052_v28 = vld [vmem:[#allocation2 + $0xd78] sm:$0xf0] }
 0x3c7   :  { %v10618_v14 = vpop.f32.mrf.mxu0  ;;  %v10620_v33 = vpop.f32.mrf.mxu1 }
 0x3c8   :  { %v5404_v54 = vadd.f32 %v10588_v56, %v5375_v48  ;;  %v11220_v48 = vld [vmem:[#allocation23_spill] sm:$0xff] }
 0x3c9   :  { %5831 = vmatpush.bf16.msra.mxu2 %v7959_v21  ;;  %v7684_v21 = vld [vmem:[#allocation2 + $0xa98] sm:$0xf0] }
 0x3ca   :  { %5557 = vmatmul.bf16.gmra.mxu0 %v11216_v24  ;;  %5586 = vmatmul.bf16.gmra.mxu1 %v11217_v4 }
 0x3cb   :  { %5615 = vmatmul.bf16.gmra.mxu2 %v11163_v62  ;;  %5644 = vmatmul.bf16.gmra.mxu3 %v11164_v6  ;;  %v9085_v62 = vld [vmem:[#allocation2 + $0xbec] sm:$0xf]  ;;  %v7860_v6 = vld [vmem:[#allocation2 + $0xbf8] sm:$0xf0] }
 0x3cc   :  { %v7863_v39 = vor.u32 %v9085_v62, %v7860_v6  ;;  %v11218_v6 = vld [vmem:[#allocation19_spill] sm:$0xff] }
 0x3ce   :  { %v10626_v51 = vpop.f32.mrf.mxu2  ;;  %v10628_v36 = vpop.f32.mrf.mxu3  ;;  %5800 = vmatpush.bf16.msra.mxu1 %v7863_v39  ;;  %v9081_v39 = vld [vmem:[#allocation2 + $0xbcc] sm:$0xf] }
 0x3cf   :  { %v10630_v24 = vpop.f32.mrf.mxu0  ;;  %v10632_v4 = vpop.f32.mrf.mxu1  ;;  %v7847_v62 = vor.u32 %v9081_v39, %v7844_v53  ;;  %v7703_v53 = vor.u32 %v9045_v61, %v7700_v60  ;;  %v5319_v61 = vadd.f32 %v10590_v40, %v10547_v43  ;;  %v9105_v60 = vld [vmem:[#allocation2 + $0xc8c] sm:$0xf] }
 0x3d1   :  { %5773 = vmatpush.bf16.msra.mxu0 %v7703_v53  ;;  %v5348_v42 = vadd.f32 %v10592_v1, %v5319_v61  ;;  %v7668_v61 = vld [vmem:[#allocation2 + $0xa78] sm:$0xf0] }
 0x3d2   :  { %5801 = vmatpush.bf16.msra.mxu1 %v7847_v62  ;;  %v7828_v62 = vld [vmem:[#allocation2 + $0xbb8] sm:$0xf0] }
 0x3d3   :  { %v7831_v0 = vor.u32 %v9077_v63, %v7828_v62  ;;  %v9073_v62 = vld [vmem:[#allocation2 + $0xb8c] sm:$0xf] }
 0x3d6   :  { %v10634_v26 = vpop.f32.mrf.mxu2  ;;  %v10636_v12 = vpop.f32.mrf.mxu3  ;;  %5802 = vmatpush.bf16.msra.mxu1 %v7831_v0  ;;  %v7812_v0 = vld [vmem:[#allocation2 + $0xb98] sm:$0xf0] }
 0x3d7   :  { %v10638_v57 = vpop.f32.mrf.mxu0  ;;  %v10640_v20 = vpop.f32.mrf.mxu1 }
 0x3da   :  { %5562 = vmatmul.bf16.gmra.mxu0 %v11218_v6  ;;  %5591 = vmatmul.bf16.gmra.mxu1 %v11219_v3  ;;  %v8087_v6 = vor.u32 %v9141_v8, %v8084_v35  ;;  %v7940_v8 = vld [vmem:[#allocation2 + $0xc98] sm:$0xf0]  ;;  %v9041_v35 = vld [vmem:[#allocation2 + $0xa8c] sm:$0xf] }
 0x3db   :  { %5620 = vmatmul.bf16.gmra.mxu2 %v11165_v27  ;;  %5649 = vmatmul.bf16.gmra.mxu3 %v11166_v9  ;;  %v7943_v15 = vor.u32 %v9105_v60, %v7940_v8  ;;  %v7815_v60 = vor.u32 %v9073_v62, %v7812_v0  ;;  %v5377_v8 = vadd.f32 %v10594_v41, %v5348_v42  ;;  %v9037_v41 = vld [vmem:[#allocation2 + $0xa6c] sm:$0xf] }
 0x3dc   :  { %5860 = vmatpush.bf16.msra.mxu3 %v8087_v6  ;;  %v7687_v6 = vor.u32 %v9041_v35, %v7684_v21 }
 0x3dd   :  { %5832 = vmatpush.bf16.msra.mxu2 %v7943_v15  ;;  %5803 = vmatpush.bf16.msra.mxu1 %v7815_v60  ;;  %v7924_v15 = vld [vmem:[#allocation2 + $0xc78] sm:$0xf0]  ;;  %v5406_v35 = vadd.f32 %v10596_v34, %v5377_v8  ;;  %v5324_v60 = vadd.f32 %v10610_v45, %v10557_v30 }
 0x3de   :  { %v10648_v39 = vpop.f32.mrf.mxu2  ;;  %v10650_v3 = vpop.f32.mrf.mxu3  ;;  %5774 = vmatpush.bf16.msra.mxu0 %v7687_v6  ;;  %v5351_v6 = vadd.f32 %v10600_v46, %v5322_v13  ;;  %v9097_v46 = vld [vmem:[#allocation2 + $0xc4c] sm:$0xf]  ;;  %v7908_v8 = vld [vmem:[#allocation2 + $0xc58] sm:$0xf0] }
 0x3df   :  { %v10652_v27 = vpop.f32.mrf.mxu0  ;;  %v10655_v9 = vpop.f32.mrf.mxu1  ;;  %v7652_v13 = vld [vmem:[#allocation2 + $0xa58] sm:$0xf0]  ;;  %v5353_v30 = vadd.f32 %v10612_v52, %v5324_v60  ;;  %v5327_v52 = vadd.f32 %v10618_v14, %v10564_v23 }
 0x3e0   :  { %5861 = vmatpush.bf16.msra.mxu3 %v8071_v32  ;;  %v9101_v32 = vld [vmem:[#allocation2 + $0xc6c] sm:$0xf]  ;;  %v5380_v34 = vadd.f32 %v10606_v17, %v5351_v6  ;;  %v8036_v17 = vld [vmem:[#allocation2 + $0xd58] sm:$0xf0] }
 0x3e1   :  { %v7927_v1 = vor.u32 %v9101_v32, %v7924_v15  ;;  %v9129_v32 = vld [vmem:[#allocation2 + $0xd4c] sm:$0xf] }
 0x3e2   :  { %v5409_v15 = vadd.f32 %v10608_v22, %v5380_v34  ;;  %v5382_v22 = vadd.f32 %v10614_v25, %v5353_v30  ;;  %v9093_v6 = vld [vmem:[#allocation2 + $0xc2c] sm:$0xf] }
 0x3e3   :  { %5833 = vmatpush.bf16.msra.mxu2 %v7927_v1 }
 0x3e6   :  { %v10661_v53 = vpop.f32.mrf.mxu2  ;;  %v10663_v63 = vpop.f32.mrf.mxu3 }
 0x3e7   :  { %v5432_v50 = vpop.f32.mrf.mxu0  ;;  %v5461_v40 = vpop.f32.mrf.mxu1 }
 0x3e8   :  { %v5433_v43 = vadd.f32 %v5432_v50, %v5404_v54 }
 0x3ea   :  { %v5462_v56 = vadd.f32 %v5461_v40, %v5433_v43  ;;  %5663 = vmatmul.bf16.vlgmr.msrb.gmra.mxu0 %v9502_v2  ;;  %5692 = vmatmul.bf16.vlgmr.msrb.gmra.mxu1 %v11220_v48  ;;  %v9133_v2 = vld [vmem:[#allocation2 + $0xd6c] sm:$0xf]  ;;  %v7796_v40 = vld [vmem:[#allocation2 + $0xb78] sm:$0xf0] }
 0x3eb   :  { %5721 = vmatmul.bf16.vlgmr.msrb.gmra.mxu2 %v9642_v29  ;;  %5750 = vmatmul.bf16.vlgmr.msrb.gmra.mxu3 %v9644_v31  ;;  %v7671_v29 = vor.u32 %v9037_v41, %v7668_v61  ;;  %v8055_v16 = vor.u32 %v9133_v2, %v8052_v28  ;;  %v9069_v43 = vld [vmem:[#allocation2 + $0xb6c] sm:$0xf] }
 0x3ec   :  { %6005 = vst [vmem:[%s10904_s2 + $0x10] sm:$0xff] %v5462_v56  ;;  %v7799_v62 = vor.u32 %v9069_v43, %v7796_v40  ;;  %v7911_v56 = vor.u32 %v9097_v46, %v7908_v8  ;;  %v9033_v48 = vld [vmem:[#allocation2 + $0xa4c] sm:$0xf]  ;;  %v7636_v43 = vld [vmem:[#allocation2 + $0xa38] sm:$0xf0] }
 0x3ed   :  { %5775 = vmatpush.bf16.msra.mxu0 %v7671_v29  ;;  %5862 = vmatpush.bf16.msra.mxu3 %v8055_v16  ;;  %v7655_v41 = vor.u32 %v9033_v48, %v7652_v13  ;;  %v9065_v28 = vld [vmem:[#allocation2 + $0xb4c] sm:$0xf] }
 0x3ee   :  { %v5490_v21 = vpop.f32.mrf.mxu2  ;;  %v5519_v54 = vpop.f32.mrf.mxu3  ;;  %5804 = vmatpush.bf16.msra.mxu1 %v7799_v62  ;;  %5834 = vmatpush.bf16.msra.mxu2 %v7911_v56  ;;  %v8020_v62 = vld [vmem:[#allocation2 + $0xd38] sm:$0xf0]  ;;  %v9061_v8 = vld [vmem:[#allocation2 + $0xb2c] sm:$0xf] }
 0x3ef   :  { %v5434_v44 = vpop.f32.mrf.mxu0  ;;  %v10678_v50 = vadd.f32 %v5519_v54, %v5490_v21  ;;  %v5463_v42 = vpop.f32.mrf.mxu1  ;;  %v7780_v54 = vld [vmem:[#allocation2 + $0xb58] sm:$0xf0] }
 0x3f0   :  { %v5435_v31 = vadd.f32 %v5434_v44, %v5406_v35  ;;  %v8039_v35 = vor.u32 %v9129_v32, %v8036_v17  ;;  %v7783_v44 = vor.u32 %v9065_v28, %v7780_v54  ;;  %v7764_v56 = vld [vmem:[#allocation2 + $0xb38] sm:$0xf0]  ;;  %v5329_v32 = vadd.f32 %v10630_v24, %v10567_v37 }
 0x3f1   :  { %5776 = vmatpush.bf16.msra.mxu0 %v7655_v41  ;;  %v7767_v48 = vor.u32 %v9061_v8, %v7764_v56  ;;  %v9025_v41 = vld [vmem:[#allocation2 + $0xa0c] sm:$0xf]  ;;  %v7620_v17 = vld [vmem:[#allocation2 + $0xa18] sm:$0xf0] }
 0x3f2   :  { %v5464_v0 = vadd.f32 %v5463_v42, %v5435_v31  ;;  %5863 = vmatpush.bf16.msra.mxu3 %v8039_v35  ;;  %5805 = vmatpush.bf16.msra.mxu1 %v7783_v44  ;;  %v7892_v31 = vld [vmem:[#allocation2 + $0xc38] sm:$0xf0]  ;;  %v9029_v42 = vld [vmem:[#allocation2 + $0xa2c] sm:$0xf]  ;;  %v7623_v30 = vor.u32 %v9025_v41, %v7620_v17  ;;  %v5358_v44 = vadd.f32 %v10632_v4, %v5329_v32 }
 0x3f3   :  { %v7895_v25 = vor.u32 %v9093_v6, %v7892_v31  ;;  %v5332_v31 = vadd.f32 %v10638_v57, %v10574_v10  ;;  %v9245_v4 = vld [vmem:[#allocation2 + $0x10ec] sm:$0xf]  ;;  %v8484_v8 = vld [vmem:[#allocation2 + $0x10d8] sm:$0xf0] }
 0x3f4   :  { %6009 = vst [vmem:[%s10904_s2 + $0x30] sm:$0xff] %v5464_v0  ;;  %v5356_v0 = vadd.f32 %v10620_v33, %v5327_v52  ;;  %v9089_v33 = vld [vmem:[#allocation2 + $0xc0c] sm:$0xf]  ;;  %v8612_v32 = vld [vmem:[#allocation2 + $0x11d8] sm:$0xf0] }
 0x3f5   :  { %5835 = vmatpush.bf16.msra.mxu2 %v7895_v25  ;;  %v8500_v25 = vld [vmem:[#allocation2 + $0x10f8] sm:$0xf0]  ;;  %v5361_v10 = vadd.f32 %v10640_v20, %v5332_v31  ;;  %v9177_v56 = vld [vmem:[#allocation2 + $0xecc] sm:$0xf]  ;;  %v5334_v20 = vadd.f32 %v10652_v27, %v10580_v59 }
 0x3f6   :  { %v5492_v1 = vpop.f32.mrf.mxu2  ;;  %v5521_v61 = vpop.f32.mrf.mxu3  ;;  %5806 = vmatpush.bf16.msra.mxu1 %v7767_v48 }
 0x3f7   :  { %v5437_v2 = vpop.f32.mrf.mxu0  ;;  %v10688_v45 = vadd.f32 %v5521_v61, %v5492_v1  ;;  %v5466_v29 = vpop.f32.mrf.mxu1  ;;  %v9121_v61 = vld [vmem:[#allocation2 + $0xd0c] sm:$0xf] }
 0x3f8   :  { %v5438_v21 = vadd.f32 %v5437_v2, %v5409_v15  ;;  %v7876_v15 = vld [vmem:[#allocation2 + $0xc18] sm:$0xf0] }
 0x3f9   :  { %v7879_v1 = vor.u32 %v9089_v33, %v7876_v15 }
 0x3fa   :  { %v5467_v16 = vadd.f32 %v5466_v29, %v5438_v21  ;;  %5668 = vmatmul.bf16.gmra.mxu0 %v9538_v47  ;;  %5697 = vmatmul.bf16.gmra.mxu1 %v9540_v49  ;;  %v9125_v47 = vld [vmem:[#allocation2 + $0xd2c] sm:$0xf]  ;;  %v5411_v49 = vadd.f32 %v10616_v55, %v5382_v22  ;;  %v5385_v55 = vadd.f32 %v10626_v51, %v5356_v0  ;;  %v8004_v51 = vld [vmem:[#allocation2 + $0xd18] sm:$0xf0] }
 0x3fb   :  { %5726 = vmatmul.bf16.gmra.mxu2 %v11168_v11  ;;  %5755 = vmatmul.bf16.gmra.mxu3 %v11169_v5  ;;  %v7639_v11 = vor.u32 %v9029_v42, %v7636_v43  ;;  %v8023_v14 = vor.u32 %v9125_v47, %v8020_v62  ;;  %v9057_v21 = vld [vmem:[#allocation2 + $0xb0c] sm:$0xf]  ;;  %v7748_v29 = vld [vmem:[#allocation2 + $0xb18] sm:$0xf0]  ;;  %v8007_v37 = vor.u32 %v9121_v61, %v8004_v51 }
 0x3fc   :  { %6013 = vst [vmem:[%s10904_s2 + $0x50] sm:$0xff] %v5467_v16  ;;  %v5414_v2 = vadd.f32 %v10628_v36, %v5385_v55  ;;  %5836 = vmatpush.bf16.msra.mxu2 %v7879_v1  ;;  %v7751_v24 = vor.u32 %v9057_v21, %v7748_v29  ;;  %v5387_v36 = vadd.f32 %v10634_v26, %v5358_v44  ;;  %v9181_v26 = vld [vmem:[#allocation2 + $0xeec] sm:$0xf]  ;;  %v8244_v43 = vld [vmem:[#allocation2 + $0xef8] sm:$0xf0] }
 0x3fd   :  { %5777 = vmatpush.bf16.msra.mxu0 %v7639_v11  ;;  %5864 = vmatpush.bf16.msra.mxu3 %v8023_v14  ;;  %v8503_v42 = vor.u32 %v9245_v4, %v8500_v25  ;;  %v9277_v47 = vld [vmem:[#allocation2 + $0x11ec] sm:$0xf]  ;;  %v8372_v14 = vld [vmem:[#allocation2 + $0xff8] sm:$0xf0]  ;;  %v5390_v0 = vadd.f32 %v10648_v39, %v5361_v10  ;;  %v5363_v61 = vadd.f32 %v10655_v9, %v5334_v20  ;;  %v11223_v9 = vld [vmem:[#allocation45_spill] sm:$0xff] }
 0x3fe   :  { %v5495_v40 = vpop.f32.mrf.mxu2  ;;  %v5524_v34 = vpop.f32.mrf.mxu3  ;;  %5807 = vmatpush.bf16.msra.mxu1 %v7751_v24  ;;  %v8228_v55 = vld [vmem:[#allocation2 + $0xed8] sm:$0xf0]  ;;  %v9173_v44 = vld [vmem:[#allocation2 + $0xeac] sm:$0xf]  ;;  %v11225_v20 = vld [vmem:[#allocation35_spill] sm:$0xff] }
 0x3ff   :  { %v5439_v23 = vpop.f32.mrf.mxu0  ;;  %v10702_v60 = vadd.f32 %v5524_v34, %v5495_v40  ;;  %v5468_v46 = vpop.f32.mrf.mxu1  ;;  %v8231_v33 = vor.u32 %v9177_v56, %v8228_v55  ;;  %v5419_v39 = vadd.f32 %v10650_v3, %v5390_v0  ;;  %v5392_v51 = vadd.f32 %v10661_v53, %v5363_v61  ;;  %v11221_v3 = vld [vmem:[#allocation33_spill] sm:$0xff]  ;;  %v8212_v53 = vld [vmem:[#allocation2 + $0xeb8] sm:$0xf0]  ;;  %v9265_v10 = vld [vmem:[#allocation2 + $0x118c] sm:$0xf] }
 0x400   :  { %v5440_v5 = vadd.f32 %v5439_v23, %v5411_v49  ;;  %v8247_v49 = vor.u32 %v9181_v26, %v8244_v43  ;;  %5945 = vmatpush.bf16.msrb.mxu2 %v8503_v42  ;;  %v9213_v23 = vld [vmem:[#allocation2 + $0xfec] sm:$0xf]  ;;  %v8180_v61 = vld [vmem:[#allocation2 + $0xe78] sm:$0xf0] }
 0x401   :  { %5778 = vmatpush.bf16.msra.mxu0 %v7623_v30  ;;  %5865 = vmatpush.bf16.msra.mxu3 %v8007_v37  ;;  %v8356_v30 = vld [vmem:[#allocation2 + $0xfd8] sm:$0xf0]  ;;  %v9201_v56 = vld [vmem:[#allocation2 + $0xf8c] sm:$0xf] }
 0x402   :  { %v5469_v13 = vadd.f32 %v5468_v46, %v5440_v5  ;;  %v8375_v5 = vor.u32 %v9213_v23, %v8372_v14  ;;  %v9241_v46 = vld [vmem:[#allocation2 + $0x10cc] sm:$0xf]  ;;  %v8468_v37 = vld [vmem:[#allocation2 + $0x10b8] sm:$0xf0] }
 0x403   :  { %v8487_v48 = vor.u32 %v9241_v46, %v8484_v8 }
 0x404   :  { %6017 = vst [vmem:[%s10904_s2 + $0x70] sm:$0xff] %v5469_v13  ;;  %v9273_v13 = vld [vmem:[#allocation2 + $0x11cc] sm:$0xf]  ;;  %5916 = vmatpush.bf16.msrb.mxu1 %v8375_v5 }
 0x405   :  { %5887 = vmatpush.bf16.msrb.mxu0 %v8247_v49  ;;  %v8615_v15 = vor.u32 %v9273_v13, %v8612_v32  ;;  %5946 = vmatpush.bf16.msrb.mxu2 %v8487_v48  ;;  %v8324_v48 = vld [vmem:[#allocation2 + $0xf98] sm:$0xf0]  ;;  %v11224_v13 = vld [vmem:[#allocation34_spill] sm:$0xff] }
 0x406   :  { %v5497_v35 = vpop.f32.mrf.mxu2  ;;  %v5526_v28 = vpop.f32.mrf.mxu3  ;;  %v8327_v32 = vor.u32 %v9201_v56, %v8324_v48 }
 0x407   :  { %v5442_v54 = vpop.f32.mrf.mxu0  ;;  %v10712_v22 = vadd.f32 %v5526_v28, %v5497_v35  ;;  %v5471_v52 = vpop.f32.mrf.mxu1  ;;  %v9209_v35 = vld [vmem:[#allocation2 + $0xfcc] sm:$0xf]  ;;  %v11222_v28 = vld [vmem:[#allocation44_spill] sm:$0xff] }
 0x408   :  { %v5443_v16 = vadd.f32 %v5442_v54, %v5414_v2  ;;  %v8359_v29 = vor.u32 %v9209_v35, %v8356_v30  ;;  %v9237_v54 = vld [vmem:[#allocation2 + $0x10ac] sm:$0xf] }
 0x409   :  { %5888 = vmatpush.bf16.msrb.mxu0 %v8231_v33  ;;  %v8471_v24 = vor.u32 %v9237_v54, %v8468_v37  ;;  %v11226_v33 = vld [vmem:[#allocation48_spill] sm:$0xff]  ;;  %v9197_v54 = vld [vmem:[#allocation2 + $0xf6c] sm:$0xf] }
 0x40a   :  { %v5472_v6 = vadd.f32 %v5471_v52, %v5443_v16  ;;  %5673 = vmatmul.bf16.gmra.mxu0 %v11107_v18  ;;  %5702 = vmatmul.bf16.gmra.mxu1 %v11108_v19  ;;  %v5416_v18 = vadd.f32 %v10636_v12, %v5387_v36  ;;  %v9269_v16 = vld [vmem:[#allocation2 + $0x11ac] sm:$0xf]  ;;  %v8215_v36 = vor.u32 %v9173_v44, %v8212_v53  ;;  %v8308_v37 = vld [vmem:[#allocation2 + $0xf78] sm:$0xf0] }
 0x40b   :  { %5731 = vmatmul.bf16.gmra.mxu2 %v11172_v7  ;;  %5760 = vmatmul.bf16.gmra.mxu3 %v11173_v38  ;;  %v8628_v7 = vld [vmem:[#allocation2 + $0x11f8] sm:$0xf0]  ;;  %v8311_v44 = vor.u32 %v9197_v54, %v8308_v37  ;;  %v9225_v53 = vld [vmem:[#allocation2 + $0x104c] sm:$0xf] }
 0x40c   :  { %6021 = vst [vmem:[%s10904_s2 + $0x90] sm:$0xff] %v5472_v6  ;;  %v8631_v57 = vor.u32 %v9277_v47, %v8628_v7  ;;  %5917 = vmatpush.bf16.msrb.mxu1 %v8359_v29  ;;  %v8596_v6 = vld [vmem:[#allocation2 + $0x11b8] sm:$0xf0]  ;;  %5947 = vmatpush.bf16.msrb.mxu2 %v8471_v24  ;;  %v9205_v47 = vld [vmem:[#allocation2 + $0xfac] sm:$0xf] }
 0x40d   :  { %v8599_v25 = vor.u32 %v9269_v16, %v8596_v6  ;;  %5889 = vmatpush.bf16.msrb.mxu0 %v8215_v36  ;;  %v9233_v7 = vld [vmem:[#allocation2 + $0x108c] sm:$0xf]  ;;  %v8420_v16 = vld [vmem:[#allocation2 + $0x1058] sm:$0xf0] }
 0x40e   :  { %v5500_v19 = vpop.f32.mrf.mxu2  ;;  %v5529_v40 = vpop.f32.mrf.mxu3  ;;  %5974 = vmatpush.bf16.msrb.mxu3 %v8631_v57  ;;  %v8196_v57 = vld [vmem:[#allocation2 + $0xe98] sm:$0xf0]  ;;  %v9257_v6 = vld [vmem:[#allocation2 + $0x114c] sm:$0xf] }
 0x40f   :  { %v5444_v11 = vpop.f32.mrf.mxu0  ;;  %v10726_v62 = vadd.f32 %v5529_v40, %v5500_v19  ;;  %v5473_v34 = vpop.f32.mrf.mxu1  ;;  %v8452_v40 = vld [vmem:[#allocation2 + $0x1098] sm:$0xf0] }
 0x410   :  { %v5445_v38 = vadd.f32 %v5444_v11, %v5416_v18  ;;  %v8340_v18 = vld [vmem:[#allocation2 + $0xfb8] sm:$0xf0]  ;;  %v8455_v11 = vor.u32 %v9233_v7, %v8452_v40  ;;  %v9193_v7 = vld [vmem:[#allocation2 + $0xf4c] sm:$0xf] }
 0x411   :  { %v8343_v49 = vor.u32 %v9205_v47, %v8340_v18  ;;  %v8164_v36 = vld [vmem:[#allocation2 + $0xe58] sm:$0xf0] }
 0x412   :  { %v5474_v12 = vadd.f32 %v5473_v34, %v5445_v38  ;;  %5975 = vmatpush.bf16.msrb.mxu3 %v8615_v15  ;;  %v8580_v38 = vld [vmem:[#allocation2 + $0x1198] sm:$0xf0]  ;;  %5948 = vmatpush.bf16.msrb.mxu2 %v8455_v11  ;;  %v11227_v15 = vld [vmem:[#allocation49_spill] sm:$0xff]  ;;  %v11228_v11 = vld [vmem:[#allocation38_spill] sm:$0xff] }
 0x413   :  { %5918 = vmatpush.bf16.msrb.mxu1 %v8343_v49  ;;  %v8583_v23 = vor.u32 %v9265_v10, %v8580_v38  ;;  %v8292_v40 = vld [vmem:[#allocation2 + $0xf58] sm:$0xf0]  ;;  %v11229_v10 = vld [vmem:[#allocation39_spill] sm:$0xff] }
 0x414   :  { %6025 = vst [vmem:[%s10904_s2 + $0xb0] sm:$0xff] %v5474_v12  ;;  %v11230_v38 = vld [vmem:[#allocation52_spill] sm:$0xff] }
 0x415   :  { %v8260_v54 = vld [vmem:[#allocation2 + $0xf18] sm:$0xf0] }
 0x416   :  { %v5502_v1 = vpop.f32.mrf.mxu2  ;;  %v5531_v41 = vpop.f32.mrf.mxu3  ;;  %5976 = vmatpush.bf16.msrb.mxu3 %v8599_v25 }
 0x417   :  { %v5447_v17 = vpop.f32.mrf.mxu0  ;;  %v10736_v2 = vadd.f32 %v5531_v41, %v5502_v1  ;;  %v5476_v27 = vpop.f32.mrf.mxu1  ;;  %5919 = vmatpush.bf16.msrb.mxu1 %v8327_v32  ;;  %v8436_v1 = vld [vmem:[#allocation2 + $0x1078] sm:$0xf0]  ;;  %v9165_v41 = vld [vmem:[#allocation2 + $0xe6c] sm:$0xf] }
 0x418   :  { %v5448_v59 = vadd.f32 %v5447_v17, %v5419_v39  ;;  %v9229_v39 = vld [vmem:[#allocation2 + $0x106c] sm:$0xf]  ;;  %v8183_v35 = vor.u32 %v9165_v41, %v8180_v61  ;;  %v8276_v41 = vld [vmem:[#allocation2 + $0xf38] sm:$0xf0] }
 0x419   :  { %v8439_v17 = vor.u32 %v9229_v39, %v8436_v1  ;;  %v9189_v1 = vld [vmem:[#allocation2 + $0xf2c] sm:$0xf] }
 0x41a   :  { %v5477_v21 = vadd.f32 %v5476_v27, %v5448_v59  ;;  %5678 = vmatmul.bf16.gmra.mxu0 %v11111_v58  ;;  %5707 = vmatmul.bf16.gmra.mxu1 %v11221_v3  ;;  %v5421_v58 = vadd.f32 %v10663_v63, %v5392_v51  ;;  %v9169_v63 = vld [vmem:[#allocation2 + $0xe8c] sm:$0xf]  ;;  %v8564_v59 = vld [vmem:[#allocation2 + $0x1178] sm:$0xf0]  ;;  %v8279_v61 = vor.u32 %v9189_v1, %v8276_v41 }
 0x41b   :  { %5736 = vmatmul.bf16.gmra.mxu2 %v11222_v28  ;;  %5765 = vmatmul.bf16.gmra.mxu3 %v11223_v9  ;;  %v8199_v34 = vor.u32 %v9169_v63, %v8196_v57  ;;  %v8295_v57 = vor.u32 %v9193_v7, %v8292_v40 }
 0x41c   :  { %6029 = vst [vmem:[%s10904_s2 + $0xd0] sm:$0xff] %v5477_v21  ;;  %5977 = vmatpush.bf16.msrb.mxu3 %v8583_v23  ;;  %5949 = vmatpush.bf16.msrb.mxu2 %v8439_v17  ;;  %v9221_v23 = vld [vmem:[#allocation2 + $0x102c] sm:$0xf] }
 0x41d   :  { %5890 = vmatpush.bf16.msrb.mxu0 %v8199_v34  ;;  %5920 = vmatpush.bf16.msrb.mxu1 %v8311_v44  ;;  %v11231_v34 = vld [vmem:[#allocation53_spill] sm:$0xff] }
 0x41e   :  { %v5505_v52 = vpop.f32.mrf.mxu2  ;;  %v5534_v31 = vpop.f32.mrf.mxu3 }
 0x41f   :  { %v5449_v4 = vpop.f32.mrf.mxu0  ;;  %v10747_v42 = vadd.f32 %v5534_v31, %v5505_v52  ;;  %v5478_v43 = vpop.f32.mrf.mxu1  ;;  %v8423_v52 = vor.u32 %v9225_v53, %v8420_v16  ;;  %v8548_v31 = vld [vmem:[#allocation2 + $0x1158] sm:$0xf0] }
 0x420   :  { %v5450_v26 = vadd.f32 %v5449_v4, %v5421_v58  ;;  %v9161_v58 = vld [vmem:[#allocation2 + $0xe4c] sm:$0xf]  ;;  %v8551_v25 = vor.u32 %v9257_v6, %v8548_v31  ;;  %v11233_v31 = vld [vmem:[#allocation43_spill] sm:$0xff] }
 0x421   :  { %5891 = vmatpush.bf16.msrb.mxu0 %v8183_v35  ;;  %v8167_v4 = vor.u32 %v9161_v58, %v8164_v36  ;;  %5950 = vmatpush.bf16.msrb.mxu2 %v8423_v52  ;;  %v11232_v6 = vld [vmem:[#allocation42_spill] sm:$0xff] }
 0x422   :  { %v5479_v19 = vadd.f32 %v5478_v43, %v5450_v26  ;;  %5921 = vmatpush.bf16.msrb.mxu1 %v8295_v57 }
 0x424   :  { %6033 = vst [vmem:[%s10904_s2 + $0xf0] sm:$0xff] %v5479_v19 }
 0x425   :  { %5892 = vmatpush.bf16.msrb.mxu0 %v8167_v4  ;;  %v11234_v4 = vld [vmem:[#allocation56_spill] sm:$0xff] }
 0x426   :  { %v5507_v14 = vpop.f32.mrf.mxu2  ;;  %v5536_v0 = vpop.f32.mrf.mxu3  ;;  %5922 = vmatpush.bf16.msrb.mxu1 %v8279_v61 }
 0x427   :  { %v5548_v12 = vpop.f32.mrf.mxu0  ;;  %v10752_v5 = vadd.f32 %v5536_v0, %v5507_v14  ;;  %v5577_v8 = vpop.f32.mrf.mxu1  ;;  %v8404_v14 = vld [vmem:[#allocation2 + $0x1038] sm:$0xf0]  ;;  %v9157_v0 = vld [vmem:[#allocation2 + $0xe2c] sm:$0xf] }
 0x428   :  { %v5549_v46 = vadd.f32 %v5548_v12, %v10678_v50  ;;  %v9261_v50 = vld [vmem:[#allocation2 + $0x116c] sm:$0xf]  ;;  %v8148_v12 = vld [vmem:[#allocation2 + $0xe38] sm:$0xf0] }
 0x429   :  { %v8567_v30 = vor.u32 %v9261_v50, %v8564_v59  ;;  %v8151_v48 = vor.u32 %v9157_v0, %v8148_v12  ;;  %v9217_v50 = vld [vmem:[#allocation2 + $0x100c] sm:$0xf]  ;;  %v8388_v59 = vld [vmem:[#allocation2 + $0x1018] sm:$0xf0]  ;;  %v11237_v0 = vld [vmem:[#allocation47_spill] sm:$0xff] }
 0x42a   :  { %v5578_v55 = vadd.f32 %v5577_v8, %v5549_v46  ;;  %5779 = vmatmul.bf16.vlgmr.msra.gmra.mxu0 %v11224_v13  ;;  %5808 = vmatmul.bf16.vlgmr.msra.gmra.mxu1 %v11225_v20  ;;  %v9253_v46 = vld [vmem:[#allocation2 + $0x112c] sm:$0xf]  ;;  %v8532_v8 = vld [vmem:[#allocation2 + $0x1138] sm:$0xf0]  ;;  %v8391_v35 = vor.u32 %v9217_v50, %v8388_v59  ;;  %v11241_v59 = vld [vmem:[#allocation51_spill] sm:$0xff] }
 0x42b   :  { %5837 = vmatmul.bf16.vlgmr.msra.gmra.mxu2 %v11226_v33  ;;  %5866 = vmatmul.bf16.vlgmr.msra.gmra.mxu3 %v11227_v15  ;;  %v11240_v50 = vld [vmem:[#allocation50_spill] sm:$0xff] }
 0x42c   :  { %5978 = vmatpush.bf16.msrb.mxu3 %v8567_v30  ;;  %5893 = vmatpush.bf16.msrb.mxu0 %v8151_v48  ;;  %v8132_v30 = vld [vmem:[#allocation2 + $0xe18] sm:$0xf0] }
 0x42e   :  { %v5606_v27 = vpop.f32.mrf.mxu2  ;;  %v5635_v21 = vpop.f32.mrf.mxu3 }
 0x42f   :  { %v5607_v51 = vadd.f32 %v5606_v27, %v5578_v55  ;;  %v5550_v29 = vpop.f32.mrf.mxu0  ;;  %v5579_v28 = vpop.f32.mrf.mxu1  ;;  %v8535_v55 = vor.u32 %v9253_v46, %v8532_v8  ;;  %v9153_v27 = vld [vmem:[#allocation2 + $0xe0c] sm:$0xf] }
 0x430   :  { %v5551_v3 = vadd.f32 %v5550_v29, %v10688_v45  ;;  %5979 = vmatpush.bf16.msrb.mxu3 %v8551_v25  ;;  %v8135_v29 = vor.u32 %v9153_v27, %v8132_v30  ;;  %v11235_v25 = vld [vmem:[#allocation57_spill] sm:$0xff]  ;;  %v11242_v27 = vld [vmem:[#allocation64_spill] sm:$0xff] }
 0x431   :  { %v10760_v9 = vadd.f32 %v5635_v21, %v5607_v51  ;;  %v9249_v51 = vld [vmem:[#allocation2 + $0x110c] sm:$0xf]  ;;  %v8516_v21 = vld [vmem:[#allocation2 + $0x1118] sm:$0xf0] }
 0x432   :  { %v5580_v24 = vadd.f32 %v5579_v28, %v5551_v3  ;;  %v8519_v3 = vor.u32 %v9249_v51, %v8516_v21  ;;  %5894 = vmatpush.bf16.msrb.mxu0 %v8135_v29  ;;  %v9185_v28 = vld [vmem:[#allocation2 + $0xf0c] sm:$0xf] }
 0x433   :  { %v8263_v53 = vor.u32 %v9185_v28, %v8260_v54 }
 0x434   :  { %5980 = vmatpush.bf16.msrb.mxu3 %v8535_v55 }
 0x435   :  { %5923 = vmatpush.bf16.msrb.mxu1 %v8263_v53 }
 0x436   :  { %v5608_v45 = vpop.f32.mrf.mxu2  ;;  %v5637_v43 = vpop.f32.mrf.mxu3 }
 0x437   :  { %v5609_v26 = vadd.f32 %v5608_v45, %v5580_v24  ;;  %v5553_v47 = vpop.f32.mrf.mxu0  ;;  %v5582_v19 = vpop.f32.mrf.mxu1 }
 0x438   :  { %v5554_v18 = vadd.f32 %v5553_v47, %v10702_v60  ;;  %v8407_v60 = vor.u32 %v9221_v23, %v8404_v14  ;;  %5981 = vmatpush.bf16.msrb.mxu3 %v8519_v3  ;;  %v11236_v14 = vld [vmem:[#allocation46_spill] sm:$0xff] }
 0x439   :  { %v10763_v49 = vadd.f32 %v5637_v43, %v5609_v26 }
 0x43a   :  { %v5583_v63 = vadd.f32 %v5582_v19, %v5554_v18  ;;  %5784 = vmatmul.bf16.gmra.mxu0 %v11228_v11  ;;  %5813 = vmatmul.bf16.gmra.mxu1 %v11229_v10 }
 0x43b   :  { %5842 = vmatmul.bf16.gmra.mxu2 %v11230_v38  ;;  %5871 = vmatmul.bf16.gmra.mxu3 %v11231_v34 }
 0x43c   :  { %5951 = vmatpush.bf16.msrb.mxu2 %v8407_v60  ;;  %v11238_v60 = vld [vmem:[#allocation60_spill] sm:$0xff] }
 0x43e   :  { %v5611_v56 = vpop.f32.mrf.mxu2  ;;  %v5640_v32 = vpop.f32.mrf.mxu3 }
 0x43f   :  { %v5612_v13 = vadd.f32 %v5611_v56, %v5583_v63  ;;  %v5555_v20 = vpop.f32.mrf.mxu0  ;;  %v5584_v15 = vpop.f32.mrf.mxu1 }
 0x440   :  { %v5556_v33 = vadd.f32 %v5555_v20, %v10712_v22  ;;  %5952 = vmatpush.bf16.msrb.mxu2 %v8391_v35 }
 0x441   :  { %v10770_v39 = vadd.f32 %v5640_v32, %v5612_v13 }
 0x442   :  { %v5585_v17 = vadd.f32 %v5584_v15, %v5556_v33 }
 0x446   :  { %v5613_v22 = vpop.f32.mrf.mxu2  ;;  %v5642_v24 = vpop.f32.mrf.mxu3 }
 0x447   :  { %v5614_v37 = vadd.f32 %v5613_v22, %v5585_v17  ;;  %v5558_v44 = vpop.f32.mrf.mxu0  ;;  %v5587_v58 = vpop.f32.mrf.mxu1 }
 0x448   :  { %v5559_v16 = vadd.f32 %v5558_v44, %v10726_v62 }
 0x449   :  { %v10773_v52 = vadd.f32 %v5642_v24, %v5614_v37 }
 0x44a   :  { %v5588_v36 = vadd.f32 %v5587_v58, %v5559_v16  ;;  %5789 = vmatmul.bf16.gmra.mxu0 %v11232_v6  ;;  %5818 = vmatmul.bf16.gmra.mxu1 %v11233_v31  ;;  %v11245_v6 = vld [vmem:[#allocation55_spill] sm:$0xff]  ;;  %v11246_v31 = vld [vmem:[#allocation66_spill] sm:$0xff] }
 0x44b   :  { %5847 = vmatmul.bf16.gmra.mxu2 %v11234_v4  ;;  %5876 = vmatmul.bf16.gmra.mxu3 %v11235_v25 }
 0x44e   :  { %v5616_v45 = vpop.f32.mrf.mxu2  ;;  %v5645_v43 = vpop.f32.mrf.mxu3 }
 0x44f   :  { %v5617_v26 = vadd.f32 %v5616_v45, %v5588_v36  ;;  %v5560_v47 = vpop.f32.mrf.mxu0  ;;  %v5589_v62 = vpop.f32.mrf.mxu1  ;;  %v11244_v36 = vld [vmem:[#allocation54_spill] sm:$0xff] }
 0x450   :  { %v5561_v18 = vadd.f32 %v5560_v47, %v10736_v2  ;;  %v11239_v2 = vld [vmem:[#allocation61_spill] sm:$0xff] }
 0x451   :  { %v10780_v19 = vadd.f32 %v5645_v43, %v5617_v26 }
 0x452   :  { %v5590_v7 = vadd.f32 %v5589_v62, %v5561_v18 }
 0x456   :  { %v5618_v40 = vpop.f32.mrf.mxu2  ;;  %v5647_v11 = vpop.f32.mrf.mxu3 }
 0x457   :  { %v5619_v63 = vadd.f32 %v5618_v40, %v5590_v7  ;;  %v5563_v57 = vpop.f32.mrf.mxu0  ;;  %v5592_v38 = vpop.f32.mrf.mxu1 }
 0x458   :  { %v5564_v10 = vadd.f32 %v5563_v57, %v10747_v42 }
 0x459   :  { %v10783_v34 = vadd.f32 %v5647_v11, %v5619_v63 }
 0x45a   :  { %v5593_v23 = vadd.f32 %v5592_v38, %v5564_v10  ;;  %5794 = vmatmul.bf16.gmra.mxu0 %v11236_v14  ;;  %5823 = vmatmul.bf16.gmra.mxu1 %v11237_v0  ;;  %v11249_v14 = vld [vmem:[#allocation59_spill] sm:$0xff]  ;;  %v11250_v0 = vld [vmem:[#allocation68_spill] sm:$0xff] }
 0x45b   :  { %5852 = vmatmul.bf16.gmra.mxu2 %v11238_v60  ;;  %5881 = vmatmul.bf16.gmra.mxu3 %v11239_v2 }
 0x45e   :  { %v5621_v12 = vpop.f32.mrf.mxu2  ;;  %v5650_v8 = vpop.f32.mrf.mxu3 }
 0x45f   :  { %v5622_v46 = vadd.f32 %v5621_v12, %v5593_v23  ;;  %v5565_v56 = vpop.f32.mrf.mxu0  ;;  %v5594_v55 = vpop.f32.mrf.mxu1  ;;  %v11248_v23 = vld [vmem:[#allocation58_spill] sm:$0xff] }
 0x460   :  { %v5566_v48 = vadd.f32 %v5565_v56, %v10752_v5  ;;  %v11243_v5 = vld [vmem:[#allocation65_spill] sm:$0xff] }
 0x461   :  { %v10790_v42 = vadd.f32 %v5650_v8, %v5622_v46 }
 0x462   :  { %v5595_v13 = vadd.f32 %v5594_v55, %v5566_v48 }
 0x466   :  { %v5623_v32 = vpop.f32.mrf.mxu2  ;;  %v5652_v33 = vpop.f32.mrf.mxu3 }
 0x467   :  { %v5624_v20 = vadd.f32 %v5623_v32, %v5595_v13  ;;  %v5664_v15 = vpop.f32.mrf.mxu0  ;;  %v5693_v41 = vpop.f32.mrf.mxu1 }
 0x468   :  { %v5665_v1 = vadd.f32 %v5664_v15, %v10760_v9 }
 0x469   :  { %v10793_v17 = vadd.f32 %v5652_v33, %v5624_v20 }
 0x46a   :  { %v5694_v61 = vadd.f32 %v5693_v41, %v5665_v1  ;;  %5895 = vmatmul.bf16.vlgmr.msrb.gmra.mxu0 %v11240_v50  ;;  %5924 = vmatmul.bf16.vlgmr.msrb.gmra.mxu1 %v11241_v59  ;;  %v11253_v50 = vld [vmem:[#allocation63_spill] sm:$0xff]  ;;  %v11254_v59 = vld [vmem:[#allocation70_spill] sm:$0xff] }
 0x46b   :  { %5953 = vmatmul.bf16.vlgmr.msrb.gmra.mxu2 %v11242_v27  ;;  %5982 = vmatmul.bf16.vlgmr.msrb.gmra.mxu3 %v11243_v5 }
 0x46e   :  { %v5722_v35 = vpop.f32.mrf.mxu2  ;;  %v5751_v51 = vpop.f32.mrf.mxu3 }
 0x46f   :  { %v5723_v30 = vadd.f32 %v5722_v35, %v5694_v61  ;;  %v5666_v21 = vpop.f32.mrf.mxu0  ;;  %v5695_v3 = vpop.f32.mrf.mxu1  ;;  %v11252_v61 = vld [vmem:[#allocation62_spill] sm:$0xff] }
 0x470   :  { %v5667_v29 = vadd.f32 %v5666_v21, %v10763_v49  ;;  %v11247_v49 = vld [vmem:[#allocation67_spill] sm:$0xff] }
 0x471   :  { %v10800_v9 = vadd.f32 %v5751_v51, %v5723_v30 }
 0x472   :  { %v5696_v22 = vadd.f32 %v5695_v3, %v5667_v29 }
 0x476   :  { %v5724_v28 = vpop.f32.mrf.mxu2  ;;  %v5753_v37 = vpop.f32.mrf.mxu3 }
 0x477   :  { %v5725_v54 = vadd.f32 %v5724_v28, %v5696_v22  ;;  %v5669_v24 = vpop.f32.mrf.mxu0  ;;  %v5698_v53 = vpop.f32.mrf.mxu1 }
 0x478   :  { %v5670_v44 = vadd.f32 %v5669_v24, %v10770_v39 }
 0x479   :  { %v10803_v16 = vadd.f32 %v5753_v37, %v5725_v54 }
 0x47a   :  { %v5699_v58 = vadd.f32 %v5698_v53, %v5670_v44  ;;  %5900 = vmatmul.bf16.gmra.mxu0 %v11244_v36  ;;  %5929 = vmatmul.bf16.gmra.mxu1 %v11245_v6 }
 0x47b   :  { %5958 = vmatmul.bf16.gmra.mxu2 %v11246_v31  ;;  %5987 = vmatmul.bf16.gmra.mxu3 %v11247_v49 }
 0x47e   :  { %v5727_v4 = vpop.f32.mrf.mxu2  ;;  %v5756_v45 = vpop.f32.mrf.mxu3 }
 0x47f   :  { %v5728_v25 = vadd.f32 %v5727_v4, %v5699_v58  ;;  %v5671_v26 = vpop.f32.mrf.mxu0  ;;  %v5700_v47 = vpop.f32.mrf.mxu1 }
 0x480   :  { %v5672_v43 = vadd.f32 %v5671_v26, %v10773_v52  ;;  %v11251_v52 = vld [vmem:[#allocation69_spill] sm:$0xff] }
 0x481   :  { %v10810_v39 = vadd.f32 %v5756_v45, %v5728_v25 }
 0x482   :  { %v5701_v18 = vadd.f32 %v5700_v47, %v5672_v43 }
 0x486   :  { %v5729_v62 = vpop.f32.mrf.mxu2  ;;  %v5758_v40 = vpop.f32.mrf.mxu3 }
 0x487   :  { %v5730_v7 = vadd.f32 %v5729_v62, %v5701_v18  ;;  %v5674_v63 = vpop.f32.mrf.mxu0  ;;  %v5703_v57 = vpop.f32.mrf.mxu1 }
 0x488   :  { %v5675_v11 = vadd.f32 %v5674_v63, %v10780_v19 }
 0x489   :  { %v10813_v10 = vadd.f32 %v5758_v40, %v5730_v7 }
 0x48a   :  { %v5704_v38 = vadd.f32 %v5703_v57, %v5675_v11  ;;  %5905 = vmatmul.bf16.gmra.mxu0 %v11248_v23  ;;  %5934 = vmatmul.bf16.gmra.mxu1 %v11249_v14 }
 0x48b   :  { %5963 = vmatmul.bf16.gmra.mxu2 %v11250_v0  ;;  %5992 = vmatmul.bf16.gmra.mxu3 %v11251_v52 }
 0x48e   :  { %v5732_v60 = vpop.f32.mrf.mxu2  ;;  %v5761_v12 = vpop.f32.mrf.mxu3 }
 0x48f   :  { %v5733_v2 = vadd.f32 %v5732_v60, %v5704_v38  ;;  %v5676_v46 = vpop.f32.mrf.mxu0  ;;  %v5705_v56 = vpop.f32.mrf.mxu1 }
 0x490   :  { %v5677_v8 = vadd.f32 %v5676_v46, %v10783_v34  ;;  %v11255_v34 = vld [vmem:[#allocation71_spill] sm:$0xff] }
 0x491   :  { %v10820_v19 = vadd.f32 %v5761_v12, %v5733_v2 }
 0x492   :  { %v5706_v48 = vadd.f32 %v5705_v56, %v5677_v8 }
 0x496   :  { %v5734_v55 = vpop.f32.mrf.mxu2  ;;  %v5763_v32 = vpop.f32.mrf.mxu3 }
 0x497   :  { %v5735_v13 = vadd.f32 %v5734_v55, %v5706_v48  ;;  %v5679_v20 = vpop.f32.mrf.mxu0  ;;  %v5708_v15 = vpop.f32.mrf.mxu1 }
 0x498   :  { %v5680_v33 = vadd.f32 %v5679_v20, %v10790_v42 }
 0x499   :  { %v10823_v1 = vadd.f32 %v5763_v32, %v5735_v13 }
 0x49a   :  { %v5709_v41 = vadd.f32 %v5708_v15, %v5680_v33  ;;  %5910 = vmatmul.bf16.gmra.mxu0 %v11252_v61  ;;  %5939 = vmatmul.bf16.gmra.mxu1 %v11253_v50 }
 0x49b   :  { %5968 = vmatmul.bf16.gmra.mxu2 %v11254_v59  ;;  %5997 = vmatmul.bf16.gmra.mxu3 %v11255_v34 }
 0x49e   :  { %v5737_v27 = vpop.f32.mrf.mxu2  ;;  %v5766_v35 = vpop.f32.mrf.mxu3 }
 0x49f   :  { %v5738_v5 = vadd.f32 %v5737_v27, %v5709_v41  ;;  %v5681_v30 = vpop.f32.mrf.mxu0  ;;  %v5710_v21 = vpop.f32.mrf.mxu1 }
 0x4a0   :  { %v5682_v51 = vadd.f32 %v5681_v30, %v10793_v17 }
 0x4a1   :  { %v10830_v42 = vadd.f32 %v5766_v35, %v5738_v5 }
 0x4a2   :  { %v5711_v29 = vadd.f32 %v5710_v21, %v5682_v51 }
 0x4a6   :  { %v5739_v3 = vpop.f32.mrf.mxu2  ;;  %v5768_v28 = vpop.f32.mrf.mxu3 }
 0x4a7   :  { %v5740_v22 = vadd.f32 %v5739_v3, %v5711_v29  ;;  %v5780_v54 = vpop.f32.mrf.mxu0  ;;  %v5809_v37 = vpop.f32.mrf.mxu1 }
 0x4a8   :  { %v5781_v0 = vadd.f32 %v5780_v54, %v10800_v9 }
 0x4a9   :  { %v10832_v24 = vadd.f32 %v5768_v28, %v5740_v22 }
 0x4aa   :  { %v5810_v46 = vadd.f32 %v5809_v37, %v5781_v0 }
 0x4ae   :  { %v5838_v44 = vpop.f32.mrf.mxu2  ;;  %v5867_v53 = vpop.f32.mrf.mxu3 }
 0x4af   :  { %v5782_v58 = vpop.f32.mrf.mxu0  ;;  %v5811_v36 = vpop.f32.mrf.mxu1  ;;  %v5839_v8 = vadd.f32 %v5838_v44, %v5810_v46 }
 0x4b0   :  { %v5783_v56 = vadd.f32 %v5782_v58, %v10803_v16 }
 0x4b1   :  { %v5868_v55 = vadd.f32 %v5867_v53, %v5839_v8 }
 0x4b2   :  { %v5812_v9 = vadd.f32 %v5811_v36, %v5783_v56 }
 0x4b6   :  { %v5840_v6 = vpop.f32.mrf.mxu2  ;;  %v5869_v31 = vpop.f32.mrf.mxu3 }
 0x4b7   :  { %v5785_v49 = vpop.f32.mrf.mxu0  ;;  %v5814_v4 = vpop.f32.mrf.mxu1  ;;  %v5841_v15 = vadd.f32 %v5840_v6, %v5812_v9 }
 0x4b8   :  { %v5786_v41 = vadd.f32 %v5785_v49, %v10810_v39 }
 0x4b9   :  { %v5870_v59 = vadd.f32 %v5869_v31, %v5841_v15 }
 0x4ba   :  { %v5815_v16 = vadd.f32 %v5814_v4, %v5786_v41 }
 0x4be   :  { %v5843_v17 = vpop.f32.mrf.mxu2  ;;  %v5872_v25 = vpop.f32.mrf.mxu3 }
 0x4bf   :  { %v5787_v45 = vpop.f32.mrf.mxu0  ;;  %v5816_v26 = vpop.f32.mrf.mxu1  ;;  %v5844_v21 = vadd.f32 %v5843_v17, %v5815_v16 }
 0x4c0   :  { %v5788_v29 = vadd.f32 %v5787_v45, %v10813_v10 }
 0x4c1   :  { %v5873_v39 = vadd.f32 %v5872_v25, %v5844_v21 }
 0x4c2   :  { %v5817_v53 = vadd.f32 %v5816_v26, %v5788_v29 }
 0x4c6   :  { %v5845_v43 = vpop.f32.mrf.mxu2  ;;  %v5874_v47 = vpop.f32.mrf.mxu3 }
 0x4c7   :  { %v5790_v18 = vpop.f32.mrf.mxu0  ;;  %v5819_v62 = vpop.f32.mrf.mxu1  ;;  %v5846_v6 = vadd.f32 %v5845_v43, %v5817_v53 }
 0x4c8   :  { %v5791_v31 = vadd.f32 %v5790_v18, %v10820_v19 }
 0x4c9   :  { %v5875_v10 = vadd.f32 %v5874_v47, %v5846_v6 }
 0x4ca   :  { %v5820_v46 = vadd.f32 %v5819_v62, %v5791_v31 }
 0x4ce   :  { %v5848_v7 = vpop.f32.mrf.mxu2  ;;  %v10834_v40 = vpop.f32.mrf.mxu3 }
 0x4cf   :  { %v5792_v63 = vpop.f32.mrf.mxu0  ;;  %v10836_v11 = vpop.f32.mrf.mxu1  ;;  %v5849_v26 = vadd.f32 %v5848_v7, %v5820_v46 }
 0x4d0   :  { %v5793_v43 = vadd.f32 %v5792_v63, %v10823_v1 }
 0x4d1   :  { %v5878_v19 = vadd.f32 %v10834_v40, %v5849_v26 }
 0x4d6   :  { %v10838_v57 = vpop.f32.mrf.mxu2  ;;  %v10840_v38 = vpop.f32.mrf.mxu3 }
 0x4d7   :  { %v10842_v23 = vpop.f32.mrf.mxu0  ;;  %v10844_v14 = vpop.f32.mrf.mxu1 }
 0x4d8   :  { %v5796_v1 = vadd.f32 %v10842_v23, %v10830_v42 }
 0x4de   :  { %v10847_v52 = vpop.f32.mrf.mxu2  ;;  %v10849_v60 = vpop.f32.mrf.mxu3 }
 0x4df   :  { %v10851_v2 = vpop.f32.mrf.mxu0  ;;  %v10853_v12 = vpop.f32.mrf.mxu1 }
 0x4e0   :  { %v5798_v42 = vadd.f32 %v10851_v2, %v10832_v24 }
 0x4e6   :  { %v10856_v48 = vpop.f32.mrf.mxu2  ;;  %v10858_v13 = vpop.f32.mrf.mxu3 }
 0x4e7   :  { %v5896_v32 = vpop.f32.mrf.mxu0  ;;  %v5925_v20 = vpop.f32.mrf.mxu1 }
 0x4e8   :  { %v5897_v33 = vadd.f32 %v5896_v32, %v5868_v55 }
 0x4ea   :  { %v5926_v61 = vadd.f32 %v5925_v20, %v5897_v33  ;;  %v5822_v33 = vadd.f32 %v10836_v11, %v5793_v43  ;;  %v5825_v11 = vadd.f32 %v10844_v14, %v5796_v1  ;;  %v5827_v14 = vadd.f32 %v10853_v12, %v5798_v42 }
 0x4ec   :  { %v5851_v7 = vadd.f32 %v10838_v57, %v5822_v33  ;;  %v5854_v57 = vadd.f32 %v10847_v52, %v5825_v11  ;;  %v5856_v52 = vadd.f32 %v10856_v48, %v5827_v14 }
 0x4ee   :  { %v5954_v50 = vpop.f32.mrf.mxu2  ;;  %v5983_v27 = vpop.f32.mrf.mxu3  ;;  %v5880_v40 = vadd.f32 %v10840_v38, %v5851_v7  ;;  %v5883_v38 = vadd.f32 %v10849_v60, %v5854_v57  ;;  %v5885_v2 = vadd.f32 %v10858_v13, %v5856_v52 }
 0x4ef   :  { %v5955_v34 = vadd.f32 %v5954_v50, %v5926_v61  ;;  %v5898_v5 = vpop.f32.mrf.mxu0  ;;  %v5927_v35 = vpop.f32.mrf.mxu1 }
 0x4f0   :  { %v5899_v51 = vadd.f32 %v5898_v5, %v5870_v59 }
 0x4f1   :  { %v5984_v30 = vadd.f32 %v5983_v27, %v5955_v34 }
 0x4f2   :  { %v5928_v3 = vadd.f32 %v5927_v35, %v5899_v51 }
 0x4f3   :  { %6006 = vst [vmem:[%s10904_s2 + $0x18] sm:$0xff] %v5984_v30 }
 0x4f6   :  { %v5956_v22 = vpop.f32.mrf.mxu2  ;;  %v5985_v54 = vpop.f32.mrf.mxu3 }
 0x4f7   :  { %v5957_v28 = vadd.f32 %v5956_v22, %v5928_v3  ;;  %v5901_v37 = vpop.f32.mrf.mxu0  ;;  %v5930_v44 = vpop.f32.mrf.mxu1 }
 0x4f8   :  { %v5902_v36 = vadd.f32 %v5901_v37, %v5873_v39 }
 0x4f9   :  { %v5986_v58 = vadd.f32 %v5985_v54, %v5957_v28 }
 0x4fa   :  { %v5931_v49 = vadd.f32 %v5930_v44, %v5902_v36 }
 0x4fb   :  { %6010 = vst [vmem:[%s10904_s2 + $0x38] sm:$0xff] %v5986_v58 }
 0x4fe   :  { %v5959_v4 = vpop.f32.mrf.mxu2  ;;  %v5988_v45 = vpop.f32.mrf.mxu3 }
 0x4ff   :  { %v5960_v17 = vadd.f32 %v5959_v4, %v5931_v49  ;;  %v5903_v25 = vpop.f32.mrf.mxu0  ;;  %v5932_v0 = vpop.f32.mrf.mxu1 }
 0x500   :  { %v5904_v56 = vadd.f32 %v5903_v25, %v5875_v10 }
 0x501   :  { %v5989_v8 = vadd.f32 %v5988_v45, %v5960_v17 }
 0x502   :  { %v5933_v55 = vadd.f32 %v5932_v0, %v5904_v56 }
 0x503   :  { %6014 = vst [vmem:[%s10904_s2 + $0x58] sm:$0xff] %v5989_v8 }
 0x506   :  { %v5961_v32 = vpop.f32.mrf.mxu2  ;;  %v5990_v47 = vpop.f32.mrf.mxu3 }
 0x507   :  { %v5962_v18 = vadd.f32 %v5961_v32, %v5933_v55  ;;  %v5906_v20 = vpop.f32.mrf.mxu0  ;;  %v5935_v9 = vpop.f32.mrf.mxu1 }
 0x508   :  { %v5907_v15 = vadd.f32 %v5906_v20, %v5878_v19 }
 0x509   :  { %v5991_v62 = vadd.f32 %v5990_v47, %v5962_v18 }
 0x50a   :  { %v5936_v63 = vadd.f32 %v5935_v9, %v5907_v15 }
 0x50b   :  { %6018 = vst [vmem:[%s10904_s2 + $0x78] sm:$0xff] %v5991_v62 }
 0x50e   :  { %v5964_v41 = vpop.f32.mrf.mxu2  ;;  %v5993_v50 = vpop.f32.mrf.mxu3 }
 0x50f   :  { %v5965_v61 = vadd.f32 %v5964_v41, %v5936_v63  ;;  %v5908_v59 = vpop.f32.mrf.mxu0  ;;  %v5937_v34 = vpop.f32.mrf.mxu1 }
 0x510   :  { %v5909_v5 = vadd.f32 %v5908_v59, %v5880_v40 }
 0x511   :  { %v5994_v27 = vadd.f32 %v5993_v50, %v5965_v61 }
 0x512   :  { %v5938_v23 = vadd.f32 %v5937_v34, %v5909_v5 }
 0x513   :  { %6022 = vst [vmem:[%s10904_s2 + $0x98] sm:$0xff] %v5994_v27 }
 0x516   :  { %v5966_v35 = vpop.f32.mrf.mxu2  ;;  %v5995_v30 = vpop.f32.mrf.mxu3 }
 0x517   :  { %v5967_v16 = vadd.f32 %v5966_v35, %v5938_v23  ;;  %v5911_v51 = vpop.f32.mrf.mxu0  ;;  %v5940_v3 = vpop.f32.mrf.mxu1 }
 0x518   :  { %v5912_v29 = vadd.f32 %v5911_v51, %v5883_v38 }
 0x519   :  { %v5996_v21 = vadd.f32 %v5995_v30, %v5967_v16 }
 0x51a   :  { %v5941_v22 = vadd.f32 %v5940_v3, %v5912_v29 }
 0x51b   :  { %6026 = vst [vmem:[%s10904_s2 + $0xb8] sm:$0xff] %v5996_v21 }
 0x51e   :  { %v5969_v24 = vpop.f32.mrf.mxu2  ;;  %v5998_v60 = vpop.f32.mrf.mxu3 }
 0x51f   :  { %v5970_v39 = vadd.f32 %v5969_v24, %v5941_v22  ;;  %v5913_v28 = vpop.f32.mrf.mxu0  ;;  %v5942_v12 = vpop.f32.mrf.mxu1 }
 0x520   :  { %v5914_v37 = vadd.f32 %v5913_v28, %v5885_v2 }
 0x521   :  { %v5999_v54 = vadd.f32 %v5998_v60, %v5970_v39 }
 0x522   :  { %v5943_v44 = vadd.f32 %v5942_v12, %v5914_v37 }
 0x523   :  { %6030 = vst [vmem:[%s10904_s2 + $0xd8] sm:$0xff] %v5999_v54 }
 0x526   :  { %v5971_v48 = vpop.f32.mrf.mxu2  ;;  %v6000_v58 = vpop.f32.mrf.mxu3 }
 0x527   :  { %v5972_v53 = vadd.f32 %v5971_v48, %v5943_v44 }
 0x529   :  { %v6001_v36 = vadd.f32 %v6000_v58, %v5972_v53 }
 0x52b   :  { %6034 = vst [vmem:[%s10904_s2 + $0xf8] sm:$0xff] %v6001_v36 }
 0x52c   :  { %6039 = vsyncpa [#allocation3], 1 }

</bundles_post_ra>
